<compile_context>
chip_gen: v7x
topology: tpu7x:2x2x1
jax: 0.10.0
libtpu: 0.0.40
codegen_flags: <defaults>
</compile_context>

<pallas_src>
import math

import jax
import jax.numpy as jnp
from jax import lax
from jax.experimental import pallas as pl
from jax.experimental.pallas import tpu as pltpu

# ----------------------- small synthetic BERT config -----------------------
VOCAB = 32
MAX_POS = 16
TYPE_VOCAB = 2
HIDDEN = 128
NUM_HEADS = 2
HEAD_DIM = HIDDEN // NUM_HEADS
INTERMEDIATE = 256
NUM_LAYERS = 2
NUM_LABELS = 6
SEQ = 8
LN_EPS = 1e-12

F32 = jnp.float32
BF16 = jnp.bfloat16


def _layer_norm(x, g, b):
    mu = jnp.mean(x, axis=-1, keepdims=True)
    var = jnp.mean(jnp.square(x - mu), axis=-1, keepdims=True)
    return (x - mu) * lax.rsqrt(var + LN_EPS) * g + b


# ------------------------------- fused kernel -------------------------------
def bert_forward_kernel(ids_ref, tids_ref, amask_ref,
                        wtab_ref, ttab_ref, pos_ref, emb_g_ref, emb_b_ref,
                        wq_ref, bq_ref, wk_ref, bk_ref, wv_ref, bv_ref,
                        wo_ref, bo_ref, ln1_g_ref, ln1_b_ref,
                        wi_ref, bi_ref, wd_ref, bd_ref, ln2_g_ref, ln2_b_ref,
                        wp_ref, bp_ref, wc_ref, bc_ref,
                        hidden_ref, logits_ref):
    scale = 1.0 / math.sqrt(HEAD_DIM)

    # ---- embeddings (in-kernel gather via one-hot MXU matmul / select) ----
    ids = ids_ref[0]                                    # (S, 1) int32
    tids = tids_ref[0]                                  # (S, 1) int32
    oh_w = (ids == lax.broadcasted_iota(jnp.int32, (SEQ, VOCAB), 1)).astype(BF16)
    word_e = jnp.dot(oh_w, wtab_ref[...], preferred_element_type=F32)   # (S, H)
    # TYPE_VOCAB == 2: vectorized select instead of a K=2 matmul
    type_e = jnp.where(tids == 0, ttab_ref[0:1, :], ttab_ref[1:2, :])   # (S, H)
    x = word_e + type_e + pos_ref[...]
    h = _layer_norm(x, emb_g_ref[...], emb_b_ref[...])
    hidden_ref[0, 0, :, :] = h

    amask = amask_ref[0]                                # (1, S) additive mask

    # ---- encoder layers (weights stacked on leading NUM_LAYERS axis) ----
    for l in range(NUM_LAYERS):
        hb = h.astype(BF16)

        # per-head Q/K/V with pre-split weights (no lane slicing), scores
        scores = []
        v_heads = []
        for hd in range(NUM_HEADS):
            qh = jnp.dot(hb, wq_ref[l, hd], preferred_element_type=F32) + bq_ref[l, hd]
            kh = jnp.dot(hb, wk_ref[l, hd], preferred_element_type=F32) + bk_ref[l, hd]
            vh = jnp.dot(hb, wv_ref[l, hd], preferred_element_type=F32) + bv_ref[l, hd]
            # 'qd,kd->qk': MXU consumes K without an explicit transpose.
            s = lax.dot_general(qh.astype(BF16), kh.astype(BF16),
                                (((1,), (1,)), ((), ())),
                                preferred_element_type=F32) * scale + amask
            scores.append(s)
            v_heads.append(vh.astype(BF16))

        # fused softmax over all heads: stack along sublanes -> one reduction
        s_all = jnp.concatenate(scores, axis=0)          # (NUM_HEADS*S, S)
        s_all = s_all - jnp.max(s_all, axis=-1, keepdims=True)
        p_all = jnp.exp(s_all)
        p_all = p_all * pl.reciprocal(jnp.sum(p_all, axis=-1, keepdims=True),
                                      approx=True)

        # per-head context folded straight into the output projection
        attn = None
        for hd in range(NUM_HEADS):
            p = p_all[hd * SEQ:(hd + 1) * SEQ, :].astype(BF16)     # sublane slice (mult of 8)
            ctx = jnp.dot(p, v_heads[hd], preferred_element_type=F32)   # (S, HEAD_DIM)
            part = jnp.dot(ctx.astype(BF16), wo_ref[l, hd],
                           preferred_element_type=F32)              # (S, H)
            attn = part if attn is None else attn + part
        attn = attn + bo_ref[l]

        h1 = _layer_norm(h + attn, ln1_g_ref[l], ln1_b_ref[l])

        # TODO(synk): HF BERT default is exact (erf) GELU; tanh approximation
        # kept for an EUP-friendly lowering.
        inter = jax.nn.gelu(
            jnp.dot(h1.astype(BF16), wi_ref[l], preferred_element_type=F32) + bi_ref[l],
            approximate=True)
        ffn = jnp.dot(inter.astype(BF16), wd_ref[l],
                      preferred_element_type=F32) + bd_ref[l]
        h = _layer_norm(h1 + ffn, ln2_g_ref[l], ln2_b_ref[l])
        hidden_ref[l + 1, 0, :, :] = h

    # ---- pooler (tanh linear on [CLS]) + classifier head ----
    cls = h[0:1, :]                                      # (1, H)
    pooled = jnp.tanh(jnp.dot(cls.astype(BF16), wp_ref[...],
                              preferred_element_type=F32) + bp_ref[...])
    # dropout(p=0.1) is identity in eval mode
    logits_ref[0] = (jnp.dot(pooled.astype(BF16), wc_ref[...],
                             preferred_element_type=F32) + bc_ref[...])


# ------------------------------ wrapper --------------------------------------
def fused_bert_forward(p, ids3, tids3, amask, pos):
    B, S = ids3.shape[0], ids3.shape[1]
    H, I, L = HIDDEN, INTERMEDIATE, NUM_LAYERS
    NH, D, NL = NUM_HEADS, HEAD_DIM, NUM_LABELS

    def rep(n):
        return lambda b, _n=n: (0,) * _n

    in_specs = [
        pl.BlockSpec((1, S, 1), lambda b: (b, 0, 0)),   # input ids (int32)
        pl.BlockSpec((1, S, 1), lambda b: (b, 0, 0)),   # token-type ids (int32)
        pl.BlockSpec((1, 1, S), lambda b: (b, 0, 0)),   # additive attn mask
        pl.BlockSpec((VOCAB, H), rep(2)),               # word table (bf16)
        pl.BlockSpec((TYPE_VOCAB, H), rep(2)),          # type table (f32)
        pl.BlockSpec((S, H), rep(2)),                   # position embeddings
        pl.BlockSpec((1, H), rep(2)),                   # embedding LN gamma
        pl.BlockSpec((1, H), rep(2)),                   # embedding LN beta
        pl.BlockSpec((L, NH, H, D), rep(4)),            # W_q per head (bf16)
        pl.BlockSpec((L, NH, 1, D), rep(4)),            # b_q
        pl.BlockSpec((L, NH, H, D), rep(4)),            # W_k (bf16)
        pl.BlockSpec((L, NH, 1, D), rep(4)),            # b_k
        pl.BlockSpec((L, NH, H, D), rep(4)),            # W_v (bf16)
        pl.BlockSpec((L, NH, 1, D), rep(4)),            # b_v
        pl.BlockSpec((L, NH, D, H), rep(4)),            # W_attn_out per head (bf16)
        pl.BlockSpec((L, 1, H), rep(3)),                # b_attn_out
        pl.BlockSpec((L, 1, H), rep(3)),                # LN1 gamma
        pl.BlockSpec((L, 1, H), rep(3)),                # LN1 beta
        pl.BlockSpec((L, H, I), rep(3)),                # W_intermediate (bf16)
        pl.BlockSpec((L, 1, I), rep(3)),                # b_intermediate
        pl.BlockSpec((L, I, H), rep(3)),                # W_ffn_down (bf16)
        pl.BlockSpec((L, 1, H), rep(3)),                # b_ffn_down
        pl.BlockSpec((L, 1, H), rep(3)),                # LN2 gamma
        pl.BlockSpec((L, 1, H), rep(3)),                # LN2 beta
        pl.BlockSpec((H, H), rep(2)),                   # pooler W (bf16)
        pl.BlockSpec((1, H), rep(2)),                   # pooler b
        pl.BlockSpec((H, NL), rep(2)),                  # classifier W (bf16)
        pl.BlockSpec((1, NL), rep(2)),                  # classifier b
    ]
    out_specs = (
        pl.BlockSpec((L + 1, 1, S, H), lambda b: (0, b, 0, 0)),  # hidden states
        pl.BlockSpec((1, 1, NL), lambda b: (b, 0, 0)),           # logits
    )
    out_shape = (
        jax.ShapeDtypeStruct((L + 1, B, S, H), jnp.float32),
        jax.ShapeDtypeStruct((B, 1, NL), jnp.float32),
    )

    # grid=(B,) parallel: one batch item per TensorCore on v7x; on 1-TC
    # v5e/v6e this is just a 2-iteration loop (negligible fixed cost here).
    return pl.pallas_call(
        bert_forward_kernel,
        out_shape=out_shape,
        grid=(B,),
        in_specs=in_specs,
        out_specs=out_specs,
        compiler_params=pltpu.CompilerParams(
            dimension_semantics=("parallel",)),
    )(ids3, tids3, amask,
      p['word_emb'], p['type_emb'], pos, p['emb_ln_g'], p['emb_ln_b'],
      p['w_q'], p['b_q'], p['w_k'], p['b_k'], p['w_v'], p['b_v'],
      p['w_ao'], p['b_ao'], p['ln1_g'], p['ln1_b'],
      p['w_i'], p['b_i'], p['w_d'], p['b_d'], p['ln2_g'], p['ln2_b'],
      p['pool_w'], p['pool_b'], p['cls_w'], p['cls_b'])


# ----------------------------- parameters -----------------------------------
def init_params(key):
    keys = iter(jax.random.split(key, 16))

    def dense(shape, dtype=jnp.float32):
        return (jax.random.normal(next(keys), shape, jnp.float32) * 0.02).astype(dtype)

    L, H, I = NUM_LAYERS, HIDDEN, INTERMEDIATE
    NH, D = NUM_HEADS, HEAD_DIM
    return {
        # matmul weight matrices stored in bf16 (MXU-native, half the DMA)
        'word_emb': dense((VOCAB, H), BF16),
        'type_emb': dense((TYPE_VOCAB, H)),                 # f32 (used via select)
        'pos_emb': dense((MAX_POS, H)),                     # f32 (direct add)
        'emb_ln_g': jnp.ones((1, H), jnp.float32),
        'emb_ln_b': jnp.zeros((1, H), jnp.float32),
        # encoder layer weights stacked on NUM_LAYERS and pre-split per head
        'w_q': dense((L, NH, H, D), BF16), 'b_q': jnp.zeros((L, NH, 1, D), jnp.float32),
        'w_k': dense((L, NH, H, D), BF16), 'b_k': jnp.zeros((L, NH, 1, D), jnp.float32),
        'w_v': dense((L, NH, H, D), BF16), 'b_v': jnp.zeros((L, NH, 1, D), jnp.float32),
        'w_ao': dense((L, NH, D, H), BF16), 'b_ao': jnp.zeros((L, 1, H), jnp.float32),
        'ln1_g': jnp.ones((L, 1, H), jnp.float32),
        'ln1_b': jnp.zeros((L, 1, H), jnp.float32),
        'w_i': dense((L, H, I), BF16), 'b_i': jnp.zeros((L, 1, I), jnp.float32),
        'w_d': dense((L, I, H), BF16), 'b_d': jnp.zeros((L, 1, H), jnp.float32),
        'ln2_g': jnp.ones((L, 1, H), jnp.float32),
        'ln2_b': jnp.zeros((L, 1, H), jnp.float32),
        'pool_w': dense((H, H), BF16),
        'pool_b': jnp.zeros((1, H), jnp.float32),
        'cls_w': dense((H, NUM_LABELS), BF16),
        'cls_b': jnp.zeros((1, NUM_LABELS), jnp.float32),
    }


# ------------------------------ forward pass --------------------------------
def bert_for_emotion_classification(params, input_ids, attention_mask=None,
                                    token_type_ids=None, labels=None):
    B, S = input_ids.shape
    if attention_mask is None:
        attention_mask = jnp.ones((B, S), jnp.int32)
    if token_type_ids is None:
        token_type_ids = jnp.zeros((B, S), jnp.int32)

    ids3 = input_ids.astype(jnp.int32).reshape(B, S, 1)
    tids3 = token_type_ids.astype(jnp.int32).reshape(B, S, 1)
    # (B,1,S) additive attention mask, classic BERT -10000 for padded tokens
    amask = ((1.0 - attention_mask.astype(jnp.float32)) * -10000.0)[:, None, :]
    pos = params['pos_emb'][:S]

    hidden_all, logits3 = fused_bert_forward(params, ids3, tids3, amask, pos)
    logits = logits3.reshape(B, NUM_LABELS)

    loss = None
    if labels is not None:
        # TODO(synk): cross-entropy loss computed in plain-JAX glue (tiny reduction)
        logp = jax.nn.log_softmax(logits, axis=-1)
        loss = -jnp.mean(jnp.take_along_axis(logp, labels[:, None], axis=1))

    return {'loss': loss,
            'logits': logits,
            'hidden_states': tuple(hidden_all[i] for i in range(NUM_LAYERS + 1))}


# --------------------------------- main --------------------------------------
if __name__ == "__main__":
    key = jax.random.PRNGKey(0)
    k_params, k_ids = jax.random.split(key)

    params = init_params(k_params)

    B, S = 2, SEQ
    input_ids = jax.random.randint(k_ids, (B, S), 0, VOCAB, dtype=jnp.int32)
    attention_mask = jnp.ones((B, S), jnp.int32)
    token_type_ids = jnp.zeros((B, S), jnp.int32)
    labels = jnp.array([1, 3], dtype=jnp.int32)

    fwd = jax.jit(bert_for_emotion_classification)
    out = fwd(params, input_ids, attention_mask, token_type_ids, labels)
    jax.block_until_ready(out['logits'])
    jax.block_until_ready(out['loss'])

    assert out['logits'].shape == (B, NUM_LABELS)
    assert len(out['hidden_states']) == NUM_LAYERS + 1
    assert out['hidden_states'][0].shape == (B, S, HIDDEN)
    assert bool(jnp.all(jnp.isfinite(out['logits'])))
    assert bool(jnp.isfinite(out['loss']))
    print("KERNEL_OK")
</pallas_src>

<mosaic_0001>
module attributes {stable_mosaic.version = 11 : i64} {
  func.func @bert_forward_kernel(%arg0: i32, %arg1: memref<1x8x1xi32, #tpu.memory_space<vmem>>, %arg2: memref<1x8x1xi32, #tpu.memory_space<vmem>>, %arg3: memref<1x1x8xf32, #tpu.memory_space<vmem>>, %arg4: memref<32x128xbf16, #tpu.memory_space<vmem>>, %arg5: memref<2x128xf32, #tpu.memory_space<vmem>>, %arg6: memref<8x128xf32, #tpu.memory_space<vmem>>, %arg7: memref<1x128xf32, #tpu.memory_space<vmem>>, %arg8: memref<1x128xf32, #tpu.memory_space<vmem>>, %arg9: memref<2x2x128x64xbf16, #tpu.memory_space<vmem>>, %arg10: memref<2x2x1x64xf32, #tpu.memory_space<vmem>>, %arg11: memref<2x2x128x64xbf16, #tpu.memory_space<vmem>>, %arg12: memref<2x2x1x64xf32, #tpu.memory_space<vmem>>, %arg13: memref<2x2x128x64xbf16, #tpu.memory_space<vmem>>, %arg14: memref<2x2x1x64xf32, #tpu.memory_space<vmem>>, %arg15: memref<2x2x64x128xbf16, #tpu.memory_space<vmem>>, %arg16: memref<2x1x128xf32, #tpu.memory_space<vmem>>, %arg17: memref<2x1x128xf32, #tpu.memory_space<vmem>>, %arg18: memref<2x1x128xf32, #tpu.memory_space<vmem>>, %arg19: memref<2x128x256xbf16, #tpu.memory_space<vmem>>, %arg20: memref<2x1x256xf32, #tpu.memory_space<vmem>>, %arg21: memref<2x256x128xbf16, #tpu.memory_space<vmem>>, %arg22: memref<2x1x128xf32, #tpu.memory_space<vmem>>, %arg23: memref<2x1x128xf32, #tpu.memory_space<vmem>>, %arg24: memref<2x1x128xf32, #tpu.memory_space<vmem>>, %arg25: memref<128x128xbf16, #tpu.memory_space<vmem>>, %arg26: memref<1x128xf32, #tpu.memory_space<vmem>>, %arg27: memref<128x6xbf16, #tpu.memory_space<vmem>>, %arg28: memref<1x6xf32, #tpu.memory_space<vmem>>, %arg29: memref<3x1x8x128xf32, #tpu.memory_space<vmem>>, %arg30: memref<1x1x6xf32, #tpu.memory_space<vmem>>) attributes {dimension_semantics = [#tpu.dimension_semantics<parallel>], iteration_bounds = array<i64: 2>, scalar_prefetch = 0 : i64, scratch_operands = 0 : i64, tpu.core_type = #tpu.core_type<tc>, window_params = [{transform_indices = @transform_0, window_bounds = array<i64: 1, 8, 1>}, {transform_indices = @transform_1, window_bounds = array<i64: 1, 8, 1>}, {transform_indices = @transform_2, window_bounds = array<i64: 1, 1, 8>}, {pipeline_mode = #tpu.pipeline_mode<synchronous>, transform_indices = @transform_3, window_bounds = array<i64: 32, 128>}, {pipeline_mode = #tpu.pipeline_mode<synchronous>, transform_indices = @transform_4, window_bounds = array<i64: 2, 128>}, {pipeline_mode = #tpu.pipeline_mode<synchronous>, transform_indices = @transform_5, window_bounds = array<i64: 8, 128>}, {pipeline_mode = #tpu.pipeline_mode<synchronous>, transform_indices = @transform_6, window_bounds = array<i64: 1, 128>}, {pipeline_mode = #tpu.pipeline_mode<synchronous>, transform_indices = @transform_7, window_bounds = array<i64: 1, 128>}, {pipeline_mode = #tpu.pipeline_mode<synchronous>, transform_indices = @transform_8, window_bounds = array<i64: 2, 2, 128, 64>}, {pipeline_mode = #tpu.pipeline_mode<synchronous>, transform_indices = @transform_9, window_bounds = array<i64: 2, 2, 1, 64>}, {pipeline_mode = #tpu.pipeline_mode<synchronous>, transform_indices = @transform_10, window_bounds = array<i64: 2, 2, 128, 64>}, {pipeline_mode = #tpu.pipeline_mode<synchronous>, transform_indices = @transform_11, window_bounds = array<i64: 2, 2, 1, 64>}, {pipeline_mode = #tpu.pipeline_mode<synchronous>, transform_indices = @transform_12, window_bounds = array<i64: 2, 2, 128, 64>}, {pipeline_mode = #tpu.pipeline_mode<synchronous>, transform_indices = @transform_13, window_bounds = array<i64: 2, 2, 1, 64>}, {pipeline_mode = #tpu.pipeline_mode<synchronous>, transform_indices = @transform_14, window_bounds = array<i64: 2, 2, 64, 128>}, {pipeline_mode = #tpu.pipeline_mode<synchronous>, transform_indices = @transform_15, window_bounds = array<i64: 2, 1, 128>}, {pipeline_mode = #tpu.pipeline_mode<synchronous>, transform_indices = @transform_16, window_bounds = array<i64: 2, 1, 128>}, {pipeline_mode = #tpu.pipeline_mode<synchronous>, transform_indices = @transform_17, window_bounds = array<i64: 2, 1, 128>}, {pipeline_mode = #tpu.pipeline_mode<synchronous>, transform_indices = @transform_18, window_bounds = array<i64: 2, 128, 256>}, {pipeline_mode = #tpu.pipeline_mode<synchronous>, transform_indices = @transform_19, window_bounds = array<i64: 2, 1, 256>}, {pipeline_mode = #tpu.pipeline_mode<synchronous>, transform_indices = @transform_20, window_bounds = array<i64: 2, 256, 128>}, {pipeline_mode = #tpu.pipeline_mode<synchronous>, transform_indices = @transform_21, window_bounds = array<i64: 2, 1, 128>}, {pipeline_mode = #tpu.pipeline_mode<synchronous>, transform_indices = @transform_22, window_bounds = array<i64: 2, 1, 128>}, {pipeline_mode = #tpu.pipeline_mode<synchronous>, transform_indices = @transform_23, window_bounds = array<i64: 2, 1, 128>}, {pipeline_mode = #tpu.pipeline_mode<synchronous>, transform_indices = @transform_24, window_bounds = array<i64: 128, 128>}, {pipeline_mode = #tpu.pipeline_mode<synchronous>, transform_indices = @transform_25, window_bounds = array<i64: 1, 128>}, {pipeline_mode = #tpu.pipeline_mode<synchronous>, transform_indices = @transform_26, window_bounds = array<i64: 128, 6>}, {pipeline_mode = #tpu.pipeline_mode<synchronous>, transform_indices = @transform_27, window_bounds = array<i64: 1, 6>}, {transform_indices = @transform_28, window_bounds = array<i64: 3, 1, 8, 128>}, {transform_indices = @transform_29, window_bounds = array<i64: 1, 1, 6>}]} {
    %c0 = arith.constant 0 : index
    %c0_0 = arith.constant 0 : index
    %c0_1 = arith.constant 0 : index
    %0 = vector.load %arg1[%c0, %c0_0, %c0_1] : memref<1x8x1xi32, #tpu.memory_space<vmem>>, vector<1x8x1xi32>
    %1 = vector.shape_cast %0 : vector<1x8x1xi32> to vector<8x1xi32>
    %c0_2 = arith.constant 0 : index
    %c0_3 = arith.constant 0 : index
    %c0_4 = arith.constant 0 : index
    %2 = vector.load %arg2[%c0_2, %c0_3, %c0_4] : memref<1x8x1xi32, #tpu.memory_space<vmem>>, vector<1x8x1xi32>
    %3 = vector.shape_cast %2 : vector<1x8x1xi32> to vector<8x1xi32>
    %4 = tpu.iota {dimensions = array<i32: 1>} : vector<8x32xi32>
    %5 = vector.broadcast %1 : vector<8x1xi32> to vector<8x32xi32>
    %6 = arith.cmpi eq, %5, %4 : vector<8x32xi32>
    %7 = arith.extui %6 : vector<8x32xi1> to vector<8x32xi32>
    %8 = arith.sitofp %7 : vector<8x32xi32> to vector<8x32xf32>
    %9 = arith.truncf %8 : vector<8x32xf32> to vector<8x32xbf16>
    %c0_5 = arith.constant 0 : index
    %c0_6 = arith.constant 0 : index
    %10 = vector.load %arg4[%c0_5, %c0_6] : memref<32x128xbf16, #tpu.memory_space<vmem>>, vector<32x128xbf16>
    %cst = arith.constant dense<0.000000e+00> : vector<8x128xf32>
    %11 = tpu.matmul %9, %10, %cst {dimension_numbers = #tpu.dot_dimension_numbers<[1], [0], [0], [1], [0, 0, 1, 1], [], []>} : vector<8x32xbf16>, vector<32x128xbf16>, vector<8x128xf32> -> vector<8x128xf32>
    %c0_i32 = arith.constant 0 : i32
    %12 = vector.broadcast %c0_i32 : i32 to vector<8x1xi32>
    %13 = arith.cmpi eq, %3, %12 : vector<8x1xi32>
    %c0_7 = arith.constant 0 : index
    %c0_8 = arith.constant 0 : index
    %14 = vector.load %arg5[%c0_7, %c0_8] : memref<2x128xf32, #tpu.memory_space<vmem>>, vector<1x128xf32>
    %c1 = arith.constant 1 : index
    %c0_9 = arith.constant 0 : index
    %15 = vector.load %arg5[%c1, %c0_9] : memref<2x128xf32, #tpu.memory_space<vmem>>, vector<1x128xf32>
    %16 = vector.shape_cast %13 : vector<8x1xi1> to vector<8x1xi1>
    %17 = vector.broadcast %16 : vector<8x1xi1> to vector<8x128xi1>
    %18 = vector.shape_cast %14 : vector<1x128xf32> to vector<1x128xf32>
    %19 = vector.broadcast %18 : vector<1x128xf32> to vector<8x128xf32>
    %20 = vector.shape_cast %15 : vector<1x128xf32> to vector<1x128xf32>
    %21 = vector.broadcast %20 : vector<1x128xf32> to vector<8x128xf32>
    %22 = arith.select %17, %19, %21 : vector<8x128xi1>, vector<8x128xf32>
    %23 = arith.addf %11, %22 : vector<8x128xf32>
    %c0_10 = arith.constant 0 : index
    %c0_11 = arith.constant 0 : index
    %24 = vector.load %arg6[%c0_10, %c0_11] : memref<8x128xf32, #tpu.memory_space<vmem>>, vector<8x128xf32>
    %25 = arith.addf %23, %24 : vector<8x128xf32>
    %c0_12 = arith.constant 0 : index
    %c0_13 = arith.constant 0 : index
    %26 = vector.load %arg7[%c0_12, %c0_13] : memref<1x128xf32, #tpu.memory_space<vmem>>, vector<1x128xf32>
    %c0_14 = arith.constant 0 : index
    %c0_15 = arith.constant 0 : index
    %27 = vector.load %arg8[%c0_14, %c0_15] : memref<1x128xf32, #tpu.memory_space<vmem>>, vector<1x128xf32>
    %cst_16 = arith.constant dense<0.000000e+00> : vector<8xf32>
    %28 = vector.multi_reduction <add>, %25, %cst_16 [1] : vector<8x128xf32> to vector<8xf32>
    %29 = vector.shape_cast %28 : vector<8xf32> to vector<8x1xf32>
    %cst_17 = arith.constant 1.280000e+02 : f32
    %30 = vector.broadcast %cst_17 : f32 to vector<8x1xf32>
    %31 = arith.divf %29, %30 : vector<8x1xf32>
    %32 = vector.broadcast %31 : vector<8x1xf32> to vector<8x128xf32>
    %33 = arith.subf %25, %32 : vector<8x128xf32>
    %34 = arith.mulf %33, %33 : vector<8x128xf32>
    %cst_18 = arith.constant dense<0.000000e+00> : vector<8xf32>
    %35 = vector.multi_reduction <add>, %34, %cst_18 [1] : vector<8x128xf32> to vector<8xf32>
    %36 = vector.shape_cast %35 : vector<8xf32> to vector<8x1xf32>
    %cst_19 = arith.constant 1.280000e+02 : f32
    %37 = vector.broadcast %cst_19 : f32 to vector<8x1xf32>
    %38 = arith.divf %36, %37 : vector<8x1xf32>
    %39 = vector.broadcast %31 : vector<8x1xf32> to vector<8x128xf32>
    %40 = arith.subf %25, %39 : vector<8x128xf32>
    %cst_20 = arith.constant 9.99999996E-13 : f32
    %41 = vector.broadcast %cst_20 : f32 to vector<8x1xf32>
    %42 = arith.addf %38, %41 : vector<8x1xf32>
    %43 = math.rsqrt %42 : vector<8x1xf32>
    %44 = vector.broadcast %43 : vector<8x1xf32> to vector<8x128xf32>
    %45 = arith.mulf %40, %44 : vector<8x128xf32>
    %46 = vector.broadcast %26 : vector<1x128xf32> to vector<8x128xf32>
    %47 = arith.mulf %45, %46 : vector<8x128xf32>
    %48 = vector.broadcast %27 : vector<1x128xf32> to vector<8x128xf32>
    %49 = arith.addf %47, %48 : vector<8x128xf32>
    %c0_21 = arith.constant 0 : index
    %c0_22 = arith.constant 0 : index
    %c0_23 = arith.constant 0 : index
    %c0_24 = arith.constant 0 : index
    %50 = vector.load %arg29[%c0_21, %c0_22, %c0_23, %c0_24] : memref<3x1x8x128xf32, #tpu.memory_space<vmem>>, vector<1x1x8x128xf32>
    %51 = vector.shape_cast %50 : vector<1x1x8x128xf32> to vector<8x128xf32>
    %52 = vector.shape_cast %49 : vector<8x128xf32> to vector<1x1x8x128xf32>
    tpu.vector_store %arg29[%c0_21, %c0_22, %c0_23, %c0_24], %52 {strides = array<i32>} : memref<3x1x8x128xf32, #tpu.memory_space<vmem>>, vector<1x1x8x128xf32>,
    %c0_25 = arith.constant 0 : index
    %c0_26 = arith.constant 0 : index
    %c0_27 = arith.constant 0 : index
    %53 = vector.load %arg3[%c0_25, %c0_26, %c0_27] : memref<1x1x8xf32, #tpu.memory_space<vmem>>, vector<1x1x8xf32>
    %54 = vector.shape_cast %53 : vector<1x1x8xf32> to vector<1x8xf32>
    %55 = arith.truncf %49 : vector<8x128xf32> to vector<8x128xbf16>
    %c0_28 = arith.constant 0 : index
    %c0_29 = arith.constant 0 : index
    %c0_30 = arith.constant 0 : index
    %c0_31 = arith.constant 0 : index
    %56 = vector.load %arg9[%c0_28, %c0_29, %c0_30, %c0_31] : memref<2x2x128x64xbf16, #tpu.memory_space<vmem>>, vector<1x1x128x64xbf16>
    %57 = vector.shape_cast %56 : vector<1x1x128x64xbf16> to vector<128x64xbf16>
    %cst_32 = arith.constant dense<0.000000e+00> : vector<8x64xf32>
    %58 = tpu.matmul %55, %57, %cst_32 {dimension_numbers = #tpu.dot_dimension_numbers<[1], [0], [0], [1], [0, 0, 1, 1], [], []>} : vector<8x128xbf16>, vector<128x64xbf16>, vector<8x64xf32> -> vector<8x64xf32>
    %c0_33 = arith.constant 0 : index
    %c0_34 = arith.constant 0 : index
    %c0_35 = arith.constant 0 : index
    %c0_36 = arith.constant 0 : index
    %59 = vector.load %arg10[%c0_33, %c0_34, %c0_35, %c0_36] : memref<2x2x1x64xf32, #tpu.memory_space<vmem>>, vector<1x1x1x64xf32>
    %60 = vector.shape_cast %59 : vector<1x1x1x64xf32> to vector<1x64xf32>
    %61 = vector.broadcast %60 : vector<1x64xf32> to vector<8x64xf32>
    %62 = arith.addf %58, %61 : vector<8x64xf32>
    %c0_37 = arith.constant 0 : index
    %c0_38 = arith.constant 0 : index
    %c0_39 = arith.constant 0 : index
    %c0_40 = arith.constant 0 : index
    %63 = vector.load %arg11[%c0_37, %c0_38, %c0_39, %c0_40] : memref<2x2x128x64xbf16, #tpu.memory_space<vmem>>, vector<1x1x128x64xbf16>
    %64 = vector.shape_cast %63 : vector<1x1x128x64xbf16> to vector<128x64xbf16>
    %cst_41 = arith.constant dense<0.000000e+00> : vector<8x64xf32>
    %65 = tpu.matmul %55, %64, %cst_41 {dimension_numbers = #tpu.dot_dimension_numbers<[1], [0], [0], [1], [0, 0, 1, 1], [], []>} : vector<8x128xbf16>, vector<128x64xbf16>, vector<8x64xf32> -> vector<8x64xf32>
    %c0_42 = arith.constant 0 : index
    %c0_43 = arith.constant 0 : index
    %c0_44 = arith.constant 0 : index
    %c0_45 = arith.constant 0 : index
    %66 = vector.load %arg12[%c0_42, %c0_43, %c0_44, %c0_45] : memref<2x2x1x64xf32, #tpu.memory_space<vmem>>, vector<1x1x1x64xf32>
    %67 = vector.shape_cast %66 : vector<1x1x1x64xf32> to vector<1x64xf32>
    %68 = vector.broadcast %67 : vector<1x64xf32> to vector<8x64xf32>
    %69 = arith.addf %65, %68 : vector<8x64xf32>
    %c0_46 = arith.constant 0 : index
    %c0_47 = arith.constant 0 : index
    %c0_48 = arith.constant 0 : index
    %c0_49 = arith.constant 0 : index
    %70 = vector.load %arg13[%c0_46, %c0_47, %c0_48, %c0_49] : memref<2x2x128x64xbf16, #tpu.memory_space<vmem>>, vector<1x1x128x64xbf16>
    %71 = vector.shape_cast %70 : vector<1x1x128x64xbf16> to vector<128x64xbf16>
    %cst_50 = arith.constant dense<0.000000e+00> : vector<8x64xf32>
    %72 = tpu.matmul %55, %71, %cst_50 {dimension_numbers = #tpu.dot_dimension_numbers<[1], [0], [0], [1], [0, 0, 1, 1], [], []>} : vector<8x128xbf16>, vector<128x64xbf16>, vector<8x64xf32> -> vector<8x64xf32>
    %c0_51 = arith.constant 0 : index
    %c0_52 = arith.constant 0 : index
    %c0_53 = arith.constant 0 : index
    %c0_54 = arith.constant 0 : index
    %73 = vector.load %arg14[%c0_51, %c0_52, %c0_53, %c0_54] : memref<2x2x1x64xf32, #tpu.memory_space<vmem>>, vector<1x1x1x64xf32>
    %74 = vector.shape_cast %73 : vector<1x1x1x64xf32> to vector<1x64xf32>
    %75 = vector.broadcast %74 : vector<1x64xf32> to vector<8x64xf32>
    %76 = arith.addf %72, %75 : vector<8x64xf32>
    %77 = arith.truncf %62 : vector<8x64xf32> to vector<8x64xbf16>
    %78 = arith.truncf %69 : vector<8x64xf32> to vector<8x64xbf16>
    %cst_55 = arith.constant dense<0.000000e+00> : vector<8x8xf32>
    %79 = tpu.matmul %77, %78, %cst_55 {dimension_numbers = #tpu.dot_dimension_numbers<[1], [1], [0], [0], [0, 0, 1, 0], [], []>} : vector<8x64xbf16>, vector<8x64xbf16>, vector<8x8xf32> -> vector<8x8xf32>
    %cst_56 = arith.constant 1.250000e-01 : f32
    %80 = vector.broadcast %cst_56 : f32 to vector<8x8xf32>
    %81 = arith.mulf %79, %80 : vector<8x8xf32>
    %82 = vector.broadcast %54 : vector<1x8xf32> to vector<8x8xf32>
    %83 = arith.addf %81, %82 : vector<8x8xf32>
    %84 = arith.truncf %76 : vector<8x64xf32> to vector<8x64xbf16>
    %c0_57 = arith.constant 0 : index
    %c1_58 = arith.constant 1 : index
    %c0_59 = arith.constant 0 : index
    %c0_60 = arith.constant 0 : index
    %85 = vector.load %arg9[%c0_57, %c1_58, %c0_59, %c0_60] : memref<2x2x128x64xbf16, #tpu.memory_space<vmem>>, vector<1x1x128x64xbf16>
    %86 = vector.shape_cast %85 : vector<1x1x128x64xbf16> to vector<128x64xbf16>
    %cst_61 = arith.constant dense<0.000000e+00> : vector<8x64xf32>
    %87 = tpu.matmul %55, %86, %cst_61 {dimension_numbers = #tpu.dot_dimension_numbers<[1], [0], [0], [1], [0, 0, 1, 1], [], []>} : vector<8x128xbf16>, vector<128x64xbf16>, vector<8x64xf32> -> vector<8x64xf32>
    %c0_62 = arith.constant 0 : index
    %c1_63 = arith.constant 1 : index
    %c0_64 = arith.constant 0 : index
    %c0_65 = arith.constant 0 : index
    %88 = vector.load %arg10[%c0_62, %c1_63, %c0_64, %c0_65] : memref<2x2x1x64xf32, #tpu.memory_space<vmem>>, vector<1x1x1x64xf32>
    %89 = vector.shape_cast %88 : vector<1x1x1x64xf32> to vector<1x64xf32>
    %90 = vector.broadcast %89 : vector<1x64xf32> to vector<8x64xf32>
    %91 = arith.addf %87, %90 : vector<8x64xf32>
    %c0_66 = arith.constant 0 : index
    %c1_67 = arith.constant 1 : index
    %c0_68 = arith.constant 0 : index
    %c0_69 = arith.constant 0 : index
    %92 = vector.load %arg11[%c0_66, %c1_67, %c0_68, %c0_69] : memref<2x2x128x64xbf16, #tpu.memory_space<vmem>>, vector<1x1x128x64xbf16>
    %93 = vector.shape_cast %92 : vector<1x1x128x64xbf16> to vector<128x64xbf16>
    %cst_70 = arith.constant dense<0.000000e+00> : vector<8x64xf32>
    %94 = tpu.matmul %55, %93, %cst_70 {dimension_numbers = #tpu.dot_dimension_numbers<[1], [0], [0], [1], [0, 0, 1, 1], [], []>} : vector<8x128xbf16>, vector<128x64xbf16>, vector<8x64xf32> -> vector<8x64xf32>
    %c0_71 = arith.constant 0 : index
    %c1_72 = arith.constant 1 : index
    %c0_73 = arith.constant 0 : index
    %c0_74 = arith.constant 0 : index
    %95 = vector.load %arg12[%c0_71, %c1_72, %c0_73, %c0_74] : memref<2x2x1x64xf32, #tpu.memory_space<vmem>>, vector<1x1x1x64xf32>
    %96 = vector.shape_cast %95 : vector<1x1x1x64xf32> to vector<1x64xf32>
    %97 = vector.broadcast %96 : vector<1x64xf32> to vector<8x64xf32>
    %98 = arith.addf %94, %97 : vector<8x64xf32>
    %c0_75 = arith.constant 0 : index
    %c1_76 = arith.constant 1 : index
    %c0_77 = arith.constant 0 : index
    %c0_78 = arith.constant 0 : index
    %99 = vector.load %arg13[%c0_75, %c1_76, %c0_77, %c0_78] : memref<2x2x128x64xbf16, #tpu.memory_space<vmem>>, vector<1x1x128x64xbf16>
    %100 = vector.shape_cast %99 : vector<1x1x128x64xbf16> to vector<128x64xbf16>
    %cst_79 = arith.constant dense<0.000000e+00> : vector<8x64xf32>
    %101 = tpu.matmul %55, %100, %cst_79 {dimension_numbers = #tpu.dot_dimension_numbers<[1], [0], [0], [1], [0, 0, 1, 1], [], []>} : vector<8x128xbf16>, vector<128x64xbf16>, vector<8x64xf32> -> vector<8x64xf32>
    %c0_80 = arith.constant 0 : index
    %c1_81 = arith.constant 1 : index
    %c0_82 = arith.constant 0 : index
    %c0_83 = arith.constant 0 : index
    %102 = vector.load %arg14[%c0_80, %c1_81, %c0_82, %c0_83] : memref<2x2x1x64xf32, #tpu.memory_space<vmem>>, vector<1x1x1x64xf32>
    %103 = vector.shape_cast %102 : vector<1x1x1x64xf32> to vector<1x64xf32>
    %104 = vector.broadcast %103 : vector<1x64xf32> to vector<8x64xf32>
    %105 = arith.addf %101, %104 : vector<8x64xf32>
    %106 = arith.truncf %91 : vector<8x64xf32> to vector<8x64xbf16>
    %107 = arith.truncf %98 : vector<8x64xf32> to vector<8x64xbf16>
    %cst_84 = arith.constant dense<0.000000e+00> : vector<8x8xf32>
    %108 = tpu.matmul %106, %107, %cst_84 {dimension_numbers = #tpu.dot_dimension_numbers<[1], [1], [0], [0], [0, 0, 1, 0], [], []>} : vector<8x64xbf16>, vector<8x64xbf16>, vector<8x8xf32> -> vector<8x8xf32>
    %cst_85 = arith.constant 1.250000e-01 : f32
    %109 = vector.broadcast %cst_85 : f32 to vector<8x8xf32>
    %110 = arith.mulf %108, %109 : vector<8x8xf32>
    %111 = vector.broadcast %54 : vector<1x8xf32> to vector<8x8xf32>
    %112 = arith.addf %110, %111 : vector<8x8xf32>
    %113 = arith.truncf %105 : vector<8x64xf32> to vector<8x64xbf16>
    %114 = tpu.concatenate %83, %112 in 0 : vector<8x8xf32>, vector<8x8xf32> -> vector<16x8xf32>
    %cst_86 = arith.constant dense<0xFF800000> : vector<16xf32>
    %115 = vector.multi_reduction <maximumf>, %114, %cst_86 [1] : vector<16x8xf32> to vector<16xf32>
    %116 = vector.shape_cast %115 : vector<16xf32> to vector<16x1xf32>
    %117 = vector.broadcast %116 : vector<16x1xf32> to vector<16x8xf32>
    %118 = arith.subf %114, %117 : vector<16x8xf32>
    %119 = math.exp %118 : vector<16x8xf32>
    %cst_87 = arith.constant dense<0.000000e+00> : vector<16xf32>
    %120 = vector.multi_reduction <add>, %119, %cst_87 [1] : vector<16x8xf32> to vector<16xf32>
    %121 = vector.shape_cast %120 : vector<16xf32> to vector<16x1xf32>
    %122 = tpu.reciprocal %121 {approx = true} : vector<16x1xf32> -> vector<16x1xf32>
    %123 = vector.broadcast %122 : vector<16x1xf32> to vector<16x8xf32>
    %124 = arith.mulf %119, %123 : vector<16x8xf32>
    %125 = vector.extract_strided_slice %124 {offsets = [0, 0], sizes = [8, 8], strides = [1, 1]} : vector<16x8xf32> to vector<8x8xf32>
    %126 = arith.truncf %125 : vector<8x8xf32> to vector<8x8xbf16>
    %cst_88 = arith.constant dense<0.000000e+00> : vector<8x64xf32>
    %127 = tpu.matmul %126, %84, %cst_88 {dimension_numbers = #tpu.dot_dimension_numbers<[1], [0], [0], [1], [0, 0, 1, 1], [], []>} : vector<8x8xbf16>, vector<8x64xbf16>, vector<8x64xf32> -> vector<8x64xf32>
    %128 = arith.truncf %127 : vector<8x64xf32> to vector<8x64xbf16>
    %c0_89 = arith.constant 0 : index
    %c0_90 = arith.constant 0 : index
    %c0_91 = arith.constant 0 : index
    %c0_92 = arith.constant 0 : index
    %129 = vector.load %arg15[%c0_89, %c0_90, %c0_91, %c0_92] : memref<2x2x64x128xbf16, #tpu.memory_space<vmem>>, vector<1x1x64x128xbf16>
    %130 = vector.shape_cast %129 : vector<1x1x64x128xbf16> to vector<64x128xbf16>
    %cst_93 = arith.constant dense<0.000000e+00> : vector<8x128xf32>
    %131 = tpu.matmul %128, %130, %cst_93 {dimension_numbers = #tpu.dot_dimension_numbers<[1], [0], [0], [1], [0, 0, 1, 1], [], []>} : vector<8x64xbf16>, vector<64x128xbf16>, vector<8x128xf32> -> vector<8x128xf32>
    %132 = vector.extract_strided_slice %124 {offsets = [8, 0], sizes = [8, 8], strides = [1, 1]} : vector<16x8xf32> to vector<8x8xf32>
    %133 = arith.truncf %132 : vector<8x8xf32> to vector<8x8xbf16>
    %cst_94 = arith.constant dense<0.000000e+00> : vector<8x64xf32>
    %134 = tpu.matmul %133, %113, %cst_94 {dimension_numbers = #tpu.dot_dimension_numbers<[1], [0], [0], [1], [0, 0, 1, 1], [], []>} : vector<8x8xbf16>, vector<8x64xbf16>, vector<8x64xf32> -> vector<8x64xf32>
    %135 = arith.truncf %134 : vector<8x64xf32> to vector<8x64xbf16>
    %c0_95 = arith.constant 0 : index
    %c1_96 = arith.constant 1 : index
    %c0_97 = arith.constant 0 : index
    %c0_98 = arith.constant 0 : index
    %136 = vector.load %arg15[%c0_95, %c1_96, %c0_97, %c0_98] : memref<2x2x64x128xbf16, #tpu.memory_space<vmem>>, vector<1x1x64x128xbf16>
    %137 = vector.shape_cast %136 : vector<1x1x64x128xbf16> to vector<64x128xbf16>
    %cst_99 = arith.constant dense<0.000000e+00> : vector<8x128xf32>
    %138 = tpu.matmul %135, %137, %cst_99 {dimension_numbers = #tpu.dot_dimension_numbers<[1], [0], [0], [1], [0, 0, 1, 1], [], []>} : vector<8x64xbf16>, vector<64x128xbf16>, vector<8x128xf32> -> vector<8x128xf32>
    %139 = arith.addf %131, %138 : vector<8x128xf32>
    %c0_100 = arith.constant 0 : index
    %c0_101 = arith.constant 0 : index
    %c0_102 = arith.constant 0 : index
    %140 = vector.load %arg16[%c0_100, %c0_101, %c0_102] : memref<2x1x128xf32, #tpu.memory_space<vmem>>, vector<1x1x128xf32>
    %141 = vector.shape_cast %140 : vector<1x1x128xf32> to vector<1x128xf32>
    %142 = vector.broadcast %141 : vector<1x128xf32> to vector<8x128xf32>
    %143 = arith.addf %139, %142 : vector<8x128xf32>
    %144 = arith.addf %49, %143 : vector<8x128xf32>
    %c0_103 = arith.constant 0 : index
    %c0_104 = arith.constant 0 : index
    %c0_105 = arith.constant 0 : index
    %145 = vector.load %arg17[%c0_103, %c0_104, %c0_105] : memref<2x1x128xf32, #tpu.memory_space<vmem>>, vector<1x1x128xf32>
    %146 = vector.shape_cast %145 : vector<1x1x128xf32> to vector<1x128xf32>
    %c0_106 = arith.constant 0 : index
    %c0_107 = arith.constant 0 : index
    %c0_108 = arith.constant 0 : index
    %147 = vector.load %arg18[%c0_106, %c0_107, %c0_108] : memref<2x1x128xf32, #tpu.memory_space<vmem>>, vector<1x1x128xf32>
    %148 = vector.shape_cast %147 : vector<1x1x128xf32> to vector<1x128xf32>
    %cst_109 = arith.constant dense<0.000000e+00> : vector<8xf32>
    %149 = vector.multi_reduction <add>, %144, %cst_109 [1] : vector<8x128xf32> to vector<8xf32>
    %150 = vector.shape_cast %149 : vector<8xf32> to vector<8x1xf32>
    %cst_110 = arith.constant 1.280000e+02 : f32
    %151 = vector.broadcast %cst_110 : f32 to vector<8x1xf32>
    %152 = arith.divf %150, %151 : vector<8x1xf32>
    %153 = vector.broadcast %152 : vector<8x1xf32> to vector<8x128xf32>
    %154 = arith.subf %144, %153 : vector<8x128xf32>
    %155 = arith.mulf %154, %154 : vector<8x128xf32>
    %cst_111 = arith.constant dense<0.000000e+00> : vector<8xf32>
    %156 = vector.multi_reduction <add>, %155, %cst_111 [1] : vector<8x128xf32> to vector<8xf32>
    %157 = vector.shape_cast %156 : vector<8xf32> to vector<8x1xf32>
    %cst_112 = arith.constant 1.280000e+02 : f32
    %158 = vector.broadcast %cst_112 : f32 to vector<8x1xf32>
    %159 = arith.divf %157, %158 : vector<8x1xf32>
    %160 = vector.broadcast %152 : vector<8x1xf32> to vector<8x128xf32>
    %161 = arith.subf %144, %160 : vector<8x128xf32>
    %cst_113 = arith.constant 9.99999996E-13 : f32
    %162 = vector.broadcast %cst_113 : f32 to vector<8x1xf32>
    %163 = arith.addf %159, %162 : vector<8x1xf32>
    %164 = math.rsqrt %163 : vector<8x1xf32>
    %165 = vector.broadcast %164 : vector<8x1xf32> to vector<8x128xf32>
    %166 = arith.mulf %161, %165 : vector<8x128xf32>
    %167 = vector.broadcast %146 : vector<1x128xf32> to vector<8x128xf32>
    %168 = arith.mulf %166, %167 : vector<8x128xf32>
    %169 = vector.broadcast %148 : vector<1x128xf32> to vector<8x128xf32>
    %170 = arith.addf %168, %169 : vector<8x128xf32>
    %171 = arith.truncf %170 : vector<8x128xf32> to vector<8x128xbf16>
    %c0_114 = arith.constant 0 : index
    %c0_115 = arith.constant 0 : index
    %c0_116 = arith.constant 0 : index
    %172 = vector.load %arg19[%c0_114, %c0_115, %c0_116] : memref<2x128x256xbf16, #tpu.memory_space<vmem>>, vector<1x128x256xbf16>
    %173 = vector.shape_cast %172 : vector<1x128x256xbf16> to vector<128x256xbf16>
    %cst_117 = arith.constant dense<0.000000e+00> : vector<8x256xf32>
    %174 = tpu.matmul %171, %173, %cst_117 {dimension_numbers = #tpu.dot_dimension_numbers<[1], [0], [0], [1], [0, 0, 1, 1], [], []>} : vector<8x128xbf16>, vector<128x256xbf16>, vector<8x256xf32> -> vector<8x256xf32>
    %c0_118 = arith.constant 0 : index
    %c0_119 = arith.constant 0 : index
    %c0_120 = arith.constant 0 : index
    %175 = vector.load %arg20[%c0_118, %c0_119, %c0_120] : memref<2x1x256xf32, #tpu.memory_space<vmem>>, vector<1x1x256xf32>
    %176 = vector.shape_cast %175 : vector<1x1x256xf32> to vector<1x256xf32>
    %177 = vector.broadcast %176 : vector<1x256xf32> to vector<8x256xf32>
    %178 = arith.addf %174, %177 : vector<8x256xf32>
    %179 = arith.mulf %178, %178 : vector<8x256xf32>
    %180 = arith.mulf %178, %179 : vector<8x256xf32>
    %cst_121 = arith.constant 4.471500e-02 : f32
    %181 = vector.broadcast %cst_121 : f32 to vector<8x256xf32>
    %182 = arith.mulf %181, %180 : vector<8x256xf32>
    %183 = arith.addf %178, %182 : vector<8x256xf32>
    %cst_122 = arith.constant 0.797884583 : f32
    %184 = vector.broadcast %cst_122 : f32 to vector<8x256xf32>
    %185 = arith.mulf %184, %183 : vector<8x256xf32>
    %186 = math.tanh %185 : vector<8x256xf32>
    %cst_123 = arith.constant 1.000000e+00 : f32
    %187 = vector.broadcast %cst_123 : f32 to vector<8x256xf32>
    %188 = arith.addf %187, %186 : vector<8x256xf32>
    %cst_124 = arith.constant 5.000000e-01 : f32
    %189 = vector.broadcast %cst_124 : f32 to vector<8x256xf32>
    %190 = arith.mulf %189, %188 : vector<8x256xf32>
    %191 = arith.mulf %178, %190 : vector<8x256xf32>
    %192 = arith.truncf %191 : vector<8x256xf32> to vector<8x256xbf16>
    %c0_125 = arith.constant 0 : index
    %c0_126 = arith.constant 0 : index
    %c0_127 = arith.constant 0 : index
    %193 = vector.load %arg21[%c0_125, %c0_126, %c0_127] : memref<2x256x128xbf16, #tpu.memory_space<vmem>>, vector<1x256x128xbf16>
    %194 = vector.shape_cast %193 : vector<1x256x128xbf16> to vector<256x128xbf16>
    %cst_128 = arith.constant dense<0.000000e+00> : vector<8x128xf32>
    %195 = tpu.matmul %192, %194, %cst_128 {dimension_numbers = #tpu.dot_dimension_numbers<[1], [0], [0], [1], [0, 0, 1, 1], [], []>} : vector<8x256xbf16>, vector<256x128xbf16>, vector<8x128xf32> -> vector<8x128xf32>
    %c0_129 = arith.constant 0 : index
    %c0_130 = arith.constant 0 : index
    %c0_131 = arith.constant 0 : index
    %196 = vector.load %arg22[%c0_129, %c0_130, %c0_131] : memref<2x1x128xf32, #tpu.memory_space<vmem>>, vector<1x1x128xf32>
    %197 = vector.shape_cast %196 : vector<1x1x128xf32> to vector<1x128xf32>
    %198 = vector.broadcast %197 : vector<1x128xf32> to vector<8x128xf32>
    %199 = arith.addf %195, %198 : vector<8x128xf32>
    %200 = arith.addf %170, %199 : vector<8x128xf32>
    %c0_132 = arith.constant 0 : index
    %c0_133 = arith.constant 0 : index
    %c0_134 = arith.constant 0 : index
    %201 = vector.load %arg23[%c0_132, %c0_133, %c0_134] : memref<2x1x128xf32, #tpu.memory_space<vmem>>, vector<1x1x128xf32>
    %202 = vector.shape_cast %201 : vector<1x1x128xf32> to vector<1x128xf32>
    %c0_135 = arith.constant 0 : index
    %c0_136 = arith.constant 0 : index
    %c0_137 = arith.constant 0 : index
    %203 = vector.load %arg24[%c0_135, %c0_136, %c0_137] : memref<2x1x128xf32, #tpu.memory_space<vmem>>, vector<1x1x128xf32>
    %204 = vector.shape_cast %203 : vector<1x1x128xf32> to vector<1x128xf32>
    %cst_138 = arith.constant dense<0.000000e+00> : vector<8xf32>
    %205 = vector.multi_reduction <add>, %200, %cst_138 [1] : vector<8x128xf32> to vector<8xf32>
    %206 = vector.shape_cast %205 : vector<8xf32> to vector<8x1xf32>
    %cst_139 = arith.constant 1.280000e+02 : f32
    %207 = vector.broadcast %cst_139 : f32 to vector<8x1xf32>
    %208 = arith.divf %206, %207 : vector<8x1xf32>
    %209 = vector.broadcast %208 : vector<8x1xf32> to vector<8x128xf32>
    %210 = arith.subf %200, %209 : vector<8x128xf32>
    %211 = arith.mulf %210, %210 : vector<8x128xf32>
    %cst_140 = arith.constant dense<0.000000e+00> : vector<8xf32>
    %212 = vector.multi_reduction <add>, %211, %cst_140 [1] : vector<8x128xf32> to vector<8xf32>
    %213 = vector.shape_cast %212 : vector<8xf32> to vector<8x1xf32>
    %cst_141 = arith.constant 1.280000e+02 : f32
    %214 = vector.broadcast %cst_141 : f32 to vector<8x1xf32>
    %215 = arith.divf %213, %214 : vector<8x1xf32>
    %216 = vector.broadcast %208 : vector<8x1xf32> to vector<8x128xf32>
    %217 = arith.subf %200, %216 : vector<8x128xf32>
    %cst_142 = arith.constant 9.99999996E-13 : f32
    %218 = vector.broadcast %cst_142 : f32 to vector<8x1xf32>
    %219 = arith.addf %215, %218 : vector<8x1xf32>
    %220 = math.rsqrt %219 : vector<8x1xf32>
    %221 = vector.broadcast %220 : vector<8x1xf32> to vector<8x128xf32>
    %222 = arith.mulf %217, %221 : vector<8x128xf32>
    %223 = vector.broadcast %202 : vector<1x128xf32> to vector<8x128xf32>
    %224 = arith.mulf %222, %223 : vector<8x128xf32>
    %225 = vector.broadcast %204 : vector<1x128xf32> to vector<8x128xf32>
    %226 = arith.addf %224, %225 : vector<8x128xf32>
    %c1_143 = arith.constant 1 : index
    %c0_144 = arith.constant 0 : index
    %c0_145 = arith.constant 0 : index
    %c0_146 = arith.constant 0 : index
    %227 = vector.load %arg29[%c1_143, %c0_144, %c0_145, %c0_146] : memref<3x1x8x128xf32, #tpu.memory_space<vmem>>, vector<1x1x8x128xf32>
    %228 = vector.shape_cast %227 : vector<1x1x8x128xf32> to vector<8x128xf32>
    %229 = vector.shape_cast %226 : vector<8x128xf32> to vector<1x1x8x128xf32>
    tpu.vector_store %arg29[%c1_143, %c0_144, %c0_145, %c0_146], %229 {strides = array<i32>} : memref<3x1x8x128xf32, #tpu.memory_space<vmem>>, vector<1x1x8x128xf32>,
    %230 = arith.truncf %226 : vector<8x128xf32> to vector<8x128xbf16>
    %c1_147 = arith.constant 1 : index
    %c0_148 = arith.constant 0 : index
    %c0_149 = arith.constant 0 : index
    %c0_150 = arith.constant 0 : index
    %231 = vector.load %arg9[%c1_147, %c0_148, %c0_149, %c0_150] : memref<2x2x128x64xbf16, #tpu.memory_space<vmem>>, vector<1x1x128x64xbf16>
    %232 = vector.shape_cast %231 : vector<1x1x128x64xbf16> to vector<128x64xbf16>
    %cst_151 = arith.constant dense<0.000000e+00> : vector<8x64xf32>
    %233 = tpu.matmul %230, %232, %cst_151 {dimension_numbers = #tpu.dot_dimension_numbers<[1], [0], [0], [1], [0, 0, 1, 1], [], []>} : vector<8x128xbf16>, vector<128x64xbf16>, vector<8x64xf32> -> vector<8x64xf32>
    %c1_152 = arith.constant 1 : index
    %c0_153 = arith.constant 0 : index
    %c0_154 = arith.constant 0 : index
    %c0_155 = arith.constant 0 : index
    %234 = vector.load %arg10[%c1_152, %c0_153, %c0_154, %c0_155] : memref<2x2x1x64xf32, #tpu.memory_space<vmem>>, vector<1x1x1x64xf32>
    %235 = vector.shape_cast %234 : vector<1x1x1x64xf32> to vector<1x64xf32>
    %236 = vector.broadcast %235 : vector<1x64xf32> to vector<8x64xf32>
    %237 = arith.addf %233, %236 : vector<8x64xf32>
    %c1_156 = arith.constant 1 : index
    %c0_157 = arith.constant 0 : index
    %c0_158 = arith.constant 0 : index
    %c0_159 = arith.constant 0 : index
    %238 = vector.load %arg11[%c1_156, %c0_157, %c0_158, %c0_159] : memref<2x2x128x64xbf16, #tpu.memory_space<vmem>>, vector<1x1x128x64xbf16>
    %239 = vector.shape_cast %238 : vector<1x1x128x64xbf16> to vector<128x64xbf16>
    %cst_160 = arith.constant dense<0.000000e+00> : vector<8x64xf32>
    %240 = tpu.matmul %230, %239, %cst_160 {dimension_numbers = #tpu.dot_dimension_numbers<[1], [0], [0], [1], [0, 0, 1, 1], [], []>} : vector<8x128xbf16>, vector<128x64xbf16>, vector<8x64xf32> -> vector<8x64xf32>
    %c1_161 = arith.constant 1 : index
    %c0_162 = arith.constant 0 : index
    %c0_163 = arith.constant 0 : index
    %c0_164 = arith.constant 0 : index
    %241 = vector.load %arg12[%c1_161, %c0_162, %c0_163, %c0_164] : memref<2x2x1x64xf32, #tpu.memory_space<vmem>>, vector<1x1x1x64xf32>
    %242 = vector.shape_cast %241 : vector<1x1x1x64xf32> to vector<1x64xf32>
    %243 = vector.broadcast %242 : vector<1x64xf32> to vector<8x64xf32>
    %244 = arith.addf %240, %243 : vector<8x64xf32>
    %c1_165 = arith.constant 1 : index
    %c0_166 = arith.constant 0 : index
    %c0_167 = arith.constant 0 : index
    %c0_168 = arith.constant 0 : index
    %245 = vector.load %arg13[%c1_165, %c0_166, %c0_167, %c0_168] : memref<2x2x128x64xbf16, #tpu.memory_space<vmem>>, vector<1x1x128x64xbf16>
    %246 = vector.shape_cast %245 : vector<1x1x128x64xbf16> to vector<128x64xbf16>
    %cst_169 = arith.constant dense<0.000000e+00> : vector<8x64xf32>
    %247 = tpu.matmul %230, %246, %cst_169 {dimension_numbers = #tpu.dot_dimension_numbers<[1], [0], [0], [1], [0, 0, 1, 1], [], []>} : vector<8x128xbf16>, vector<128x64xbf16>, vector<8x64xf32> -> vector<8x64xf32>
    %c1_170 = arith.constant 1 : index
    %c0_171 = arith.constant 0 : index
    %c0_172 = arith.constant 0 : index
    %c0_173 = arith.constant 0 : index
    %248 = vector.load %arg14[%c1_170, %c0_171, %c0_172, %c0_173] : memref<2x2x1x64xf32, #tpu.memory_space<vmem>>, vector<1x1x1x64xf32>
    %249 = vector.shape_cast %248 : vector<1x1x1x64xf32> to vector<1x64xf32>
    %250 = vector.broadcast %249 : vector<1x64xf32> to vector<8x64xf32>
    %251 = arith.addf %247, %250 : vector<8x64xf32>
    %252 = arith.truncf %237 : vector<8x64xf32> to vector<8x64xbf16>
    %253 = arith.truncf %244 : vector<8x64xf32> to vector<8x64xbf16>
    %cst_174 = arith.constant dense<0.000000e+00> : vector<8x8xf32>
    %254 = tpu.matmul %252, %253, %cst_174 {dimension_numbers = #tpu.dot_dimension_numbers<[1], [1], [0], [0], [0, 0, 1, 0], [], []>} : vector<8x64xbf16>, vector<8x64xbf16>, vector<8x8xf32> -> vector<8x8xf32>
    %cst_175 = arith.constant 1.250000e-01 : f32
    %255 = vector.broadcast %cst_175 : f32 to vector<8x8xf32>
    %256 = arith.mulf %254, %255 : vector<8x8xf32>
    %257 = vector.broadcast %54 : vector<1x8xf32> to vector<8x8xf32>
    %258 = arith.addf %256, %257 : vector<8x8xf32>
    %259 = arith.truncf %251 : vector<8x64xf32> to vector<8x64xbf16>
    %c1_176 = arith.constant 1 : index
    %c1_177 = arith.constant 1 : index
    %c0_178 = arith.constant 0 : index
    %c0_179 = arith.constant 0 : index
    %260 = vector.load %arg9[%c1_176, %c1_177, %c0_178, %c0_179] : memref<2x2x128x64xbf16, #tpu.memory_space<vmem>>, vector<1x1x128x64xbf16>
    %261 = vector.shape_cast %260 : vector<1x1x128x64xbf16> to vector<128x64xbf16>
    %cst_180 = arith.constant dense<0.000000e+00> : vector<8x64xf32>
    %262 = tpu.matmul %230, %261, %cst_180 {dimension_numbers = #tpu.dot_dimension_numbers<[1], [0], [0], [1], [0, 0, 1, 1], [], []>} : vector<8x128xbf16>, vector<128x64xbf16>, vector<8x64xf32> -> vector<8x64xf32>
    %c1_181 = arith.constant 1 : index
    %c1_182 = arith.constant 1 : index
    %c0_183 = arith.constant 0 : index
    %c0_184 = arith.constant 0 : index
    %263 = vector.load %arg10[%c1_181, %c1_182, %c0_183, %c0_184] : memref<2x2x1x64xf32, #tpu.memory_space<vmem>>, vector<1x1x1x64xf32>
    %264 = vector.shape_cast %263 : vector<1x1x1x64xf32> to vector<1x64xf32>
    %265 = vector.broadcast %264 : vector<1x64xf32> to vector<8x64xf32>
    %266 = arith.addf %262, %265 : vector<8x64xf32>
    %c1_185 = arith.constant 1 : index
    %c1_186 = arith.constant 1 : index
    %c0_187 = arith.constant 0 : index
    %c0_188 = arith.constant 0 : index
    %267 = vector.load %arg11[%c1_185, %c1_186, %c0_187, %c0_188] : memref<2x2x128x64xbf16, #tpu.memory_space<vmem>>, vector<1x1x128x64xbf16>
    %268 = vector.shape_cast %267 : vector<1x1x128x64xbf16> to vector<128x64xbf16>
    %cst_189 = arith.constant dense<0.000000e+00> : vector<8x64xf32>
    %269 = tpu.matmul %230, %268, %cst_189 {dimension_numbers = #tpu.dot_dimension_numbers<[1], [0], [0], [1], [0, 0, 1, 1], [], []>} : vector<8x128xbf16>, vector<128x64xbf16>, vector<8x64xf32> -> vector<8x64xf32>
    %c1_190 = arith.constant 1 : index
    %c1_191 = arith.constant 1 : index
    %c0_192 = arith.constant 0 : index
    %c0_193 = arith.constant 0 : index
    %270 = vector.load %arg12[%c1_190, %c1_191, %c0_192, %c0_193] : memref<2x2x1x64xf32, #tpu.memory_space<vmem>>, vector<1x1x1x64xf32>
    %271 = vector.shape_cast %270 : vector<1x1x1x64xf32> to vector<1x64xf32>
    %272 = vector.broadcast %271 : vector<1x64xf32> to vector<8x64xf32>
    %273 = arith.addf %269, %272 : vector<8x64xf32>
    %c1_194 = arith.constant 1 : index
    %c1_195 = arith.constant 1 : index
    %c0_196 = arith.constant 0 : index
    %c0_197 = arith.constant 0 : index
    %274 = vector.load %arg13[%c1_194, %c1_195, %c0_196, %c0_197] : memref<2x2x128x64xbf16, #tpu.memory_space<vmem>>, vector<1x1x128x64xbf16>
    %275 = vector.shape_cast %274 : vector<1x1x128x64xbf16> to vector<128x64xbf16>
    %cst_198 = arith.constant dense<0.000000e+00> : vector<8x64xf32>
    %276 = tpu.matmul %230, %275, %cst_198 {dimension_numbers = #tpu.dot_dimension_numbers<[1], [0], [0], [1], [0, 0, 1, 1], [], []>} : vector<8x128xbf16>, vector<128x64xbf16>, vector<8x64xf32> -> vector<8x64xf32>
    %c1_199 = arith.constant 1 : index
    %c1_200 = arith.constant 1 : index
    %c0_201 = arith.constant 0 : index
    %c0_202 = arith.constant 0 : index
    %277 = vector.load %arg14[%c1_199, %c1_200, %c0_201, %c0_202] : memref<2x2x1x64xf32, #tpu.memory_space<vmem>>, vector<1x1x1x64xf32>
    %278 = vector.shape_cast %277 : vector<1x1x1x64xf32> to vector<1x64xf32>
    %279 = vector.broadcast %278 : vector<1x64xf32> to vector<8x64xf32>
    %280 = arith.addf %276, %279 : vector<8x64xf32>
    %281 = arith.truncf %266 : vector<8x64xf32> to vector<8x64xbf16>
    %282 = arith.truncf %273 : vector<8x64xf32> to vector<8x64xbf16>
    %cst_203 = arith.constant dense<0.000000e+00> : vector<8x8xf32>
    %283 = tpu.matmul %281, %282, %cst_203 {dimension_numbers = #tpu.dot_dimension_numbers<[1], [1], [0], [0], [0, 0, 1, 0], [], []>} : vector<8x64xbf16>, vector<8x64xbf16>, vector<8x8xf32> -> vector<8x8xf32>
    %cst_204 = arith.constant 1.250000e-01 : f32
    %284 = vector.broadcast %cst_204 : f32 to vector<8x8xf32>
    %285 = arith.mulf %283, %284 : vector<8x8xf32>
    %286 = vector.broadcast %54 : vector<1x8xf32> to vector<8x8xf32>
    %287 = arith.addf %285, %286 : vector<8x8xf32>
    %288 = arith.truncf %280 : vector<8x64xf32> to vector<8x64xbf16>
    %289 = tpu.concatenate %258, %287 in 0 : vector<8x8xf32>, vector<8x8xf32> -> vector<16x8xf32>
    %cst_205 = arith.constant dense<0xFF800000> : vector<16xf32>
    %290 = vector.multi_reduction <maximumf>, %289, %cst_205 [1] : vector<16x8xf32> to vector<16xf32>
    %291 = vector.shape_cast %290 : vector<16xf32> to vector<16x1xf32>
    %292 = vector.broadcast %291 : vector<16x1xf32> to vector<16x8xf32>
    %293 = arith.subf %289, %292 : vector<16x8xf32>
    %294 = math.exp %293 : vector<16x8xf32>
    %cst_206 = arith.constant dense<0.000000e+00> : vector<16xf32>
    %295 = vector.multi_reduction <add>, %294, %cst_206 [1] : vector<16x8xf32> to vector<16xf32>
    %296 = vector.shape_cast %295 : vector<16xf32> to vector<16x1xf32>
    %297 = tpu.reciprocal %296 {approx = true} : vector<16x1xf32> -> vector<16x1xf32>
    %298 = vector.broadcast %297 : vector<16x1xf32> to vector<16x8xf32>
    %299 = arith.mulf %294, %298 : vector<16x8xf32>
    %300 = vector.extract_strided_slice %299 {offsets = [0, 0], sizes = [8, 8], strides = [1, 1]} : vector<16x8xf32> to vector<8x8xf32>
    %301 = arith.truncf %300 : vector<8x8xf32> to vector<8x8xbf16>
    %cst_207 = arith.constant dense<0.000000e+00> : vector<8x64xf32>
    %302 = tpu.matmul %301, %259, %cst_207 {dimension_numbers = #tpu.dot_dimension_numbers<[1], [0], [0], [1], [0, 0, 1, 1], [], []>} : vector<8x8xbf16>, vector<8x64xbf16>, vector<8x64xf32> -> vector<8x64xf32>
    %303 = arith.truncf %302 : vector<8x64xf32> to vector<8x64xbf16>
    %c1_208 = arith.constant 1 : index
    %c0_209 = arith.constant 0 : index
    %c0_210 = arith.constant 0 : index
    %c0_211 = arith.constant 0 : index
    %304 = vector.load %arg15[%c1_208, %c0_209, %c0_210, %c0_211] : memref<2x2x64x128xbf16, #tpu.memory_space<vmem>>, vector<1x1x64x128xbf16>
    %305 = vector.shape_cast %304 : vector<1x1x64x128xbf16> to vector<64x128xbf16>
    %cst_212 = arith.constant dense<0.000000e+00> : vector<8x128xf32>
    %306 = tpu.matmul %303, %305, %cst_212 {dimension_numbers = #tpu.dot_dimension_numbers<[1], [0], [0], [1], [0, 0, 1, 1], [], []>} : vector<8x64xbf16>, vector<64x128xbf16>, vector<8x128xf32> -> vector<8x128xf32>
    %307 = vector.extract_strided_slice %299 {offsets = [8, 0], sizes = [8, 8], strides = [1, 1]} : vector<16x8xf32> to vector<8x8xf32>
    %308 = arith.truncf %307 : vector<8x8xf32> to vector<8x8xbf16>
    %cst_213 = arith.constant dense<0.000000e+00> : vector<8x64xf32>
    %309 = tpu.matmul %308, %288, %cst_213 {dimension_numbers = #tpu.dot_dimension_numbers<[1], [0], [0], [1], [0, 0, 1, 1], [], []>} : vector<8x8xbf16>, vector<8x64xbf16>, vector<8x64xf32> -> vector<8x64xf32>
    %310 = arith.truncf %309 : vector<8x64xf32> to vector<8x64xbf16>
    %c1_214 = arith.constant 1 : index
    %c1_215 = arith.constant 1 : index
    %c0_216 = arith.constant 0 : index
    %c0_217 = arith.constant 0 : index
    %311 = vector.load %arg15[%c1_214, %c1_215, %c0_216, %c0_217] : memref<2x2x64x128xbf16, #tpu.memory_space<vmem>>, vector<1x1x64x128xbf16>
    %312 = vector.shape_cast %311 : vector<1x1x64x128xbf16> to vector<64x128xbf16>
    %cst_218 = arith.constant dense<0.000000e+00> : vector<8x128xf32>
    %313 = tpu.matmul %310, %312, %cst_218 {dimension_numbers = #tpu.dot_dimension_numbers<[1], [0], [0], [1], [0, 0, 1, 1], [], []>} : vector<8x64xbf16>, vector<64x128xbf16>, vector<8x128xf32> -> vector<8x128xf32>
    %314 = arith.addf %306, %313 : vector<8x128xf32>
    %c1_219 = arith.constant 1 : index
    %c0_220 = arith.constant 0 : index
    %c0_221 = arith.constant 0 : index
    %315 = vector.load %arg16[%c1_219, %c0_220, %c0_221] : memref<2x1x128xf32, #tpu.memory_space<vmem>>, vector<1x1x128xf32>
    %316 = vector.shape_cast %315 : vector<1x1x128xf32> to vector<1x128xf32>
    %317 = vector.broadcast %316 : vector<1x128xf32> to vector<8x128xf32>
    %318 = arith.addf %314, %317 : vector<8x128xf32>
    %319 = arith.addf %226, %318 : vector<8x128xf32>
    %c1_222 = arith.constant 1 : index
    %c0_223 = arith.constant 0 : index
    %c0_224 = arith.constant 0 : index
    %320 = vector.load %arg17[%c1_222, %c0_223, %c0_224] : memref<2x1x128xf32, #tpu.memory_space<vmem>>, vector<1x1x128xf32>
    %321 = vector.shape_cast %320 : vector<1x1x128xf32> to vector<1x128xf32>
    %c1_225 = arith.constant 1 : index
    %c0_226 = arith.constant 0 : index
    %c0_227 = arith.constant 0 : index
    %322 = vector.load %arg18[%c1_225, %c0_226, %c0_227] : memref<2x1x128xf32, #tpu.memory_space<vmem>>, vector<1x1x128xf32>
    %323 = vector.shape_cast %322 : vector<1x1x128xf32> to vector<1x128xf32>
    %cst_228 = arith.constant dense<0.000000e+00> : vector<8xf32>
    %324 = vector.multi_reduction <add>, %319, %cst_228 [1] : vector<8x128xf32> to vector<8xf32>
    %325 = vector.shape_cast %324 : vector<8xf32> to vector<8x1xf32>
    %cst_229 = arith.constant 1.280000e+02 : f32
    %326 = vector.broadcast %cst_229 : f32 to vector<8x1xf32>
    %327 = arith.divf %325, %326 : vector<8x1xf32>
    %328 = vector.broadcast %327 : vector<8x1xf32> to vector<8x128xf32>
    %329 = arith.subf %319, %328 : vector<8x128xf32>
    %330 = arith.mulf %329, %329 : vector<8x128xf32>
    %cst_230 = arith.constant dense<0.000000e+00> : vector<8xf32>
    %331 = vector.multi_reduction <add>, %330, %cst_230 [1] : vector<8x128xf32> to vector<8xf32>
    %332 = vector.shape_cast %331 : vector<8xf32> to vector<8x1xf32>
    %cst_231 = arith.constant 1.280000e+02 : f32
    %333 = vector.broadcast %cst_231 : f32 to vector<8x1xf32>
    %334 = arith.divf %332, %333 : vector<8x1xf32>
    %335 = vector.broadcast %327 : vector<8x1xf32> to vector<8x128xf32>
    %336 = arith.subf %319, %335 : vector<8x128xf32>
    %cst_232 = arith.constant 9.99999996E-13 : f32
    %337 = vector.broadcast %cst_232 : f32 to vector<8x1xf32>
    %338 = arith.addf %334, %337 : vector<8x1xf32>
    %339 = math.rsqrt %338 : vector<8x1xf32>
    %340 = vector.broadcast %339 : vector<8x1xf32> to vector<8x128xf32>
    %341 = arith.mulf %336, %340 : vector<8x128xf32>
    %342 = vector.broadcast %321 : vector<1x128xf32> to vector<8x128xf32>
    %343 = arith.mulf %341, %342 : vector<8x128xf32>
    %344 = vector.broadcast %323 : vector<1x128xf32> to vector<8x128xf32>
    %345 = arith.addf %343, %344 : vector<8x128xf32>
    %346 = arith.truncf %345 : vector<8x128xf32> to vector<8x128xbf16>
    %c1_233 = arith.constant 1 : index
    %c0_234 = arith.constant 0 : index
    %c0_235 = arith.constant 0 : index
    %347 = vector.load %arg19[%c1_233, %c0_234, %c0_235] : memref<2x128x256xbf16, #tpu.memory_space<vmem>>, vector<1x128x256xbf16>
    %348 = vector.shape_cast %347 : vector<1x128x256xbf16> to vector<128x256xbf16>
    %cst_236 = arith.constant dense<0.000000e+00> : vector<8x256xf32>
    %349 = tpu.matmul %346, %348, %cst_236 {dimension_numbers = #tpu.dot_dimension_numbers<[1], [0], [0], [1], [0, 0, 1, 1], [], []>} : vector<8x128xbf16>, vector<128x256xbf16>, vector<8x256xf32> -> vector<8x256xf32>
    %c1_237 = arith.constant 1 : index
    %c0_238 = arith.constant 0 : index
    %c0_239 = arith.constant 0 : index
    %350 = vector.load %arg20[%c1_237, %c0_238, %c0_239] : memref<2x1x256xf32, #tpu.memory_space<vmem>>, vector<1x1x256xf32>
    %351 = vector.shape_cast %350 : vector<1x1x256xf32> to vector<1x256xf32>
    %352 = vector.broadcast %351 : vector<1x256xf32> to vector<8x256xf32>
    %353 = arith.addf %349, %352 : vector<8x256xf32>
    %354 = arith.mulf %353, %353 : vector<8x256xf32>
    %355 = arith.mulf %353, %354 : vector<8x256xf32>
    %cst_240 = arith.constant 4.471500e-02 : f32
    %356 = vector.broadcast %cst_240 : f32 to vector<8x256xf32>
    %357 = arith.mulf %356, %355 : vector<8x256xf32>
    %358 = arith.addf %353, %357 : vector<8x256xf32>
    %cst_241 = arith.constant 0.797884583 : f32
    %359 = vector.broadcast %cst_241 : f32 to vector<8x256xf32>
    %360 = arith.mulf %359, %358 : vector<8x256xf32>
    %361 = math.tanh %360 : vector<8x256xf32>
    %cst_242 = arith.constant 1.000000e+00 : f32
    %362 = vector.broadcast %cst_242 : f32 to vector<8x256xf32>
    %363 = arith.addf %362, %361 : vector<8x256xf32>
    %cst_243 = arith.constant 5.000000e-01 : f32
    %364 = vector.broadcast %cst_243 : f32 to vector<8x256xf32>
    %365 = arith.mulf %364, %363 : vector<8x256xf32>
    %366 = arith.mulf %353, %365 : vector<8x256xf32>
    %367 = arith.truncf %366 : vector<8x256xf32> to vector<8x256xbf16>
    %c1_244 = arith.constant 1 : index
    %c0_245 = arith.constant 0 : index
    %c0_246 = arith.constant 0 : index
    %368 = vector.load %arg21[%c1_244, %c0_245, %c0_246] : memref<2x256x128xbf16, #tpu.memory_space<vmem>>, vector<1x256x128xbf16>
    %369 = vector.shape_cast %368 : vector<1x256x128xbf16> to vector<256x128xbf16>
    %cst_247 = arith.constant dense<0.000000e+00> : vector<8x128xf32>
    %370 = tpu.matmul %367, %369, %cst_247 {dimension_numbers = #tpu.dot_dimension_numbers<[1], [0], [0], [1], [0, 0, 1, 1], [], []>} : vector<8x256xbf16>, vector<256x128xbf16>, vector<8x128xf32> -> vector<8x128xf32>
    %c1_248 = arith.constant 1 : index
    %c0_249 = arith.constant 0 : index
    %c0_250 = arith.constant 0 : index
    %371 = vector.load %arg22[%c1_248, %c0_249, %c0_250] : memref<2x1x128xf32, #tpu.memory_space<vmem>>, vector<1x1x128xf32>
    %372 = vector.shape_cast %371 : vector<1x1x128xf32> to vector<1x128xf32>
    %373 = vector.broadcast %372 : vector<1x128xf32> to vector<8x128xf32>
    %374 = arith.addf %370, %373 : vector<8x128xf32>
    %375 = arith.addf %345, %374 : vector<8x128xf32>
    %c1_251 = arith.constant 1 : index
    %c0_252 = arith.constant 0 : index
    %c0_253 = arith.constant 0 : index
    %376 = vector.load %arg23[%c1_251, %c0_252, %c0_253] : memref<2x1x128xf32, #tpu.memory_space<vmem>>, vector<1x1x128xf32>
    %377 = vector.shape_cast %376 : vector<1x1x128xf32> to vector<1x128xf32>
    %c1_254 = arith.constant 1 : index
    %c0_255 = arith.constant 0 : index
    %c0_256 = arith.constant 0 : index
    %378 = vector.load %arg24[%c1_254, %c0_255, %c0_256] : memref<2x1x128xf32, #tpu.memory_space<vmem>>, vector<1x1x128xf32>
    %379 = vector.shape_cast %378 : vector<1x1x128xf32> to vector<1x128xf32>
    %cst_257 = arith.constant dense<0.000000e+00> : vector<8xf32>
    %380 = vector.multi_reduction <add>, %375, %cst_257 [1] : vector<8x128xf32> to vector<8xf32>
    %381 = vector.shape_cast %380 : vector<8xf32> to vector<8x1xf32>
    %cst_258 = arith.constant 1.280000e+02 : f32
    %382 = vector.broadcast %cst_258 : f32 to vector<8x1xf32>
    %383 = arith.divf %381, %382 : vector<8x1xf32>
    %384 = vector.broadcast %383 : vector<8x1xf32> to vector<8x128xf32>
    %385 = arith.subf %375, %384 : vector<8x128xf32>
    %386 = arith.mulf %385, %385 : vector<8x128xf32>
    %cst_259 = arith.constant dense<0.000000e+00> : vector<8xf32>
    %387 = vector.multi_reduction <add>, %386, %cst_259 [1] : vector<8x128xf32> to vector<8xf32>
    %388 = vector.shape_cast %387 : vector<8xf32> to vector<8x1xf32>
    %cst_260 = arith.constant 1.280000e+02 : f32
    %389 = vector.broadcast %cst_260 : f32 to vector<8x1xf32>
    %390 = arith.divf %388, %389 : vector<8x1xf32>
    %391 = vector.broadcast %383 : vector<8x1xf32> to vector<8x128xf32>
    %392 = arith.subf %375, %391 : vector<8x128xf32>
    %cst_261 = arith.constant 9.99999996E-13 : f32
    %393 = vector.broadcast %cst_261 : f32 to vector<8x1xf32>
    %394 = arith.addf %390, %393 : vector<8x1xf32>
    %395 = math.rsqrt %394 : vector<8x1xf32>
    %396 = vector.broadcast %395 : vector<8x1xf32> to vector<8x128xf32>
    %397 = arith.mulf %392, %396 : vector<8x128xf32>
    %398 = vector.broadcast %377 : vector<1x128xf32> to vector<8x128xf32>
    %399 = arith.mulf %397, %398 : vector<8x128xf32>
    %400 = vector.broadcast %379 : vector<1x128xf32> to vector<8x128xf32>
    %401 = arith.addf %399, %400 : vector<8x128xf32>
    %c2 = arith.constant 2 : index
    %c0_262 = arith.constant 0 : index
    %c0_263 = arith.constant 0 : index
    %c0_264 = arith.constant 0 : index
    %402 = vector.load %arg29[%c2, %c0_262, %c0_263, %c0_264] : memref<3x1x8x128xf32, #tpu.memory_space<vmem>>, vector<1x1x8x128xf32>
    %403 = vector.shape_cast %402 : vector<1x1x8x128xf32> to vector<8x128xf32>
    %404 = vector.shape_cast %401 : vector<8x128xf32> to vector<1x1x8x128xf32>
    tpu.vector_store %arg29[%c2, %c0_262, %c0_263, %c0_264], %404 {strides = array<i32>} : memref<3x1x8x128xf32, #tpu.memory_space<vmem>>, vector<1x1x8x128xf32>,
    %405 = vector.extract_strided_slice %401 {offsets = [0, 0], sizes = [1, 128], strides = [1, 1]} : vector<8x128xf32> to vector<1x128xf32>
    %406 = arith.truncf %405 : vector<1x128xf32> to vector<1x128xbf16>
    %c0_265 = arith.constant 0 : index
    %c0_266 = arith.constant 0 : index
    %407 = vector.load %arg25[%c0_265, %c0_266] : memref<128x128xbf16, #tpu.memory_space<vmem>>, vector<128x128xbf16>
    %cst_267 = arith.constant dense<0.000000e+00> : vector<1x128xf32>
    %408 = tpu.matmul %406, %407, %cst_267 {dimension_numbers = #tpu.dot_dimension_numbers<[1], [0], [0], [1], [0, 0, 1, 1], [], []>} : vector<1x128xbf16>, vector<128x128xbf16>, vector<1x128xf32> -> vector<1x128xf32>
    %c0_268 = arith.constant 0 : index
    %c0_269 = arith.constant 0 : index
    %409 = vector.load %arg26[%c0_268, %c0_269] : memref<1x128xf32, #tpu.memory_space<vmem>>, vector<1x128xf32>
    %410 = arith.addf %408, %409 : vector<1x128xf32>
    %411 = math.tanh %410 : vector<1x128xf32>
    %412 = arith.truncf %411 : vector<1x128xf32> to vector<1x128xbf16>
    %c0_270 = arith.constant 0 : index
    %c0_271 = arith.constant 0 : index
    %413 = vector.load %arg27[%c0_270, %c0_271] : memref<128x6xbf16, #tpu.memory_space<vmem>>, vector<128x6xbf16>
    %cst_272 = arith.constant dense<0.000000e+00> : vector<1x6xf32>
    %414 = tpu.matmul %412, %413, %cst_272 {dimension_numbers = #tpu.dot_dimension_numbers<[1], [0], [0], [1], [0, 0, 1, 1], [], []>} : vector<1x128xbf16>, vector<128x6xbf16>, vector<1x6xf32> -> vector<1x6xf32>
    %c0_273 = arith.constant 0 : index
    %c0_274 = arith.constant 0 : index
    %415 = vector.load %arg28[%c0_273, %c0_274] : memref<1x6xf32, #tpu.memory_space<vmem>>, vector<1x6xf32>
    %416 = arith.addf %414, %415 : vector<1x6xf32>
    %c0_275 = arith.constant 0 : index
    %c0_276 = arith.constant 0 : index
    %c0_277 = arith.constant 0 : index
    %417 = vector.load %arg30[%c0_275, %c0_276, %c0_277] : memref<1x1x6xf32, #tpu.memory_space<vmem>>, vector<1x1x6xf32>
    %418 = vector.shape_cast %417 : vector<1x1x6xf32> to vector<1x6xf32>
    %419 = vector.shape_cast %416 : vector<1x6xf32> to vector<1x1x6xf32>
    tpu.vector_store %arg30[%c0_275, %c0_276, %c0_277], %419 {strides = array<i32>} : memref<1x1x6xf32, #tpu.memory_space<vmem>>, vector<1x1x6xf32>,
    return
  }
  func.func @transform_0(%arg0: i32) -> (i32, i32, i32) {
    %c0_i32 = arith.constant 0 : i32
    %c0_i32_0 = arith.constant 0 : i32
    %c0_i32_1 = arith.constant 0 : i32
    return %arg0, %c0_i32, %c0_i32_0 : i32, i32, i32
  }
  func.func @transform_1(%arg0: i32) -> (i32, i32, i32) {
    %c0_i32 = arith.constant 0 : i32
    %c0_i32_0 = arith.constant 0 : i32
    %c0_i32_1 = arith.constant 0 : i32
    return %arg0, %c0_i32, %c0_i32_0 : i32, i32, i32
  }
  func.func @transform_2(%arg0: i32) -> (i32, i32, i32) {
    %c0_i32 = arith.constant 0 : i32
    %c0_i32_0 = arith.constant 0 : i32
    %c0_i32_1 = arith.constant 0 : i32
    return %arg0, %c0_i32, %c0_i32_0 : i32, i32, i32
  }
  func.func @transform_3(%arg0: i32) -> (i32, i32) {
    %c0_i32 = arith.constant 0 : i32
    %c0_i32_0 = arith.constant 0 : i32
    %c0_i32_1 = arith.constant 0 : i32
    return %c0_i32, %c0_i32_0 : i32, i32
  }
  func.func @transform_4(%arg0: i32) -> (i32, i32) {
    %c0_i32 = arith.constant 0 : i32
    %c0_i32_0 = arith.constant 0 : i32
    %c0_i32_1 = arith.constant 0 : i32
    return %c0_i32, %c0_i32_0 : i32, i32
  }
  func.func @transform_5(%arg0: i32) -> (i32, i32) {
    %c0_i32 = arith.constant 0 : i32
    %c0_i32_0 = arith.constant 0 : i32
    %c0_i32_1 = arith.constant 0 : i32
    return %c0_i32, %c0_i32_0 : i32, i32
  }
  func.func @transform_6(%arg0: i32) -> (i32, i32) {
    %c0_i32 = arith.constant 0 : i32
    %c0_i32_0 = arith.constant 0 : i32
    %c0_i32_1 = arith.constant 0 : i32
    return %c0_i32, %c0_i32_0 : i32, i32
  }
  func.func @transform_7(%arg0: i32) -> (i32, i32) {
    %c0_i32 = arith.constant 0 : i32
    %c0_i32_0 = arith.constant 0 : i32
    %c0_i32_1 = arith.constant 0 : i32
    return %c0_i32, %c0_i32_0 : i32, i32
  }
  func.func @transform_8(%arg0: i32) -> (i32, i32, i32, i32) {
    %c0_i32 = arith.constant 0 : i32
    %c0_i32_0 = arith.constant 0 : i32
    %c0_i32_1 = arith.constant 0 : i32
    %c0_i32_2 = arith.constant 0 : i32
    %c0_i32_3 = arith.constant 0 : i32
    return %c0_i32, %c0_i32_0, %c0_i32_1, %c0_i32_2 : i32, i32, i32, i32
  }
  func.func @transform_9(%arg0: i32) -> (i32, i32, i32, i32) {
    %c0_i32 = arith.constant 0 : i32
    %c0_i32_0 = arith.constant 0 : i32
    %c0_i32_1 = arith.constant 0 : i32
    %c0_i32_2 = arith.constant 0 : i32
    %c0_i32_3 = arith.constant 0 : i32
    return %c0_i32, %c0_i32_0, %c0_i32_1, %c0_i32_2 : i32, i32, i32, i32
  }
  func.func @transform_10(%arg0: i32) -> (i32, i32, i32, i32) {
    %c0_i32 = arith.constant 0 : i32
    %c0_i32_0 = arith.constant 0 : i32
    %c0_i32_1 = arith.constant 0 : i32
    %c0_i32_2 = arith.constant 0 : i32
    %c0_i32_3 = arith.constant 0 : i32
    return %c0_i32, %c0_i32_0, %c0_i32_1, %c0_i32_2 : i32, i32, i32, i32
  }
  func.func @transform_11(%arg0: i32) -> (i32, i32, i32, i32) {
    %c0_i32 = arith.constant 0 : i32
    %c0_i32_0 = arith.constant 0 : i32
    %c0_i32_1 = arith.constant 0 : i32
    %c0_i32_2 = arith.constant 0 : i32
    %c0_i32_3 = arith.constant 0 : i32
    return %c0_i32, %c0_i32_0, %c0_i32_1, %c0_i32_2 : i32, i32, i32, i32
  }
  func.func @transform_12(%arg0: i32) -> (i32, i32, i32, i32) {
    %c0_i32 = arith.constant 0 : i32
    %c0_i32_0 = arith.constant 0 : i32
    %c0_i32_1 = arith.constant 0 : i32
    %c0_i32_2 = arith.constant 0 : i32
    %c0_i32_3 = arith.constant 0 : i32
    return %c0_i32, %c0_i32_0, %c0_i32_1, %c0_i32_2 : i32, i32, i32, i32
  }
  func.func @transform_13(%arg0: i32) -> (i32, i32, i32, i32) {
    %c0_i32 = arith.constant 0 : i32
    %c0_i32_0 = arith.constant 0 : i32
    %c0_i32_1 = arith.constant 0 : i32
    %c0_i32_2 = arith.constant 0 : i32
    %c0_i32_3 = arith.constant 0 : i32
    return %c0_i32, %c0_i32_0, %c0_i32_1, %c0_i32_2 : i32, i32, i32, i32
  }
  func.func @transform_14(%arg0: i32) -> (i32, i32, i32, i32) {
    %c0_i32 = arith.constant 0 : i32
    %c0_i32_0 = arith.constant 0 : i32
    %c0_i32_1 = arith.constant 0 : i32
    %c0_i32_2 = arith.constant 0 : i32
    %c0_i32_3 = arith.constant 0 : i32
    return %c0_i32, %c0_i32_0, %c0_i32_1, %c0_i32_2 : i32, i32, i32, i32
  }
  func.func @transform_15(%arg0: i32) -> (i32, i32, i32) {
    %c0_i32 = arith.constant 0 : i32
    %c0_i32_0 = arith.constant 0 : i32
    %c0_i32_1 = arith.constant 0 : i32
    %c0_i32_2 = arith.constant 0 : i32
    return %c0_i32, %c0_i32_0, %c0_i32_1 : i32, i32, i32
  }
  func.func @transform_16(%arg0: i32) -> (i32, i32, i32) {
    %c0_i32 = arith.constant 0 : i32
    %c0_i32_0 = arith.constant 0 : i32
    %c0_i32_1 = arith.constant 0 : i32
    %c0_i32_2 = arith.constant 0 : i32
    return %c0_i32, %c0_i32_0, %c0_i32_1 : i32, i32, i32
  }
  func.func @transform_17(%arg0: i32) -> (i32, i32, i32) {
    %c0_i32 = arith.constant 0 : i32
    %c0_i32_0 = arith.constant 0 : i32
    %c0_i32_1 = arith.constant 0 : i32
    %c0_i32_2 = arith.constant 0 : i32
    return %c0_i32, %c0_i32_0, %c0_i32_1 : i32, i32, i32
  }
  func.func @transform_18(%arg0: i32) -> (i32, i32, i32) {
    %c0_i32 = arith.constant 0 : i32
    %c0_i32_0 = arith.constant 0 : i32
    %c0_i32_1 = arith.constant 0 : i32
    %c0_i32_2 = arith.constant 0 : i32
    return %c0_i32, %c0_i32_0, %c0_i32_1 : i32, i32, i32
  }
  func.func @transform_19(%arg0: i32) -> (i32, i32, i32) {
    %c0_i32 = arith.constant 0 : i32
    %c0_i32_0 = arith.constant 0 : i32
    %c0_i32_1 = arith.constant 0 : i32
    %c0_i32_2 = arith.constant 0 : i32
    return %c0_i32, %c0_i32_0, %c0_i32_1 : i32, i32, i32
  }
  func.func @transform_20(%arg0: i32) -> (i32, i32, i32) {
    %c0_i32 = arith.constant 0 : i32
    %c0_i32_0 = arith.constant 0 : i32
    %c0_i32_1 = arith.constant 0 : i32
    %c0_i32_2 = arith.constant 0 : i32
    return %c0_i32, %c0_i32_0, %c0_i32_1 : i32, i32, i32
  }
  func.func @transform_21(%arg0: i32) -> (i32, i32, i32) {
    %c0_i32 = arith.constant 0 : i32
    %c0_i32_0 = arith.constant 0 : i32
    %c0_i32_1 = arith.constant 0 : i32
    %c0_i32_2 = arith.constant 0 : i32
    return %c0_i32, %c0_i32_0, %c0_i32_1 : i32, i32, i32
  }
  func.func @transform_22(%arg0: i32) -> (i32, i32, i32) {
    %c0_i32 = arith.constant 0 : i32
    %c0_i32_0 = arith.constant 0 : i32
    %c0_i32_1 = arith.constant 0 : i32
    %c0_i32_2 = arith.constant 0 : i32
    return %c0_i32, %c0_i32_0, %c0_i32_1 : i32, i32, i32
  }
  func.func @transform_23(%arg0: i32) -> (i32, i32, i32) {
    %c0_i32 = arith.constant 0 : i32
    %c0_i32_0 = arith.constant 0 : i32
    %c0_i32_1 = arith.constant 0 : i32
    %c0_i32_2 = arith.constant 0 : i32
    return %c0_i32, %c0_i32_0, %c0_i32_1 : i32, i32, i32
  }
  func.func @transform_24(%arg0: i32) -> (i32, i32) {
    %c0_i32 = arith.constant 0 : i32
    %c0_i32_0 = arith.constant 0 : i32
    %c0_i32_1 = arith.constant 0 : i32
    return %c0_i32, %c0_i32_0 : i32, i32
  }
  func.func @transform_25(%arg0: i32) -> (i32, i32) {
    %c0_i32 = arith.constant 0 : i32
    %c0_i32_0 = arith.constant 0 : i32
    %c0_i32_1 = arith.constant 0 : i32
    return %c0_i32, %c0_i32_0 : i32, i32
  }
  func.func @transform_26(%arg0: i32) -> (i32, i32) {
    %c0_i32 = arith.constant 0 : i32
    %c0_i32_0 = arith.constant 0 : i32
    %c0_i32_1 = arith.constant 0 : i32
    return %c0_i32, %c0_i32_0 : i32, i32
  }
  func.func @transform_27(%arg0: i32) -> (i32, i32) {
    %c0_i32 = arith.constant 0 : i32
    %c0_i32_0 = arith.constant 0 : i32
    %c0_i32_1 = arith.constant 0 : i32
    return %c0_i32, %c0_i32_0 : i32, i32
  }
  func.func @transform_28(%arg0: i32) -> (i32, i32, i32, i32) {
    %c0_i32 = arith.constant 0 : i32
    %c0_i32_0 = arith.constant 0 : i32
    %c0_i32_1 = arith.constant 0 : i32
    %c0_i32_2 = arith.constant 0 : i32
    return %c0_i32, %arg0, %c0_i32_0, %c0_i32_1 : i32, i32, i32, i32
  }
  func.func @transform_29(%arg0: i32) -> (i32, i32, i32) {
    %c0_i32 = arith.constant 0 : i32
    %c0_i32_0 = arith.constant 0 : i32
    %c0_i32_1 = arith.constant 0 : i32
    return %arg0, %c0_i32, %c0_i32_0 : i32, i32, i32
  }
}

</mosaic_0001>

<bundles_post_ra>
// kernel: bert_for_emotion_classification.1
= control target key start
LH: loop header
LB: loop body
LE: loop exit
PB: predicated region body
PF: predicated region fallthrough
CT: control target
= control target key end

     0   :  { %s5781_s6 = smov 1   ;;  %s5782_s10 = smov 2   ;;  %s6541_s0 = inlined_call_operand.smem [shape: u32[30], index: -1, kind: input, shape index: {}] }
   0x1   :  { %s5821_s5 = sld [smem:[%s6541_s0]]   ;;  %s5783_s14 = smov 3  }
   0x2   :  { %s5826_s9 = sld [smem:[%s6541_s0 + %s5781_s6]]   ;;  %s5784_s18 = smov 4  }
   0x3   :  { %s5831_s13 = sld [smem:[%s6541_s0 + %s5782_s10]]   ;;  %s5785_s22 = smov 5  }
   0x4   :  { %s5836_s17 = sld [smem:[%s6541_s0 + %s5783_s14]]   ;;  %s5786_s26 = smov 6  }
   0x5   :  { %s5841_s21 = sld [smem:[%s6541_s0 + %s5784_s18]]   ;;  %s5787_s30 = smov 7  }
   0x6   :  { %s5846_s25 = sld [smem:[%s6541_s0 + %s5785_s22]]   ;;  %s5788_s4 = smov 8  }
   0x7   :  { %6556 = sst [smem:[#allocation3_spill]] %s5821_s5  ;;  %s5789_s10 = smov 9  }
   0x8   :  { %6557 = sst [smem:[#allocation4_spill]] %s5826_s9  ;;  %s5790_s15 = smov 10  }
   0x9   :  { %6558 = sst [smem:[#allocation5_spill]] %s5831_s13  ;;  %s5791_s20 = smov 11  }
   0xa   :  { %6559 = sst [smem:[#allocation6_spill]] %s5836_s17  ;;  %s5793_s1 = smov 13  }
   0xb   :  { %6560 = sst [smem:[#allocation7_spill]] %s5841_s21  ;;  %s5794_s7 = smov 14  }
   0xc   :  { %s5851_s29 = sld [smem:[%s6541_s0 + %s5786_s26]]   ;;  %s5792_s26 = smov 12  }
   0xd   :  { %s5856_s3 = sld [smem:[%s6541_s0 + %s5787_s30]]   ;;  %s5796_s22 = smov 16  }
   0xe   :  { %s5861_s8 = sld [smem:[%s6541_s0 + %s5788_s4]]   ;;  %s5797_s28 = smov 17  }
   0xf   :  { %s5866_s14 = sld [smem:[%s6541_s0 + %s5789_s10]]  }
  0x10   :  { %s5871_s19 = sld [smem:[%s6541_s0 + %s5790_s15]]   ;;  %s5795_s15 = smov 15  }
  0x11   :  { %s5876_s24 = sld [smem:[%s6541_s0 + %s5791_s20]]  }
  0x12   :  { %s5881_s30 = sld [smem:[%s6541_s0 + %s5792_s26]]  }
  0x13   :  { %6561 = sst [smem:[#allocation8_spill]] %s5856_s3 }
  0x14   :  { %s5886_s6 = sld [smem:[%s6541_s0 + %s5793_s1]]  }
  0x15   :  { %s5891_s12 = sld [smem:[%s6541_s0 + %s5794_s7]]   ;;  %s5798_s7 = smov 18  }
  0x16   :  { %s5896_s20 = sld [smem:[%s6541_s0 + %s5795_s15]]   ;;  %s5799_s15 = smov 19  }
  0x17   :  { %s5901_s27 = sld [smem:[%s6541_s0 + %s5796_s22]]   ;;  %s5800_s22 = smov 20  }
  0x18   :  { %s5906_s4 = sld [smem:[%s6541_s0 + %s5797_s28]]   ;;  %s5801_s28 = smov 21  }
  0x1b   :  { %6562 = sst [smem:[#allocation9_spill]] %s5891_s12 }
  0x1c   :  { %6563 = sst [smem:[#allocation10_spill]] %s5896_s20 }
  0x1d   :  { %6564 = sst [smem:[#allocation11_spill]] %s5901_s27 }
  0x1e   :  { %6565 = sst [smem:[#allocation12_spill]] %s5906_s4 }
  0x1f   :  { %s5911_s12 = sld [smem:[%s6541_s0 + %s5798_s7]]   ;;  %s5802_s7 = smov 22  }
  0x20   :  { %s5916_s20 = sld [smem:[%s6541_s0 + %s5799_s15]]   ;;  %s5803_s15 = smov 23  }
  0x21   :  { %s5921_s27 = sld [smem:[%s6541_s0 + %s5800_s22]]   ;;  %s5804_s22 = smov 24  }
  0x22   :  { %s5926_s4 = sld [smem:[%s6541_s0 + %s5801_s28]]   ;;  %s5805_s28 = smov 25  }
  0x25   :  { %6566 = sst [smem:[#allocation13_spill]] %s5911_s12 }
  0x26   :  { %6567 = sst [smem:[#allocation14_spill]] %s5916_s20 }
  0x27   :  { %6568 = sst [smem:[#allocation15_spill]] %s5921_s27 }
  0x28   :  { %6569 = sst [smem:[#allocation16_spill]] %s5926_s4 }
  0x29   :  { %s5931_s12 = sld [smem:[%s6541_s0 + %s5802_s7]]   ;;  %s5806_s7 = smov 26  }
  0x2a   :  { %s5936_s20 = sld [smem:[%s6541_s0 + %s5803_s15]]   ;;  %s5807_s15 = smov 27  }
  0x2b   :  { %s5941_s27 = sld [smem:[%s6541_s0 + %s5804_s22]]   ;;  %s5808_s22 = smov 28  }
  0x2c   :  { %s5946_s4 = sld [smem:[%s6541_s0 + %s5805_s28]]   ;;  %s5809_s28 = smov 29  }
  0x2f   :  { %6570 = sst [smem:[#allocation17_spill]] %s5931_s12 }
  0x30   :  { %6571 = sst [smem:[#allocation18_spill]] %s5936_s20 }
  0x31   :  { %6572 = sst [smem:[#allocation19_spill]] %s5941_s27 }
  0x32   :  { %6573 = sst [smem:[#allocation20_spill]] %s5946_s4 }
  0x33   :  { %s5951_s12 = sld [smem:[%s6541_s0 + %s5806_s7]]  }
  0x34   :  { %s5956_s20 = sld [smem:[%s6541_s0 + %s5807_s15]]  }
  0x35   :  { %s5961_s27 = sld [smem:[%s6541_s0 + %s5808_s22]]  }
  0x36   :  { %s5966_s4 = sld [smem:[%s6541_s0 + %s5809_s28]]  }
  0x37   :  { %s5968_s7 = smov 0   ;;  %s5970_s10 = smov 0  }
  0x38   :  { %s5972_s11 = smov 0  }
  0x39 LB: > { %s6574_s21 = sld [smem:[#allocation7_spill]]  ;;  %s6575_s17 = sld [smem:[#allocation6_spill]]  ;;  %s5775_s10 = sphi %s5970_s10, %s6601_s10   ;;  %s5771_s7 = sphi %s5968_s7, %s6600_s7   ;;  %s5779_s11 = sphi %s5972_s11, %s6602_s11  }
  0x3a   : > { %s5981_s0 = sadd.s32 4294967295, %s5779_s11   ;;  %s5983_s15 = sadd.s32 1, %s5779_s11  }
  0x3b   : > { %s677_s16 = ssub.s32 %s5779_s11, %s5983_s15  ;;  %s680_s18 = sadd.s32 1, %s5775_s10 }
  0x3c   : > { %p678_p0 = scmp.eq.s32.totalorder %s677_s16, 0  ;;  %p690_p1 = scmp.ne.s32.totalorder %s5775_s10, %s5771_s7 }
  0x3d   : > { %p691_p2 = scmp.eq.s32.totalorder %s5981_s0, 1  ;;  %p4383_p3 = scmp.ge.s32.totalorder %s5779_s11, 1 }
  0x3e   : > { %s5991_s22 = scalar_select %p678_p0, %s5775_s10, %s680_s18  }
  0x3f   : > { %p5993_p4 = por %p691_p2, %p690_p1  ;;  %p836_p5 = scmp.lt.s32.totalorder %s5779_s11, 3 }
  0x41   : > { %p837_p6 = pnand %p4383_p3, %p836_p5 }
  0x42   : > { %s6577_s5 = sld [smem:[#allocation3_spill]] (!%p837_p6)  ;;  %s6578_s9 = sld [smem:[#allocation4_spill]] (!%p837_p6)  ;;  %v5511_v0 = vld [vmem:[%s6575_s17] sm:$0xff] (!%p837_p6)   ;;  %v5810_v1 = vmov (!%p837_p6), 0   ;;  %v5811_v2 = vmov (!%p837_p6), 0.0   ;;  %v5512_v5 = vld [vmem:[%s6575_s17 + $0x8] sm:$0xff] (!%p837_p6)   ;;  %v937_v7 = vlaneseq (!%p837_p6) }
  0x43   : > { %840 = sbr.rel (%p837_p6) target bundleno = 6234 (0x185a), region = 132  ;;  %p920_p7 = scmp.lt.s32.totalorder (!%p837_p6), %s5981_s0, 1  ;;  %5510 = vset.pattern.permute.xlu0 (!%p837_p6), %v5810_v1  ;;  %5069 = vmatprep.subr.bf16.mxu0 (!%p837_p6), %v5811_v2  ;;  %vm5812_vm1 = vmmov (!%p837_p6), 0   ;;  %vm979_vm3 = vcmask (!%p837_p6), 261120   ;;  %v4387_v13 = vld [vmem:[%s6574_s21] ss:$0 sm:$0xff] (!%p837_p6) }
  0x44   : > { %5070 = vmatpush3.bf16.msra.mxu0 (!%p837_p6), %v5511_v0  ;;  %5077 = vmatprep.subr.bf16.mxu1 (!%p837_p6), %v5811_v2  ;;  %v938_v8 = vand.u32 (!%p837_p6), 127, %v937_v7  ;;  %v4388_v14 = vld [vmem:[%s6574_s21 + $0x1] ss:$0 sm:$0xff] (!%p837_p6)  ;;  %v5515_v25 = vld [vmem:[%s5861_s8 + $0x8] sm:$0xff] (!%p837_p6)   ;;  %v5517_v27 = vld [vmem:[%s5861_s8 + $0x10] sm:$0xff] (!%p837_p6)   ;;  %s6579_s3 = sld [smem:[#allocation8_spill]] (!%p837_p6) }
  0x45   : > { %5071 = vmatprep.subr.bf16.mxu0 (!%p837_p6), %v5811_v2  ;;  %5073 = vmatprep.mubr.msk.bf16.mxu0 (!%p837_p6), %vm5812_vm1, %v5811_v2  ;;  %v1023_v17 = vld [vmem:[%s5846_s25] sm:$0xff] (!%p837_p6)  ;;  %v5516_v26 = vld [vmem:[%s5871_s19 + $0x8] sm:$0xff] (!%p837_p6)   ;;  %v5518_v32 = vld [vmem:[%s5871_s19 + $0x10] sm:$0xff] (!%p837_p6)   ;;  %s912_s11 = sand.u32 (!%p837_p6), 1, %s5771_s7   ;;  %vm1391_vm5 = vcmask (!%p837_p6), 523264   ;;  %s6580_s13 = sld [smem:[#allocation5_spill]] (!%p837_p6) }
  0x46   : > { %5093 = vmatprep.mubr.msk.bf16.mxu1 (!%p837_p6), %vm5812_vm1, %v5811_v2  ;;  %v5513_v23 = vld [vmem:[%s5861_s8] sm:$0xff] (!%p837_p6)   ;;  %v5519_v33 = vld [vmem:[%s5861_s8 + $0x18] sm:$0xff] (!%p837_p6)   ;;  %v5523_v37 = vld [vmem:[%s5861_s8 + $0x28] sm:$0xff] (!%p837_p6)   ;;  %s5453_s16 = smul.u32 (!%p837_p6), 24, %s912_s11  ;;  %vm1837_vm6 = vcmask (!%p837_p6), 64512   ;;  %vm1864_vm7 = vcmask (!%p837_p6), 1043456  }
  0x47   : > { %v5514_v24 = vld [vmem:[%s5871_s19] sm:$0xff] (!%p837_p6)   ;;  %5078 = vmatpush3.bf16.msra.mxu1 (!%p837_p6), %v5513_v23  ;;  %v5520_v34 = vld [vmem:[%s5871_s19 + $0x18] sm:$0xff] (!%p837_p6)   ;;  %v5524_v38 = vld [vmem:[%s5871_s19 + $0x28] sm:$0xff] (!%p837_p6)   ;;  %s6584_s11 = sld [smem:[#allocation11_spill]] (!%p837_p6)  ;;  %vm4203_vm8 = vcmask (!%p837_p6), 40960  }
  0x48   : > { %5072 = vmatpush3.bf16.msra.mxu0 (!%p837_p6), %v5512_v5  ;;  %5079 = vmatprep.subr.bf16.mxu1 (!%p837_p6), %v5811_v2  ;;  %v5521_v35 = vld [vmem:[%s5861_s8 + $0x20] sm:$0xff] (!%p837_p6)   ;;  %v5525_v39 = vld [vmem:[%s5861_s8 + $0x30] sm:$0xff] (!%p837_p6)   ;;  %v5527_v41 = vld [vmem:[%s5861_s8 + $0x38] sm:$0xff] (!%p837_p6)   ;;  %s6065_s18 = scalar_lea.vmem (!%p837_p6), [#allocation2], %s5453_s16 }
  0x49   : > { %5097 = vmatprep.subr.bf16.mxu0 (!%p837_p6), %v5811_v2  ;;  %v5522_v36 = vld [vmem:[%s5871_s19 + $0x20] sm:$0xff] (!%p837_p6)   ;;  %v5526_v40 = vld [vmem:[%s5871_s19 + $0x30] sm:$0xff] (!%p837_p6)   ;;  %v5528_v42 = vld [vmem:[%s5871_s19 + $0x38] sm:$0xff] (!%p837_p6)  }
  0x4a   : > { %s6002_s26 = scalar_select %p920_p7, %s5981_s0, 1  ;;  %v4392_v47 = vld [vmem:[%s5851_s29] ss:$0 sm:$0xff]  ;;  %v5530_v54 = vld [vmem:[%s5881_s30 + $0x8] sm:$0xff]   ;;  %v5531_v55 = vld [vmem:[%s5881_s30 + $0x10] sm:$0xff]  }
  0x4b   : > { %5080 = vmatpush3.bf16.msra.mxu1 %v5515_v25  ;;  %v4393_v49 = vld [vmem:[%s6579_s3] ss:$0 sm:$0xff]  ;;  %v5532_v56 = vld [vmem:[%s5881_s30 + $0x18] sm:$0xff]   ;;  %v5534_v58 = vld [vmem:[%s5881_s30 + $0x28] sm:$0xff]  }
  0x4c   : > { %s4384_s28 = sshll.u32 %s6002_s26, 3  ;;  %5081 = vmatprep.subr.bf16.mxu1 %v5811_v2  ;;  %v5529_v52 = vld [vmem:[%s5881_s30] sm:$0xff]   ;;  %v5535_v59 = vld [vmem:[%s5881_s30 + $0x30] sm:$0xff]   ;;  %v5536_v60 = vld [vmem:[%s5881_s30 + $0x38] sm:$0xff]   ;;  %s930_s7 = scalar_lea.vmem %s6580_s13, %s6002_s26 }
  0x4d   : > { %s923_s1 = scalar_lea.vmem %s6577_s5, %s4384_s28  ;;  %s927_s2 = scalar_lea.vmem %s6578_s9, %s4384_s28  ;;  %v5533_v57 = vld [vmem:[%s5881_s30 + $0x20] sm:$0xff]   ;;  %v5538_v62 = vld [vmem:[%s5871_s19 + $0x48] sm:$0xff]   ;;  %v5539_v63 = vld [vmem:[%s5871_s19 + $0x50] sm:$0xff]  }
  0x4e   : > { %v935_v3 = vld [vmem:[%s923_s1] sm:$0xff]  ;;  %v5540_v0 = vld [vmem:[%s5871_s19 + $0x58] sm:$0xff]   ;;  %v5543_v5 = vld [vmem:[%s5871_s19 + $0x70] sm:$0xff]   ;;  %s6581_s28 = sld [smem:[#allocation9_spill]]  ;;  %s6582_s1 = sld [smem:[#allocation10_spill]] }
  0x4f   : > { %v936_v4 = vld [vmem:[%s927_s2] sm:$0xff]  ;;  %940 = vperm.xlu0 %5510, %v935_v3   ;;  %5082 = vmatpush3.bf16.msra.mxu1 %v5517_v27  ;;  %v5547_v25 = vld [vmem:[%s5861_s8 + $0x50] sm:$0xff]   ;;  %s6583_s2 = sld [smem:[#allocation13_spill]]  ;;  %s6585_s16 = smov %s6584_s11 }
  0x50   : > { %vm950_vm0 = vcmp.eq.s32.totalorder %v936_v4, 0  ;;  %5083 = vmatprep.subr.bf16.mxu1 %v5811_v2  ;;  %v5537_v61 = vld [vmem:[%s5871_s19 + $0x40] sm:$0xff]   ;;  %v5542_v4 = vld [vmem:[%s5871_s19 + $0x68] sm:$0xff]   ;;  %s6588_s5 = sld [smem:[#allocation15_spill]] }
  0x51   : > { %v953_v6 = vsel %vm950_vm0, 1, %v5810_v1  ;;  %v5541_v3 = vld [vmem:[%s5871_s19 + $0x60] sm:$0xff]  }
  0x52   : > { %v5549_v27 = vld [vmem:[%s5861_s8 + $0x60] sm:$0xff]  }
  0x53   : > { %955 = vperm.xlu0 %5510, %v953_v6   ;;  %5084 = vmatpush3.bf16.msra.mxu1 %v5519_v33  ;;  %v5544_v6 = vld [vmem:[%s5871_s19 + $0x78] sm:$0xff]  }
  0x54   : > { %5085 = vmatprep.subr.bf16.mxu1 %v5811_v2 }
  0x57   : > { %5086 = vmatpush3.bf16.msra.mxu1 %v5521_v35  ;;  %v5553_v35 = vld [vmem:[%s5881_s30 + $0x40] sm:$0xff]  }
  0x58   : > { %5087 = vmatprep.subr.bf16.mxu1 %v5811_v2 }
  0x5b   : > { %5088 = vmatpush3.bf16.msra.mxu1 %v5523_v37  ;;  %v5555_v37 = vld [vmem:[%s5881_s30 + $0x50] sm:$0xff]  }
  0x5c   : > { %5089 = vmatprep.subr.bf16.mxu1 %v5811_v2 }
  0x5f   : > { %5090 = vmatpush3.bf16.msra.mxu1 %v5525_v39  ;;  %v5557_v39 = vld [vmem:[%s5881_s30 + $0x60] sm:$0xff]  }
  0x60   : > { %5091 = vmatprep.subr.bf16.mxu1 %v5811_v2 }
  0x63   : > { %5092 = vmatpush3.bf16.msra.mxu1 %v5527_v41  ;;  %v5558_v41 = vld [vmem:[%s5881_s30 + $0x68] sm:$0xff]  }
  0x64   : > { %5117 = vmatprep.subr.bf16.mxu1 %v5811_v2 }
  0xce   : > { %v941_v9 = vpop.permute.xlu0 %940 }
  0xcf   : > { %vm942_vm2 = vcmp.eq.s32.totalorder %v941_v9, %v938_v8  ;;  %v4403_v8 = vld [vmem:[%s5876_s24] ss:$0 sm:$0xff] }
  0xd0   : > { %v4386_v10 = vsel %vm942_vm2, 1.0, %v5811_v2 }
  0xd1   : > { %v945_v11 = vpack.c.bf16 %v4386_v10, %v4386_v10 }
  0xd2   : > { %v956_v12 = vpop.permute.xlu0 %955 }
  0xd3   : > { %5074 = vmatmul.mubr.msk.bf16.vlgmr.msra.gmra.mrb[0].mxu0 %vm979_vm3, %v945_v11  ;;  %vm957_vm4 = vcmp.eq.s32.totalorder %v956_v12, 1 }
  0xd4   : > { %5113 = vmatprep.mubr.msk.bf16.mxu0 %vm5812_vm1, %v5811_v2  ;;  %v966_v15 = vsel %vm957_vm4, %v4387_v13, %v4388_v14  ;;  %5098 = vmatpush3.bf16.msra.mxu0 %v5514_v24  ;;  %v5546_v24 = vld [vmem:[%s5861_s8 + $0x48] sm:$0xff]  }
  0xd5   : > { %5099 = vmatprep.subr.bf16.mxu0 %v5811_v2 }
  0xd8   : > { %5100 = vmatpush3.bf16.msra.mxu0 %v5516_v26  ;;  %v5548_v26 = vld [vmem:[%s5861_s8 + $0x58] sm:$0xff]  }
  0xd9   : > { %5101 = vmatprep.subr.bf16.mxu0 %v5811_v2 }
  0xdc   : > { %5102 = vmatpush3.bf16.msra.mxu0 %v5518_v32  ;;  %v5551_v32 = vld [vmem:[%s5861_s8 + $0x70] sm:$0xff]  }
  0xdd   : > { %5103 = vmatprep.subr.bf16.mxu0 %v5811_v2 }
  0xe0   : > { %5104 = vmatpush3.bf16.msra.mxu0 %v5520_v34  ;;  %v5552_v34 = vld [vmem:[%s5861_s8 + $0x78] sm:$0xff]  }
  0xe1   : > { %5105 = vmatprep.subr.bf16.mxu0 %v5811_v2 }
  0xe4   : > { %5106 = vmatpush3.bf16.msra.mxu0 %v5522_v36  ;;  %v5554_v36 = vld [vmem:[%s5881_s30 + $0x48] sm:$0xff]  }
  0xe5   : > { %5107 = vmatprep.subr.bf16.mxu0 %v5811_v2 }
  0xe8   : > { %5108 = vmatpush3.bf16.msra.mxu0 %v5524_v38  ;;  %v5556_v38 = vld [vmem:[%s5881_s30 + $0x58] sm:$0xff]  }
  0xe9   : > { %5109 = vmatprep.subr.bf16.mxu0 %v5811_v2 }
  0xec   : > { %5110 = vmatpush3.bf16.msra.mxu0 %v5526_v40  ;;  %v4466_v40 = vld [vmem:[%s5876_s24 + $0x1] ss:$0 sm:$0xff] }
  0xed   : > { %5111 = vmatprep.subr.bf16.mxu0 %v5811_v2 }
  0xf0   : > { %5112 = vmatpush3.bf16.msra.mxu0 %v5528_v42 }
  0xf1   : > { %5137 = vmatprep.subr.bf16.mxu0 %v5811_v2 }
 0x1a6   : > { %v1017_v16 = vpop.f32.mrb[0].mxu0 }
 0x1a7   : > { %v1018_v18 = vadd.f32 %v1017_v16, %v966_v15  ;;  %v5075_v19 = vpop.f32.mrb[1].mxu0 }
 0x1a8   : > { %v1020_v20 = vpop.f32.mrb[2].mxu0  ;;  %v4394_v19 = vld [vmem:[%s5866_s14] ss:$0 sm:$0xff] }
 0x1a9   : > { %v5076_v21 = vpop.f32.mrb[3].mxu0  ;;  %v1024_v22 = vadd.f32 %v1023_v17, %v1018_v18 }
 0x1ab   : > { %1027 = vadd.xlane.f32.xlu1 %v1024_v22 }
 0x238   : > { %v1028_v28 = vpop.xlane.xlu1 %1027 }
 0x239   : > { %v1030_v29 = vmul.f32 0.0078125, %v1028_v28  ;;  %v5550_v28 = vld [vmem:[%s5861_s8 + $0x68] sm:$0xff]  }
 0x23b   : > { %v1031_v30 = vsub.f32 %v1024_v22, %v1030_v29  ;;  %v5545_v22 = vld [vmem:[%s5861_s8 + $0x40] sm:$0xff]  }
 0x23d   : > { %v1032_v31 = vmul.f32 %v1031_v30, %v1031_v30 }
 0x23f   : > { %1033 = vadd.xlane.f32.xlu1 %v1032_v31 }
 0x2cc   : > { %v1034_v43 = vpop.xlane.xlu1 %1033 }
 0x2cd   : > { %v1035_v44 = vmul.f32 0.0078125, %v1034_v43 }
 0x2cf   : > { %v1036_v45 = vadd.f32 1e-12, %v1035_v44 }
 0x2d1   : > { %5721 = vrsqrt.f32 %v1036_v45 }
 0x2db   : > { %v5722_v46 = vpop.eup %5721 }
 0x2dc   : > { %v1038_v48 = vmul.f32 %v5722_v46, %v1031_v30  ;;  %v5559_v46 = vld [vmem:[%s5881_s30 + $0x70] sm:$0xff]  }
 0x2de   : > { %v1045_v50 = vmul.f32 %v4392_v47, %v1038_v48 }
 0x2e0   : > { %v6058_v51 = vadd.f32 %v4393_v49, %v1045_v50  ;;  %v5560_v50 = vld [vmem:[%s5881_s30 + $0x78] sm:$0xff]  }
 0x2e2   : > { %v6063_v53 = vpack.c.bf16 %v6058_v51, %v6058_v51  ;;  %1053 = vst [vmem:[%s6065_s18] sm:$0xff] %v6058_v51 }
 0x2e4   : > { %5094 = vmatmul.mubr.bf16.vlgmr.msra.gmra.mrb[0].mxu1 %v6063_v53  ;;  %5114 = vmatmul.mubr.bf16.vlgmr.msra.gmra.mrb[4].mxu0 %v6063_v53 }
 0x2e5   : > { %5118 = vmatpush3.bf16.msra.mxu1 %v5529_v52  ;;  %5133 = vmatprep.mubr.msk.bf16.mxu1 %vm5812_vm1, %v5811_v2 }
 0x2e6   : > { %5119 = vmatprep.subr.bf16.mxu1 %v5811_v2  ;;  %5139 = vmatprep.mubr.msk.bf16.mxu0 %vm5812_vm1, %v5811_v2 }
 0x2e9   : > { %5120 = vmatpush3.bf16.msra.mxu1 %v5530_v54  ;;  %v6162_v54 = vld [vmem:[%s930_s7] ss:$0 sm:$0xff]  ;;  %s6586_s7 = sld [smem:[#allocation12_spill]] }
 0x2ea   : > { %5121 = vmatprep.subr.bf16.mxu1 %v5811_v2 }
 0x2ed   : > { %5122 = vmatpush3.bf16.msra.mxu1 %v5531_v55 }
 0x2ee   : > { %5123 = vmatprep.subr.bf16.mxu1 %v5811_v2 }
 0x2ef   : > { %s6587_s3 = smov %s6586_s7 }
 0x2f1   : > { %5124 = vmatpush3.bf16.msra.mxu1 %v5532_v56 }
 0x2f2   : > { %5125 = vmatprep.subr.bf16.mxu1 %v5811_v2 }
 0x2f5   : > { %5126 = vmatpush3.bf16.msra.mxu1 %v5533_v57 }
 0x2f6   : > { %5127 = vmatprep.subr.bf16.mxu1 %v5811_v2 }
 0x2f9   : > { %5128 = vmatpush3.bf16.msra.mxu1 %v5534_v58 }
 0x2fa   : > { %5129 = vmatprep.subr.bf16.mxu1 %v5811_v2 }
 0x2fd   : > { %5130 = vmatpush3.bf16.msra.mxu1 %v5535_v59 }
 0x2fe   : > { %5131 = vmatprep.subr.bf16.mxu1 %v5811_v2 }
 0x301   : > { %5132 = vmatpush3.bf16.msra.mxu1 %v5536_v60 }
 0x302   : > { %5163 = vmatprep.subr.bf16.mxu1 %v5811_v2 }
 0x304   : > { %5134 = vmatmul.mubr.bf16.vlgmr.msra.gmra.mrb[4].mxu1 %v6063_v53 }
 0x305   : > { %5164 = vmatpush3.bf16.msra.mxu1 %v5537_v61  ;;  %5179 = vmatprep.mubr.msk.bf16.mxu1 %vm5812_vm1, %v5811_v2  ;;  %v4412_v61 = vld [vmem:[%s5886_s6] ss:$0 sm:$0xff] }
 0x306   : > { %5165 = vmatprep.subr.bf16.mxu1 %v5811_v2 }
 0x309   : > { %5166 = vmatpush3.bf16.msra.mxu1 %v5538_v62  ;;  %v4440_v62 = vld [vmem:[%s5866_s14 + $0x1] ss:$0 sm:$0xff] }
 0x30a   : > { %5167 = vmatprep.subr.bf16.mxu1 %v5811_v2 }
 0x30d   : > { %5168 = vmatpush3.bf16.msra.mxu1 %v5539_v63 }
 0x30e   : > { %5169 = vmatprep.subr.bf16.mxu1 %v5811_v2 }
 0x311   : > { %5170 = vmatpush3.bf16.msra.mxu1 %v5540_v0 }
 0x312   : > { %5171 = vmatprep.subr.bf16.mxu1 %v5811_v2 }
 0x315   : > { %5172 = vmatpush3.bf16.msra.mxu1 %v5541_v3 }
 0x316   : > { %5173 = vmatprep.subr.bf16.mxu1 %v5811_v2 }
 0x319   : > { %5174 = vmatpush3.bf16.msra.mxu1 %v5542_v4 }
 0x31a   : > { %5175 = vmatprep.subr.bf16.mxu1 %v5811_v2 }
 0x31d   : > { %5176 = vmatpush3.bf16.msra.mxu1 %v5543_v5 }
 0x31e   : > { %5177 = vmatprep.subr.bf16.mxu1 %v5811_v2 }
 0x321   : > { %5178 = vmatpush3.bf16.msra.mxu1 %v5544_v6 }
 0x322   : > { %5203 = vmatprep.subr.bf16.mxu1 %v5811_v2 }
 0x324   : > { %5180 = vmatmul.mubr.bf16.vlgmr.msra.gmra.mrb[8].mxu1 %v6063_v53 }
 0x325   : > { %5205 = vmatprep.mubr.msk.bf16.mxu1 %vm5812_vm1, %v5811_v2 }
 0x3b7   : > { %v1161_v9 = vpop.f32.mrb[0].mxu1  ;;  %v1272_v10 = vpop.f32.mrb[4].mxu0 }
 0x3b8   : > { %v1273_v11 = vadd.f32 %v4403_v8, %v1272_v10  ;;  %v5095_v12 = vpop.f32.mrb[1].mxu1  ;;  %v5115_v13 = vpop.f32.mrb[5].mxu0  ;;  %v1162_v21 = vadd.f32 %v4394_v19, %v1161_v9  ;;  %v4492_v10 = vld [vmem:[%s5886_s6 + $0x1] ss:$0 sm:$0xff] }
 0x3b9   : > { %v1164_v14 = vpop.f32.mrb[2].mxu1  ;;  %v1275_v15 = vpop.f32.mrb[6].mxu0 }
 0x3ba   : > { %v1390_v16 = vpack.c.bf16 %v1273_v11, %v1273_v11  ;;  %v5096_v17 = vpop.f32.mrb[3].mxu1  ;;  %v5116_v18 = vpop.f32.mrb[7].mxu0  ;;  %v1389_v23 = vpack.c.bf16 %v1162_v21, %v1162_v21 }
 0x3bc   : > { %v1396_v20 = vsel %vm1391_vm5, %v1390_v16, 0 }
 0x3bd   : > { %5138 = vmatpush3.bf16.xpose.msra.mxu0 %v1396_v20 }
 0x3be   : > { %5143 = vmatprep.subr.bf16.mxu0 %v5811_v2 }
 0x3c4   : > { %5140 = vmatmul.mubr.msk.bf16.vlgmr.msra.gmra.mrb[8].mxu0 %vm1391_vm5, %v1389_v23 }
 0x3c5   : > { %5144 = vmatpush3.bf16.msra.mxu0 %v5545_v22  ;;  %5159 = vmatprep.mubr.msk.bf16.mxu0 %vm5812_vm1, %v5811_v2 }
 0x3c6   : > { %5145 = vmatprep.subr.bf16.mxu0 %v5811_v2 }
 0x3c9   : > { %5146 = vmatpush3.bf16.msra.mxu0 %v5546_v24 }
 0x3ca   : > { %5147 = vmatprep.subr.bf16.mxu0 %v5811_v2 }
 0x3cd   : > { %5148 = vmatpush3.bf16.msra.mxu0 %v5547_v25 }
 0x3ce   : > { %5149 = vmatprep.subr.bf16.mxu0 %v5811_v2 }
 0x3d1   : > { %5150 = vmatpush3.bf16.msra.mxu0 %v5548_v26 }
 0x3d2   : > { %5151 = vmatprep.subr.bf16.mxu0 %v5811_v2 }
 0x3d5   : > { %5152 = vmatpush3.bf16.msra.mxu0 %v5549_v27 }
 0x3d6   : > { %5153 = vmatprep.subr.bf16.mxu0 %v5811_v2 }
 0x3d7   : > { %v1383_v29 = vpop.f32.mrb[4].mxu1 }
 0x3d8   : > { %v5135_v30 = vpop.f32.mrb[5].mxu1 }
 0x3d9   : > { %v1386_v31 = vpop.f32.mrb[6].mxu1  ;;  %5154 = vmatpush3.bf16.msra.mxu0 %v5550_v28 }
 0x3da   : > { %v5136_v33 = vpop.f32.mrb[7].mxu1  ;;  %5155 = vmatprep.subr.bf16.mxu0 %v5811_v2 }
 0x3dd   : > { %5156 = vmatpush3.bf16.msra.mxu0 %v5551_v32 }
 0x3de   : > { %5157 = vmatprep.subr.bf16.mxu0 %v5811_v2 }
 0x3e1   : > { %5158 = vmatpush3.bf16.msra.mxu0 %v5552_v34 }
 0x3e2   : > { %5183 = vmatprep.subr.bf16.mxu0 %v5811_v2 }
 0x3e4   : > { %5160 = vmatmul.mubr.bf16.vlgmr.msra.gmra.mrb[12].mxu0 %v6063_v53 }
 0x3e5   : > { %5184 = vmatpush3.bf16.msra.mxu0 %v5553_v35  ;;  %5199 = vmatprep.mubr.msk.bf16.mxu0 %vm5812_vm1, %v5811_v2 }
 0x3e6   : > { %5185 = vmatprep.subr.bf16.mxu0 %v5811_v2 }
 0x3e9   : > { %5186 = vmatpush3.bf16.msra.mxu0 %v5554_v36 }
 0x3ea   : > { %5187 = vmatprep.subr.bf16.mxu0 %v5811_v2 }
 0x3ed   : > { %5188 = vmatpush3.bf16.msra.mxu0 %v5555_v37 }
 0x3ee   : > { %5189 = vmatprep.subr.bf16.mxu0 %v5811_v2 }
 0x3f1   : > { %5190 = vmatpush3.bf16.msra.mxu0 %v5556_v38 }
 0x3f2   : > { %5191 = vmatprep.subr.bf16.mxu0 %v5811_v2 }
 0x3f5   : > { %5192 = vmatpush3.bf16.msra.mxu0 %v5557_v39  ;;  %v5565_v39 = vld [vmem:[%s6581_s28 + $0x20] sm:$0xff]  }
 0x3f6   : > { %5193 = vmatprep.subr.bf16.mxu0 %v5811_v2 }
 0x3f7   : > { %v1667_v42 = vpop.f32.mrb[8].mxu1 }
 0x3f8   : > { %v1668_v43 = vadd.f32 %v4466_v40, %v1667_v42  ;;  %v5181_v44 = vpop.f32.mrb[9].mxu1  ;;  %v5566_v40 = vld [vmem:[%s6581_s28 + $0x28] sm:$0xff]  }
 0x3f9   : > { %v1670_v45 = vpop.f32.mrb[10].mxu1  ;;  %5194 = vmatpush3.bf16.msra.mxu0 %v5558_v41  ;;  %v5567_v41 = vld [vmem:[%s6581_s28 + $0x30] sm:$0xff]  }
 0x3fa   : > { %v1787_v47 = vpack.c.bf16 %v1668_v43, %v1668_v43  ;;  %v5182_v48 = vpop.f32.mrb[11].mxu1  ;;  %5195 = vmatprep.subr.bf16.mxu0 %v5811_v2  ;;  %v5561_v45 = vld [vmem:[%s6581_s28] sm:$0xff]  }
 0x3fb   : > { %v5563_v48 = vld [vmem:[%s6581_s28 + $0x10] sm:$0xff]  }
 0x3fc   : > { %v1792_v49 = vsel %vm1391_vm5, %v1787_v47, 0  ;;  %v5562_v47 = vld [vmem:[%s6581_s28 + $0x8] sm:$0xff]  }
 0x3fd   : > { %5204 = vmatpush3.bf16.xpose.msra.mxu1 %v1792_v49  ;;  %5196 = vmatpush3.bf16.msra.mxu0 %v5559_v46  ;;  %v5564_v49 = vld [vmem:[%s6581_s28 + $0x18] sm:$0xff]  }
 0x3fe   : > { %5197 = vmatprep.subr.bf16.mxu0 %v5811_v2  ;;  %5209 = vmatprep.subr.bf16.mxu1 %v5811_v2 }
 0x401   : > { %5198 = vmatpush3.bf16.msra.mxu0 %v5560_v50 }
 0x402   : > { %5215 = vmatprep.subr.bf16.mxu0 %v5811_v2 }
 0x404   : > { %5200 = vmatmul.mubr.bf16.vlgmr.msra.gmra.mrb[16].mxu0 %v6063_v53  ;;  %v1384_v53 = vadd.f32 %v4412_v61, %v1383_v29 }
 0x405   : > { %5217 = vmatprep.mubr.msk.bf16.mxu0 %vm5812_vm1, %v5811_v2 }
 0x406   : > { %v1446_v0 = vpack.c.bf16 %v1384_v53, %v1384_v53 }
 0x408   : > { %v1866_v9 = vsel %vm1864_vm7, %v1446_v0, 0 }
 0x497   : > { %v1432_v52 = vpop.f32.mrb[8].mxu0 }
 0x498   : > { %v1438_v55 = vmul.f32 0.125, %v1432_v52  ;;  %v5141_v56 = vpop.f32.mrb[9].mxu0 }
 0x499   : > { %v1435_v57 = vpop.f32.mrb[10].mxu0 }
 0x49a   : > { %v5142_v58 = vpop.f32.mrb[11].mxu0  ;;  %v1445_v59 = vadd.f32 %v6162_v54, %v1438_v55 }
 0x49b   : > { %v5568_v58 = vld [vmem:[%s6581_s28 + $0x38] sm:$0xff]  }
 0x49c   : > { %v1838_v60 = vsel %vm1837_vm6, %v1445_v59, -inf }
 0x49d   : > { %1839 = vmax.xlane.f32.xlu0 %v1838_v60 }
 0x4b7   : > { %v1554_v63 = vpop.f32.mrb[12].mxu0 }
 0x4b8   : > { %v1555_v3 = vadd.f32 %v4440_v62, %v1554_v63  ;;  %v5161_v4 = vpop.f32.mrb[13].mxu0 }
 0x4b9   : > { %v1557_v5 = vpop.f32.mrb[14].mxu0 }
 0x4ba   : > { %v1786_v6 = vpack.c.bf16 %v1555_v3, %v1555_v3  ;;  %v5162_v8 = vpop.f32.mrb[15].mxu0 }
 0x4bc   : > { %5206 = vmatmul.mubr.msk.bf16.vlgmr.msra.gmra.mrb[12].mxu1 %vm1391_vm5, %v1786_v6  ;;  %v4522_v6 = vld [vmem:[%s6582_s1] ss:$0 sm:$0xff] }
 0x4bd   : > { %5210 = vmatpush3.bf16.msra.mxu1 %v1866_v9  ;;  %5211 = vmatprep.mubr.msk.bf16.mxu1 %vm5812_vm1, %v5811_v2 }
 0x4be   : > { %5221 = vmatprep.subr.bf16.mxu1 %v5811_v2 }
 0x4d7   : > { %v1780_v11 = vpop.f32.mrb[16].mxu0 }
 0x4d8   : > { %v1781_v12 = vadd.f32 %v4492_v10, %v1780_v11  ;;  %v5201_v13 = vpop.f32.mrb[17].mxu0 }
 0x4d9   : > { %v1783_v14 = vpop.f32.mrb[18].mxu0 }
 0x4da   : > { %v1836_v15 = vpack.c.bf16 %v1781_v12, %v1781_v12  ;;  %v5202_v16 = vpop.f32.mrb[19].mxu0  ;;  %v5569_v14 = vld [vmem:[%s6583_s2] ss:$8 sps:$4 sm:$0xff]  }
 0x4db   : > { %v5574_v16 = vld [vmem:[%s6583_s2 + $0x14] ss:$8 sps:$4 sm:$0xff]  }
 0x4dc   : > { %v1922_v17 = vsel %vm1864_vm7, %v1836_v15, 0  ;;  %v5571_v15 = vld [vmem:[%s6583_s2 + $0x4] ss:$8 sps:$4 sm:$0xff]  }
 0x4dd   : > { %5216 = vmatpush3.bf16.msra.mxu0 %v1922_v17  ;;  %v5572_v17 = vld [vmem:[%s6583_s2 + $0x10] ss:$8 sps:$4 sm:$0xff]  }
 0x4de   : > { %5233 = vmatprep.subr.bf16.mxu0 %v5811_v2 }
 0x52a   : > { %v1840_v18 = vpop.xlane.xlu0 %1839 }
 0x52b   : > { %v1844_v19 = vsub.f32 %v1445_v59, %v1840_v18  ;;  %v5577_v18 = vld [vmem:[%s6583_s2 + $0x24] ss:$8 sps:$4 sm:$0xff]  }
 0x52d   : > { %v1846_v20 = vmul.f32 1.442695, %v1844_v19  ;;  %v5575_v19 = vld [vmem:[%s6583_s2 + $0x20] ss:$8 sps:$4 sm:$0xff]  }
 0x52f   : > { %5723 = vpow2.f32 %v1846_v20 }
 0x539   : > { %v5724_v28 = vpop.eup %5723 }
 0x53a   : > { %v1850_v29 = vsel %vm1837_vm6, %v5724_v28, 0.0 }
 0x58f   : > { %v1828_v21 = vpop.f32.mrb[12].mxu1 }
 0x590   : > { %v1834_v22 = vmul.f32 0.125, %v1828_v21  ;;  %v5207_v23 = vpop.f32.mrb[13].mxu1 }
 0x591   : > { %v1831_v24 = vpop.f32.mrb[14].mxu1  ;;  %v5580_v23 = vld [vmem:[%s6583_s2 + $0x34] ss:$8 sps:$4 sm:$0xff]  }
 0x592   : > { %v5208_v25 = vpop.f32.mrb[15].mxu1  ;;  %v1835_v26 = vadd.f32 %v6162_v54, %v1834_v22  ;;  %v5578_v24 = vld [vmem:[%s6583_s2 + $0x30] ss:$8 sps:$4 sm:$0xff]  }
 0x593   : > { %v5583_v25 = vld [vmem:[%s6583_s2 + $0x44] ss:$8 sps:$4 sm:$0xff]  }
 0x594   : > { %v1841_v27 = vsel %vm1837_vm6, %v1835_v26, -inf }
 0x595   : > { %1842 = vmax.xlane.f32.xlu1 %v1841_v27  ;;  %v5586_v27 = vld [vmem:[%s6583_s2 + $0x54] ss:$8 sps:$4 sm:$0xff]  }
 0x599   : > { %1851 = vadd.xlane.f32.xlu1 %v1850_v29  ;;  %v5589_v29 = vld [vmem:[%s6583_s2 + $0x64] ss:$8 sps:$4 sm:$0xff]  }
 0x622   : > { %v1843_v30 = vpop.xlane.xlu1 %1842 }
 0x623   : > { %v1845_v31 = vsub.f32 %v1835_v26, %v1843_v30  ;;  %v5581_v26 = vld [vmem:[%s6583_s2 + $0x40] ss:$8 sps:$4 sm:$0xff]  }
 0x624   : > { %v5587_v30 = vld [vmem:[%s6583_s2 + $0x60] ss:$8 sps:$4 sm:$0xff]  }
 0x625   : > { %v1848_v32 = vmul.f32 1.442695, %v1845_v31  ;;  %v5592_v31 = vld [vmem:[%s6583_s2 + $0x74] ss:$8 sps:$4 sm:$0xff]  }
 0x626   : > { %v1852_v33 = vpop.xlane.xlu1 %1851 }
 0x627   : > { %5725 = vpow2.f32 %v1848_v32  ;;  %v5590_v32 = vld [vmem:[%s6583_s2 + $0x70] ss:$8 sps:$4 sm:$0xff]  }
 0x628   : > { %5727 = vrcp.f32 %v1852_v33 }
 0x631   : > { %v5726_v34 = vpop.eup %5725 }
 0x632   : > { %v5728_v35 = vpop.eup %5727  ;;  %v1853_v36 = vsel %vm1837_vm6, %v5726_v34, 0.0 }
 0x633   : > { %v1858_v37 = vmul.f32 %v5728_v35, %v5724_v28  ;;  %1854 = vadd.xlane.f32.xlu1 %v1853_v36  ;;  %v5584_v28 = vld [vmem:[%s6583_s2 + $0x50] ss:$8 sps:$4 sm:$0xff]  }
 0x635   : > { %v1860_v38 = vpack.c.bf16 %v1858_v37, %v1858_v37  ;;  %v4523_v37 = vld [vmem:[%s6584_s11] ss:$0 sm:$0xff]  ;;  %s6589_s11 = sld [smem:[#allocation14_spill]] }
 0x637   : > { %5212 = vmatmul.mubr.msk.bf16.vlgmr.msra.gmra.mrb[16].mxu1 %vm1837_vm6, %v1860_v38 }
 0x638   : > { %5229 = vmatprep.mubr.msk.bf16.mxu1 %vm5812_vm1, %v5811_v2  ;;  %5222 = vmatpush3.bf16.msra.mxu1 %v5565_v39  ;;  %v4524_v39 = vld [vmem:[%s6586_s7] ss:$0 sm:$0xff]  ;;  %s6591_s7 = sld [smem:[#allocation16_spill]] }
 0x639   : > { %5223 = vmatprep.subr.bf16.mxu1 %v5811_v2 }
 0x63b   : > { %s6590_s9 = smov %s6589_s11 }
 0x63c   : > { %5224 = vmatpush3.bf16.msra.mxu1 %v5566_v40 }
 0x63d   : > { %5225 = vmatprep.subr.bf16.mxu1 %v5811_v2 }
 0x63e   : > { %s6592_s13 = smov %s6591_s7 }
 0x640   : > { %5226 = vmatpush3.bf16.msra.mxu1 %v5567_v41 }
 0x641   : > { %5227 = vmatprep.subr.bf16.mxu1 %v5811_v2 }
 0x644   : > { %5228 = vmatpush3.bf16.msra.mxu1 %v5568_v58  ;;  %v5605_v58 = vld [vmem:[%s6588_s5 + $0x70] sm:$0xff]  }
 0x645   : > { %2253 = vmatprep.subr.bf16.mxu1 %v5571_v15 }
 0x6c0   : > { %v1855_v42 = vpop.xlane.xlu1 %1854 }
 0x6c1   : > { %5729 = vrcp.f32 %v1855_v42 }
 0x6cb   : > { %v5730_v43 = vpop.eup %5729 }
 0x6cc   : > { %v1859_v44 = vmul.f32 %v5730_v43, %v5726_v34  ;;  %v5593_v43 = vld [vmem:[%s6588_s5 + $0x40] sm:$0xff]  }
 0x6ce   : > { %v1917_v46 = vpack.c.bf16 %v1859_v44, %v1859_v44  ;;  %v5594_v44 = vld [vmem:[%s6588_s5] sm:$0xff]  }
 0x6d0   : > { %5218 = vmatmul.mubr.msk.bf16.vlgmr.msra.gmra.mrb[20].mxu0 %vm1837_vm6, %v1917_v46  ;;  %v5596_v46 = vld [vmem:[%s6588_s5 + $0x8] sm:$0xff]  }
 0x6d1   : > { %5234 = vmatpush3.bf16.msra.mxu0 %v5561_v45  ;;  %5241 = vmatprep.mubr.msk.bf16.mxu0 %vm5812_vm1, %v5811_v2  ;;  %v5595_v45 = vld [vmem:[%s6588_s5 + $0x48] sm:$0xff]  }
 0x6d2   : > { %5235 = vmatprep.subr.bf16.mxu0 %v5811_v2 }
 0x6d5   : > { %5236 = vmatpush3.bf16.msra.mxu0 %v5562_v47  ;;  %v5597_v47 = vld [vmem:[%s6588_s5 + $0x50] sm:$0xff]  }
 0x6d6   : > { %5237 = vmatprep.subr.bf16.mxu0 %v5811_v2 }
 0x6d9   : > { %5238 = vmatpush3.bf16.msra.mxu0 %v5563_v48  ;;  %v5598_v48 = vld [vmem:[%s6588_s5 + $0x10] sm:$0xff]  }
 0x6da   : > { %5239 = vmatprep.subr.bf16.mxu0 %v5811_v2 }
 0x6dd   : > { %5240 = vmatpush3.bf16.msra.mxu0 %v5564_v49  ;;  %v5599_v49 = vld [vmem:[%s6588_s5 + $0x58] sm:$0xff]  }
 0x6de   : > { %4935 = vmatprep.subr.bf16.mxu0 %v5593_v43  ;;  %v5613_v43 = vld [vmem:[%s5861_s8 + $0x90] sm:$0xff]  }
 0x70a   : > { %v1902_v50 = vpop.f32.mrb[16].mxu1 }
 0x70b   : > { %v1908_v52 = vpack.c.bf16 %v1902_v50, %v1902_v50  ;;  %v5213_v55 = vpop.f32.mrb[17].mxu1  ;;  %v5600_v50 = vld [vmem:[%s6588_s5 + $0x18] sm:$0xff]  }
 0x70c   : > { %v1905_v56 = vpop.f32.mrb[18].mxu1  ;;  %v5602_v55 = vld [vmem:[%s6588_s5 + $0x20] sm:$0xff]  }
 0x70d   : > { %v5214_v57 = vpop.f32.mrb[19].mxu1  ;;  %5242 = vmatmul.mubr.msk.bf16.vlgmr.msra.gmra.mrb[24].mxu0 %vm1391_vm5, %v1908_v52  ;;  %v5601_v52 = vld [vmem:[%s6588_s5 + $0x60] sm:$0xff]   ;;  %v5603_v56 = vld [vmem:[%s6588_s5 + $0x68] sm:$0xff]  }
 0x70e   : > { %4936 = vmatpush3.bf16.msra.mxu0 %v5594_v44  ;;  %v5604_v57 = vld [vmem:[%s6588_s5 + $0x28] sm:$0xff]  }
 0x70f   : > { %4937 = vmatprep.subr.bf16.mxu0 %v5595_v45 }
 0x712   : > { %4938 = vmatpush3.bf16.msra.mxu0 %v5596_v46 }
 0x713   : > { %4939 = vmatprep.subr.bf16.mxu0 %v5597_v47  ;;  %v5614_v47 = vld [vmem:[%s5871_s19 + $0x90] sm:$0xff]  }
 0x716   : > { %4940 = vmatpush3.bf16.msra.mxu0 %v5598_v48  ;;  %v5615_v48 = vld [vmem:[%s5861_s8 + $0x98] sm:$0xff]  }
 0x717   : > { %4941 = vmatprep.subr.bf16.mxu0 %v5599_v49  ;;  %v5616_v49 = vld [vmem:[%s5871_s19 + $0x98] sm:$0xff]  }
 0x71a   : > { %4942 = vmatpush3.bf16.msra.mxu0 %v5600_v50  ;;  %v5617_v50 = vld [vmem:[%s5861_s8 + $0xa0] sm:$0xff]  }
 0x71b   : > { %4943 = vmatprep.subr.bf16.mxu0 %v5601_v52  ;;  %v5618_v52 = vld [vmem:[%s5871_s19 + $0xa0] sm:$0xff]  }
 0x71e   : > { %4944 = vmatpush3.bf16.msra.mxu0 %v5602_v55  ;;  %v5619_v55 = vld [vmem:[%s5861_s8 + $0xa8] sm:$0xff]  }
 0x71f   : > { %4945 = vmatprep.subr.bf16.mxu0 %v5603_v56  ;;  %v5620_v56 = vld [vmem:[%s5871_s19 + $0xa8] sm:$0xff]  }
 0x722   : > { %4946 = vmatpush3.bf16.msra.mxu0 %v5604_v57  ;;  %v5621_v57 = vld [vmem:[%s5861_s8 + $0xb0] sm:$0xff]  }
 0x723   : > { %4947 = vmatprep.subr.bf16.mxu0 %v5605_v58  ;;  %v5622_v58 = vld [vmem:[%s5871_s19 + $0xb0] sm:$0xff]  }
 0x7a3   : > { %v1958_v59 = vpop.f32.mrb[20].mxu0 }
 0x7a4   : > { %v1964_v60 = vpack.c.bf16 %v1958_v59, %v1958_v59  ;;  %v5219_v61 = vpop.f32.mrb[21].mxu0  ;;  %v5606_v59 = vld [vmem:[%s6588_s5 + $0x30] sm:$0xff]  }
 0x7a5   : > { %v1961_v53 = vpop.f32.mrb[22].mxu0  ;;  %4948 = vmatpush3.bf16.msra.mxu0 %v5606_v59  ;;  %v5608_v61 = vld [vmem:[%s6588_s5 + $0x38] sm:$0xff]  }
 0x7a6   : > { %v5220_v62 = vpop.f32.mrb[23].mxu0  ;;  %5230 = vmatmul.mubr.msk.bf16.vlgmr.msra.gmra.mrb[20].mxu1 %vm1391_vm5, %v1964_v60  ;;  %v5607_v60 = vld [vmem:[%s6588_s5 + $0x78] sm:$0xff]   ;;  %v6248_v53 = vshrl.u32 %v937_v7, 7 }
 0x7a7   : > { %2285 = vmatprep.mubr.bf16.mxu1 %v5810_v1  ;;  %2254 = vmatpush1.bf16.msra.mxu1 %v5569_v14  ;;  %v5623_v59 = vld [vmem:[%s5861_s8 + $0xb8] sm:$0xff]  }
 0x7a8   : > { %2255 = vmatprep.subr.bf16.mxu1 %v5574_v16  ;;  %4949 = vmatprep.subr.bf16.mxu0 %v5607_v60  ;;  %v2165_v62 = vsub.s32 0, %v6248_v53  ;;  %v5624_v60 = vld [vmem:[%s5871_s19 + $0xb8] sm:$0xff]  }
 0x7a9   : > { %4950 = vmatpush3.bf16.msra.mxu0 %v5608_v61 }
 0x7aa   : > { %5265 = vmatprep.subr.bf16.mxu0 %v5811_v2 }
 0x7ab   : > { %2256 = vmatpush1.bf16.msra.mxu1 %v5572_v17 }
 0x7ac   : > { %2257 = vmatprep.subr.bf16.mxu1 %v5577_v18 }
 0x7af   : > { %2258 = vmatpush1.bf16.msra.mxu1 %v5575_v19 }
 0x7b0   : > { %2259 = vmatprep.subr.bf16.mxu1 %v5580_v23 }
 0x7b3   : > { %2260 = vmatpush1.bf16.msra.mxu1 %v5578_v24 }
 0x7b4   : > { %2261 = vmatprep.subr.bf16.mxu1 %v5583_v25 }
 0x7b7   : > { %2262 = vmatpush1.bf16.msra.mxu1 %v5581_v26 }
 0x7b8   : > { %2263 = vmatprep.subr.bf16.mxu1 %v5586_v27 }
 0x7bb   : > { %2264 = vmatpush1.bf16.msra.mxu1 %v5584_v28 }
 0x7bc   : > { %2265 = vmatprep.subr.bf16.mxu1 %v5589_v29 }
 0x7bf   : > { %2266 = vmatpush1.bf16.msra.mxu1 %v5587_v30 }
 0x7c0   : > { %2267 = vmatprep.subr.bf16.mxu1 %v5592_v31  ;;  %v4541_v31 = vld [vmem:[%s6591_s7] ss:$0 sm:$0xff]  ;;  %s6595_s7 = sld [smem:[#allocation18_spill]] }
 0x7c3   : > { %2268 = vmatpush1.bf16.msra.mxu1 %v5590_v32 }
 0x7c4   : > { %5245 = vmatprep.subr.bf16.mxu1 %v5811_v2 }
 0x7c6   : > { %s6596_s21 = smov %s6595_s7 }
 0x7e0   : > { %v2102_v63 = vpop.f32.mrb[24].mxu0 }
 0x7e1   : > { %v5243_v0 = vpop.f32.mrb[25].mxu0 }
 0x7e2   : > { %v2105_v3 = vpop.f32.mrb[26].mxu0  ;;  %v2169_v0 = vsub.s32 1, %v6248_v53 }
 0x7e3   : > { %v5244_v4 = vpop.f32.mrb[27].mxu0 }
 0x879   : > { %v2035_v5 = vpop.f32.mrb[20].mxu1 }
 0x87a   : > { %v2103_v8 = vadd.f32 %v2102_v63, %v2035_v5  ;;  %v5231_v9 = vpop.f32.mrb[21].mxu1  ;;  %v2161_v63 = vld [vmem:[%s6589_s11] sm:$0x3]  ;;  %s6593_s11 = sld [smem:[#allocation17_spill]] }
 0x87b   : > { %v2038_v10 = vpop.f32.mrb[22].mxu1  ;;  %v2166_v3 = vrot.slane %v2161_v63, %v2165_v62  ;;  %v2170_v4 = vrot.slane %v2161_v63, %v2169_v0 }
 0x87c   : > { %v2115_v11 = vadd.f32 %v4522_v6, %v2103_v8  ;;  %v5232_v12 = vpop.f32.mrb[23].mxu1 }
 0x87e   : > { %v2116_v13 = vadd.f32 %v2115_v11, %v6058_v51 }
 0x880   : > { %2119 = vadd.xlane.f32.xlu1 %v2116_v13  ;;  %s6594_s17 = smov %s6593_s11 }
 0x90d   : > { %v2120_v51 = vpop.xlane.xlu1 %2119 }
 0x90e   : > { %v2121_v20 = vmul.f32 0.0078125, %v2120_v51 }
 0x910   : > { %v2122_v21 = vsub.f32 %v2116_v13, %v2121_v20 }
 0x912   : > { %v2123_v22 = vmul.f32 %v2122_v21, %v2122_v21 }
 0x914   : > { %2124 = vadd.xlane.f32.xlu1 %v2123_v22 }
 0x9a1   : > { %v2125_v33 = vpop.xlane.xlu1 %2124 }
 0x9a2   : > { %v2126_v34 = vmul.f32 0.0078125, %v2125_v33 }
 0x9a4   : > { %v2127_v35 = vadd.f32 1e-12, %v2126_v34 }
 0x9a6   : > { %5731 = vrsqrt.f32 %v2127_v35 }
 0x9b0   : > { %v5732_v36 = vpop.eup %5731 }
 0x9b1   : > { %v2129_v38 = vmul.f32 %v5732_v36, %v2122_v21 }
 0x9b3   : > { %v2136_v40 = vmul.f32 %v4523_v37, %v2129_v38  ;;  %v5609_v38 = vld [vmem:[%s5861_s8 + $0x80] sm:$0xff]  }
 0x9b5   : > { %v6224_v41 = vadd.f32 %v4524_v39, %v2136_v40  ;;  %v5610_v39 = vld [vmem:[%s5871_s19 + $0x80] sm:$0xff]   ;;  %v5611_v40 = vld [vmem:[%s5861_s8 + $0x88] sm:$0xff]  }
 0x9b7   : > { %v2144_v42 = vpack.c.bf16 %v6224_v41, %v6224_v41 }
 0x9b9   : > { %2286 = vmatmul.mubr.bf16.vlgmr.msra.gmra.mrb[24].mxu1 %v2144_v42  ;;  %v5612_v42 = vld [vmem:[%s5871_s19 + $0x88] sm:$0xff]  }
 0x9ba   : > { %5261 = vmatprep.mubr.msk.bf16.mxu1 %vm5812_vm1, %v5811_v2  ;;  %5246 = vmatpush3.bf16.msra.mxu1 %v5609_v38 }
 0x9bb   : > { %5247 = vmatprep.subr.bf16.mxu1 %v5811_v2 }
 0x9be   : > { %5248 = vmatpush3.bf16.msra.mxu1 %v5611_v40  ;;  %v5641_v40 = vld [vmem:[%s5861_s8 + $0xc0] sm:$0xff]  }
 0x9bf   : > { %5249 = vmatprep.subr.bf16.mxu1 %v5811_v2 }
 0x9c2   : > { %5250 = vmatpush3.bf16.msra.mxu1 %v5613_v43  ;;  %v5642_v43 = vld [vmem:[%s5861_s8 + $0xc8] sm:$0xff]  }
 0x9c3   : > { %5251 = vmatprep.subr.bf16.mxu1 %v5811_v2 }
 0x9c6   : > { %5252 = vmatpush3.bf16.msra.mxu1 %v5615_v48 }
 0x9c7   : > { %5253 = vmatprep.subr.bf16.mxu1 %v5811_v2 }
 0x9ca   : > { %5254 = vmatpush3.bf16.msra.mxu1 %v5617_v50  ;;  %v5647_v50 = vld [vmem:[%s5861_s8 + $0xf0] sm:$0xff]  }
 0x9cb   : > { %5255 = vmatprep.subr.bf16.mxu1 %v5811_v2 }
 0x9ce   : > { %5256 = vmatpush3.bf16.msra.mxu1 %v5619_v55  ;;  %v5648_v55 = vld [vmem:[%s5861_s8 + $0xf8] sm:$0xff]  }
 0x9cf   : > { %5257 = vmatprep.subr.bf16.mxu1 %v5811_v2 }
 0x9d2   : > { %5258 = vmatpush3.bf16.msra.mxu1 %v5621_v57  ;;  %v5650_v57 = vld [vmem:[%s5881_s30 + $0xc8] sm:$0xff]  }
 0x9d3   : > { %5259 = vmatprep.subr.bf16.mxu1 %v5811_v2 }
 0x9d6   : > { %5260 = vmatpush3.bf16.msra.mxu1 %v5623_v59  ;;  %v5652_v59 = vld [vmem:[%s5881_s30 + $0xd8] sm:$0xff]  }
 0x9d7   : > { %5285 = vmatprep.subr.bf16.mxu1 %v5811_v2 }
 0xa8c   : > { %v2287_v5 = vpop.f32.mrb[24].mxu1 }
 0xa8d   : > { %v2288_v6 = vadd.f32 %v2287_v5, %v2166_v3  ;;  %v2289_v8 = vpop.f32.mrb[25].mxu1  ;;  %v4558_v5 = vld [vmem:[%s6593_s11] ss:$0 sm:$0xff]  ;;  %s6597_s11 = sld [smem:[#allocation19_spill]] }
 0xa8e   : > { %v2290_v9 = vadd.f32 %v2289_v8, %v2170_v4  ;;  %v2291_v10 = vpop.f32.mrb[26].mxu1  ;;  %v4559_v8 = vld [vmem:[%s6595_s7] ss:$0 sm:$0xff]  ;;  %s6599_s7 = sld [smem:[#allocation20_spill]] }
 0xa8f   : > { %v2294_v11 = vmul.f32 %v2288_v6, %v2288_v6  ;;  %v2292_v12 = vpop.f32.mrb[27].mxu1 }
 0xa90   : > { %v2295_v7 = vmul.f32 %v2290_v9, %v2290_v9 }
 0xa91   : > { %v2296_v13 = vmul.f32 %v2294_v11, %v2288_v6  ;;  %v5625_v11 = vld [vmem:[%s5881_s30 + $0x80] sm:$0xff]  }
 0xa92   : > { %v2297_v14 = vmul.f32 %v2295_v7, %v2290_v9  ;;  %v5626_v7 = vld [vmem:[%s5881_s30 + $0x88] sm:$0xff]  }
 0xa93   : > { %v2298_v15 = vmul.f32 0.044715, %v2296_v13  ;;  %v5627_v13 = vld [vmem:[%s5881_s30 + $0x90] sm:$0xff]  }
 0xa94   : > { %v2299_v16 = vmul.f32 0.044715, %v2297_v14  ;;  %v5628_v14 = vld [vmem:[%s5881_s30 + $0x98] sm:$0xff]  }
 0xa95   : > { %v2300_v17 = vadd.f32 %v2298_v15, %v2288_v6  ;;  %v5629_v15 = vld [vmem:[%s5881_s30 + $0xa0] sm:$0xff]  }
 0xa96   : > { %v2301_v18 = vadd.f32 %v2299_v16, %v2290_v9  ;;  %v5630_v16 = vld [vmem:[%s5881_s30 + $0xa8] sm:$0xff]  }
 0xa97   : > { %v2302_v19 = vmul.f32 0.7978846, %v2300_v17  ;;  %v5631_v17 = vld [vmem:[%s5881_s30 + $0xb0] sm:$0xff]  }
 0xa98   : > { %v2303_v51 = vmul.f32 0.7978846, %v2301_v18  ;;  %v5632_v18 = vld [vmem:[%s5881_s30 + $0xb8] sm:$0xff]  }
 0xa99   : > { %5733 = vtanh.f32 %v2302_v19  ;;  %v5633_v19 = vld [vmem:[%s5871_s19 + $0xc0] sm:$0xff]  }
 0xa9a   : > { %5735 = vtanh.f32 %v2303_v51  ;;  %v5634_v51 = vld [vmem:[%s5871_s19 + $0xc8] sm:$0xff]  }
 0xaa3   : > { %v5734_v20 = vpop.eup %5733 }
 0xaa4   : > { %v5736_v21 = vpop.eup %5735  ;;  %v2306_v22 = vadd.f32 1.0, %v5734_v20  ;;  %v5635_v20 = vld [vmem:[%s5871_s19 + $0xd0] sm:$0xff]  }
 0xaa5   : > { %v2307_v23 = vadd.f32 1.0, %v5736_v21  ;;  %v5636_v21 = vld [vmem:[%s5871_s19 + $0xd8] sm:$0xff]  }
 0xaa6   : > { %v2308_v24 = vmul.f32 0.5, %v2306_v22  ;;  %v5637_v22 = vld [vmem:[%s5871_s19 + $0xe0] sm:$0xff]  }
 0xaa7   : > { %v2309_v25 = vmul.f32 0.5, %v2307_v23  ;;  %v5638_v23 = vld [vmem:[%s5871_s19 + $0xe8] sm:$0xff]  }
 0xaa8   : > { %v2310_v26 = vmul.f32 %v2308_v24, %v2288_v6  ;;  %v5639_v24 = vld [vmem:[%s5871_s19 + $0xf0] sm:$0xff]  }
 0xaa9   : > { %v2311_v27 = vmul.f32 %v2309_v25, %v2290_v9  ;;  %v5640_v25 = vld [vmem:[%s5871_s19 + $0xf8] sm:$0xff]  }
 0xaaa   : > { %v2312_v29 = vpack.c.bf16 %v2310_v26, %v2310_v26  ;;  %v4604_v26 = vld [vmem:[%s5876_s24 + $0x2] ss:$0 sm:$0xff] }
 0xaab   : > { %v2313_v28 = vpack.c.bf16 %v2311_v27, %v2311_v27 }
 0xaad   : > { %2481 = vmatprep.mubr.bf16.mxu0 %v2313_v28 }
 0xaae   : > { %2482 = vmatmul.mubr.bf16.vlgmr.msra.gmra.mrb[28].mxu0 %v2312_v29 }
 0xaaf   : > { %5281 = vmatprep.mubr.msk.bf16.mxu0 %vm5812_vm1, %v5811_v2  ;;  %5266 = vmatpush3.bf16.msra.mxu0 %v5610_v39 }
 0xab0   : > { %5267 = vmatprep.subr.bf16.mxu0 %v5811_v2 }
 0xab3   : > { %5268 = vmatpush3.bf16.msra.mxu0 %v5612_v42 }
 0xab4   : > { %5269 = vmatprep.subr.bf16.mxu0 %v5811_v2 }
 0xab7   : > { %5270 = vmatpush3.bf16.msra.mxu0 %v5614_v47 }
 0xab8   : > { %5271 = vmatprep.subr.bf16.mxu0 %v5811_v2 }
 0xabb   : > { %5272 = vmatpush3.bf16.msra.mxu0 %v5616_v49 }
 0xabc   : > { %5273 = vmatprep.subr.bf16.mxu0 %v5811_v2 }
 0xabf   : > { %5274 = vmatpush3.bf16.msra.mxu0 %v5618_v52 }
 0xac0   : > { %5275 = vmatprep.subr.bf16.mxu0 %v5811_v2 }
 0xac3   : > { %5276 = vmatpush3.bf16.msra.mxu0 %v5620_v56  ;;  %v5649_v56 = vld [vmem:[%s5881_s30 + $0xc0] sm:$0xff]  }
 0xac4   : > { %5277 = vmatprep.subr.bf16.mxu0 %v5811_v2 }
 0xac7   : > { %5278 = vmatpush3.bf16.msra.mxu0 %v5622_v58  ;;  %v5651_v58 = vld [vmem:[%s5881_s30 + $0xd0] sm:$0xff]  }
 0xac8   : > { %5279 = vmatprep.subr.bf16.mxu0 %v5811_v2 }
 0xacb   : > { %5280 = vmatpush3.bf16.msra.mxu0 %v5624_v60  ;;  %v5653_v60 = vld [vmem:[%s5881_s30 + $0xe0] sm:$0xff]  }
 0xacc   : > { %5305 = vmatprep.subr.bf16.mxu0 %v5811_v2 }
 0xb81   : > { %v4951_v30 = vpop.f32.mrb[28].mxu0 }
 0xb82   : > { %v4952_v32 = vpop.f32.mrb[29].mxu0 }
 0xb83   : > { %v4953_v33 = vadd.f32 %v4952_v32, %v4951_v30  ;;  %v4954_v34 = vpop.f32.mrb[30].mxu0 }
 0xb84   : > { %v4955_v35 = vpop.f32.mrb[31].mxu0 }
 0xb85   : > { %v2484_v36 = vadd.f32 %v4953_v33, %v4541_v31 }
 0xb87   : > { %v2489_v37 = vadd.f32 %v2484_v36, %v6224_v41 }
 0xb89   : > { %2492 = vadd.xlane.f32.xlu1 %v2489_v37 }
 0xc16   : > { %v2493_v41 = vpop.xlane.xlu1 %2492 }
 0xc17   : > { %v2494_v44 = vmul.f32 0.0078125, %v2493_v41  ;;  %v5643_v41 = vld [vmem:[%s5861_s8 + $0xd0] sm:$0xff]  }
 0xc19   : > { %v2495_v45 = vsub.f32 %v2489_v37, %v2494_v44  ;;  %v4578_v37 = vld [vmem:[%s5866_s14 + $0x2] ss:$0 sm:$0xff]  ;;  %v5644_v44 = vld [vmem:[%s5861_s8 + $0xd8] sm:$0xff]  }
 0xc1b   : > { %v2496_v46 = vmul.f32 %v2495_v45, %v2495_v45 }
 0xc1d   : > { %2497 = vadd.xlane.f32.xlu1 %v2496_v46  ;;  %v5646_v46 = vld [vmem:[%s5861_s8 + $0xe8] sm:$0xff]  }
 0xcaa   : > { %v2498_v61 = vpop.xlane.xlu1 %2497 }
 0xcab   : > { %v2499_v63 = vmul.f32 0.0078125, %v2498_v61  ;;  %v4683_v61 = vld [vmem:[%s5876_s24 + $0x3] ss:$0 sm:$0xff] }
 0xcad   : > { %v2500_v3 = vadd.f32 1e-12, %v2499_v63  ;;  %v5654_v63 = vld [vmem:[%s5881_s30 + $0xe8] sm:$0xff]  }
 0xcaf   : > { %5737 = vrsqrt.f32 %v2500_v3 }
 0xcb9   : > { %v5738_v4 = vpop.eup %5737 }
 0xcba   : > { %v2502_v6 = vmul.f32 %v5738_v4, %v2495_v45  ;;  %v5645_v45 = vld [vmem:[%s5861_s8 + $0xe0] sm:$0xff]  }
 0xcbc   : > { %v2509_v9 = vmul.f32 %v4558_v5, %v2502_v6 }
 0xcbe   : > { %v6295_v10 = vadd.f32 %v4559_v8, %v2509_v9  ;;  %v5655_v8 = vld [vmem:[%s5881_s30 + $0xf0] sm:$0xff]  }
 0xcc0   : > { %v6300_v12 = vpack.c.bf16 %v6295_v10, %v6295_v10  ;;  %4560 = vst [vmem:[%s6065_s18 + $0x8] sm:$0xff] %v6295_v10 }
 0xcc2   : > { %5262 = vmatmul.mubr.bf16.vlgmr.msra.gmra.mrb[28].mxu1 %v6300_v12  ;;  %5282 = vmatmul.mubr.bf16.vlgmr.msra.gmra.mrb[32].mxu0 %v6300_v12 }
 0xcc3   : > { %5286 = vmatpush3.bf16.msra.mxu1 %v5625_v11  ;;  %5301 = vmatprep.mubr.msk.bf16.mxu1 %vm5812_vm1, %v5811_v2 }
 0xcc4   : > { %5287 = vmatprep.subr.bf16.mxu1 %v5811_v2  ;;  %5307 = vmatprep.mubr.msk.bf16.mxu0 %vm5812_vm1, %v5811_v2 }
 0xcc7   : > { %5288 = vmatpush3.bf16.msra.mxu1 %v5626_v7 }
 0xcc8   : > { %5289 = vmatprep.subr.bf16.mxu1 %v5811_v2 }
 0xccb   : > { %5290 = vmatpush3.bf16.msra.mxu1 %v5627_v13  ;;  %v5656_v13 = vld [vmem:[%s5881_s30 + $0xf8] sm:$0xff]  }
 0xccc   : > { %5291 = vmatprep.subr.bf16.mxu1 %v5811_v2 }
 0xccf   : > { %5292 = vmatpush3.bf16.msra.mxu1 %v5628_v14 }
 0xcd0   : > { %5293 = vmatprep.subr.bf16.mxu1 %v5811_v2 }
 0xcd3   : > { %5294 = vmatpush3.bf16.msra.mxu1 %v5629_v15 }
 0xcd4   : > { %5295 = vmatprep.subr.bf16.mxu1 %v5811_v2 }
 0xcd7   : > { %5296 = vmatpush3.bf16.msra.mxu1 %v5630_v16 }
 0xcd8   : > { %5297 = vmatprep.subr.bf16.mxu1 %v5811_v2 }
 0xcdb   : > { %5298 = vmatpush3.bf16.msra.mxu1 %v5631_v17 }
 0xcdc   : > { %5299 = vmatprep.subr.bf16.mxu1 %v5811_v2 }
 0xcdf   : > { %5300 = vmatpush3.bf16.msra.mxu1 %v5632_v18 }
 0xce0   : > { %5331 = vmatprep.subr.bf16.mxu1 %v5811_v2 }
 0xce2   : > { %5302 = vmatmul.mubr.bf16.vlgmr.msra.gmra.mrb[32].mxu1 %v6300_v12 }
 0xce3   : > { %5332 = vmatpush3.bf16.msra.mxu1 %v5633_v19  ;;  %5347 = vmatprep.mubr.msk.bf16.mxu1 %vm5812_vm1, %v5811_v2 }
 0xce4   : > { %5333 = vmatprep.subr.bf16.mxu1 %v5811_v2 }
 0xce7   : > { %5334 = vmatpush3.bf16.msra.mxu1 %v5634_v51 }
 0xce8   : > { %5335 = vmatprep.subr.bf16.mxu1 %v5811_v2 }
 0xceb   : > { %5336 = vmatpush3.bf16.msra.mxu1 %v5635_v20  ;;  %v4630_v20 = vld [vmem:[%s5886_s6 + $0x2] ss:$0 sm:$0xff] }
 0xcec   : > { %5337 = vmatprep.subr.bf16.mxu1 %v5811_v2 }
 0xcef   : > { %5338 = vmatpush3.bf16.msra.mxu1 %v5636_v21 }
 0xcf0   : > { %5339 = vmatprep.subr.bf16.mxu1 %v5811_v2 }
 0xcf3   : > { %5340 = vmatpush3.bf16.msra.mxu1 %v5637_v22  ;;  %v4657_v22 = vld [vmem:[%s5866_s14 + $0x3] ss:$0 sm:$0xff] }
 0xcf4   : > { %5341 = vmatprep.subr.bf16.mxu1 %v5811_v2 }
 0xcf7   : > { %5342 = vmatpush3.bf16.msra.mxu1 %v5638_v23 }
 0xcf8   : > { %5343 = vmatprep.subr.bf16.mxu1 %v5811_v2 }
 0xcfb   : > { %5344 = vmatpush3.bf16.msra.mxu1 %v5639_v24 }
 0xcfc   : > { %5345 = vmatprep.subr.bf16.mxu1 %v5811_v2 }
 0xcff   : > { %5346 = vmatpush3.bf16.msra.mxu1 %v5640_v25 }
 0xd00   : > { %5371 = vmatprep.subr.bf16.mxu1 %v5811_v2 }
 0xd02   : > { %5348 = vmatmul.mubr.bf16.vlgmr.msra.gmra.mrb[36].mxu1 %v6300_v12 }
 0xd03   : > { %5373 = vmatprep.mubr.msk.bf16.mxu1 %vm5812_vm1, %v5811_v2 }
 0xd95   : > { %v2627_v27 = vpop.f32.mrb[28].mxu1  ;;  %v2740_v28 = vpop.f32.mrb[32].mxu0 }
 0xd96   : > { %v2741_v29 = vadd.f32 %v4604_v26, %v2740_v28  ;;  %v5263_v30 = vpop.f32.mrb[29].mxu1  ;;  %v5283_v31 = vpop.f32.mrb[33].mxu0  ;;  %v2628_v39 = vadd.f32 %v4578_v37, %v2627_v27 }
 0xd97   : > { %v2630_v32 = vpop.f32.mrb[30].mxu1  ;;  %v2743_v33 = vpop.f32.mrb[34].mxu0  ;;  %v4709_v30 = vld [vmem:[%s5886_s6 + $0x3] ss:$0 sm:$0xff] }
 0xd98   : > { %v2860_v34 = vpack.c.bf16 %v2741_v29, %v2741_v29  ;;  %v5264_v35 = vpop.f32.mrb[31].mxu1  ;;  %v5284_v36 = vpop.f32.mrb[35].mxu0  ;;  %v2859_v42 = vpack.c.bf16 %v2628_v39, %v2628_v39 }
 0xd9a   : > { %v2865_v38 = vsel %vm1391_vm5, %v2860_v34, 0 }
 0xd9b   : > { %5306 = vmatpush3.bf16.xpose.msra.mxu0 %v2865_v38 }
 0xd9c   : > { %5311 = vmatprep.subr.bf16.mxu0 %v5811_v2 }
 0xda2   : > { %5308 = vmatmul.mubr.msk.bf16.vlgmr.msra.gmra.mrb[36].mxu0 %vm1391_vm5, %v2859_v42 }
 0xda3   : > { %5312 = vmatpush3.bf16.msra.mxu0 %v5641_v40  ;;  %5327 = vmatprep.mubr.msk.bf16.mxu0 %vm5812_vm1, %v5811_v2 }
 0xda4   : > { %5313 = vmatprep.subr.bf16.mxu0 %v5811_v2 }
 0xda7   : > { %5314 = vmatpush3.bf16.msra.mxu0 %v5642_v43 }
 0xda8   : > { %5315 = vmatprep.subr.bf16.mxu0 %v5811_v2 }
 0xdab   : > { %5316 = vmatpush3.bf16.msra.mxu0 %v5643_v41 }
 0xdac   : > { %5317 = vmatprep.subr.bf16.mxu0 %v5811_v2 }
 0xdaf   : > { %5318 = vmatpush3.bf16.msra.mxu0 %v5644_v44 }
 0xdb0   : > { %5319 = vmatprep.subr.bf16.mxu0 %v5811_v2 }
 0xdb3   : > { %5320 = vmatpush3.bf16.msra.mxu0 %v5645_v45 }
 0xdb4   : > { %5321 = vmatprep.subr.bf16.mxu0 %v5811_v2 }
 0xdb5   : > { %v2853_v47 = vpop.f32.mrb[32].mxu1 }
 0xdb6   : > { %v5303_v48 = vpop.f32.mrb[33].mxu1  ;;  %v2854_v21 = vadd.f32 %v4630_v20, %v2853_v47 }
 0xdb7   : > { %v2856_v49 = vpop.f32.mrb[34].mxu1  ;;  %5322 = vmatpush3.bf16.msra.mxu0 %v5646_v46 }
 0xdb8   : > { %v5304_v52 = vpop.f32.mrb[35].mxu1  ;;  %5323 = vmatprep.subr.bf16.mxu0 %v5811_v2  ;;  %v2909_v24 = vpack.c.bf16 %v2854_v21, %v2854_v21 }
 0xdba   : > { %v3327_v29 = vsel %vm1864_vm7, %v2909_v24, 0 }
 0xdbb   : > { %5324 = vmatpush3.bf16.msra.mxu0 %v5647_v50 }
 0xdbc   : > { %5325 = vmatprep.subr.bf16.mxu0 %v5811_v2 }
 0xdbf   : > { %5326 = vmatpush3.bf16.msra.mxu0 %v5648_v55 }
 0xdc0   : > { %5351 = vmatprep.subr.bf16.mxu0 %v5811_v2 }
 0xdc2   : > { %5328 = vmatmul.mubr.bf16.vlgmr.msra.gmra.mrb[40].mxu0 %v6300_v12 }
 0xdc3   : > { %5352 = vmatpush3.bf16.msra.mxu0 %v5649_v56  ;;  %5367 = vmatprep.mubr.msk.bf16.mxu0 %vm5812_vm1, %v5811_v2 }
 0xdc4   : > { %5353 = vmatprep.subr.bf16.mxu0 %v5811_v2 }
 0xdc7   : > { %5354 = vmatpush3.bf16.msra.mxu0 %v5650_v57 }
 0xdc8   : > { %5355 = vmatprep.subr.bf16.mxu0 %v5811_v2 }
 0xdcb   : > { %5356 = vmatpush3.bf16.msra.mxu0 %v5651_v58 }
 0xdcc   : > { %5357 = vmatprep.subr.bf16.mxu0 %v5811_v2 }
 0xdcf   : > { %5358 = vmatpush3.bf16.msra.mxu0 %v5652_v59 }
 0xdd0   : > { %5359 = vmatprep.subr.bf16.mxu0 %v5811_v2 }
 0xdd3   : > { %5360 = vmatpush3.bf16.msra.mxu0 %v5653_v60 }
 0xdd4   : > { %5361 = vmatprep.subr.bf16.mxu0 %v5811_v2 }
 0xdd5   : > { %v3130_v3 = vpop.f32.mrb[36].mxu1 }
 0xdd6   : > { %v3131_v4 = vadd.f32 %v4683_v61, %v3130_v3  ;;  %v5349_v5 = vpop.f32.mrb[37].mxu1  ;;  %v5661_v61 = vld [vmem:[%s6581_s28 + $0x60] sm:$0xff]   ;;  %v5663_v3 = vld [vmem:[%s6581_s28 + $0x70] sm:$0xff]  }
 0xdd7   : > { %v3133_v6 = vpop.f32.mrb[38].mxu1  ;;  %5362 = vmatpush3.bf16.msra.mxu0 %v5654_v63  ;;  %v5662_v63 = vld [vmem:[%s6581_s28 + $0x68] sm:$0xff]  }
 0xdd8   : > { %v3250_v9 = vpack.c.bf16 %v3131_v4, %v3131_v4  ;;  %v5350_v11 = vpop.f32.mrb[39].mxu1  ;;  %5363 = vmatprep.subr.bf16.mxu0 %v5811_v2 }
 0xdda   : > { %v3255_v7 = vsel %vm1391_vm5, %v3250_v9, 0 }
 0xddb   : > { %5372 = vmatpush3.bf16.xpose.msra.mxu1 %v3255_v7  ;;  %5364 = vmatpush3.bf16.msra.mxu0 %v5655_v8 }
 0xddc   : > { %5365 = vmatprep.subr.bf16.mxu0 %v5811_v2  ;;  %5377 = vmatprep.subr.bf16.mxu1 %v5811_v2 }
 0xddf   : > { %5366 = vmatpush3.bf16.msra.mxu0 %v5656_v13  ;;  %v5657_v13 = vld [vmem:[%s6581_s28 + $0x40] sm:$0xff]  }
 0xde0   : > { %5383 = vmatprep.subr.bf16.mxu0 %v5811_v2 }
 0xde2   : > { %5368 = vmatmul.mubr.bf16.vlgmr.msra.gmra.mrb[44].mxu0 %v6300_v12 }
 0xde3   : > { %5385 = vmatprep.mubr.msk.bf16.mxu0 %vm5812_vm1, %v5811_v2 }
 0xe75   : > { %v2901_v14 = vpop.f32.mrb[36].mxu0 }
 0xe76   : > { %v2907_v15 = vmul.f32 0.125, %v2901_v14  ;;  %v5309_v16 = vpop.f32.mrb[37].mxu0 }
 0xe77   : > { %v2904_v17 = vpop.f32.mrb[38].mxu0  ;;  %v5659_v16 = vld [vmem:[%s6581_s28 + $0x50] sm:$0xff]  }
 0xe78   : > { %v5310_v18 = vpop.f32.mrb[39].mxu0  ;;  %v2908_v19 = vadd.f32 %v6162_v54, %v2907_v15  ;;  %v5658_v15 = vld [vmem:[%s6581_s28 + $0x48] sm:$0xff]   ;;  %v5660_v17 = vld [vmem:[%s6581_s28 + $0x58] sm:$0xff]  }
 0xe7a   : > { %v3300_v51 = vsel %vm1837_vm6, %v2908_v19, -inf }
 0xe7b   : > { %3301 = vmax.xlane.f32.xlu1 %v3300_v51 }
 0xe95   : > { %v3017_v23 = vpop.f32.mrb[40].mxu0 }
 0xe96   : > { %v3018_v12 = vadd.f32 %v4657_v22, %v3017_v23  ;;  %v5329_v25 = vpop.f32.mrb[41].mxu0 }
 0xe97   : > { %v3020_v26 = vpop.f32.mrb[42].mxu0 }
 0xe98   : > { %v3249_v27 = vpack.c.bf16 %v3018_v12, %v3018_v12  ;;  %v5330_v28 = vpop.f32.mrb[43].mxu0 }
 0xe99   : > { %v4748_v28 = vld [vmem:[%s6582_s1 + $0x1] ss:$0 sm:$0xff]  ;;  %s6598_s1 = smov %s6597_s11 }
 0xe9a   : > { %5374 = vmatmul.mubr.msk.bf16.vlgmr.msra.gmra.mrb[40].mxu1 %vm1391_vm5, %v3249_v27 }
 0xe9b   : > { %5378 = vmatpush3.bf16.msra.mxu1 %v3327_v29  ;;  %5379 = vmatprep.mubr.msk.bf16.mxu1 %vm5812_vm1, %v5811_v2 }
 0xe9c   : > { %5389 = vmatprep.subr.bf16.mxu1 %v5811_v2 }
 0xeb5   : > { %v3243_v31 = vpop.f32.mrb[44].mxu0 }
 0xeb6   : > { %v3244_v32 = vadd.f32 %v4709_v30, %v3243_v31  ;;  %v5369_v33 = vpop.f32.mrb[45].mxu0 }
 0xeb7   : > { %v3246_v34 = vpop.f32.mrb[46].mxu0 }
 0xeb8   : > { %v3299_v35 = vpack.c.bf16 %v3244_v32, %v3244_v32  ;;  %v5370_v36 = vpop.f32.mrb[47].mxu0 }
 0xeb9   : > { %v5670_v36 = vld [vmem:[%s6583_s2 + $0x94] ss:$8 sps:$4 sm:$0xff]  }
 0xeba   : > { %v3384_v37 = vsel %vm1864_vm7, %v3299_v35, 0  ;;  %v5665_v35 = vld [vmem:[%s6583_s2 + $0x80] ss:$8 sps:$4 sm:$0xff]  }
 0xebb   : > { %5384 = vmatpush3.bf16.msra.mxu0 %v3384_v37  ;;  %v5668_v37 = vld [vmem:[%s6583_s2 + $0x90] ss:$8 sps:$4 sm:$0xff]  }
 0xebc   : > { %5401 = vmatprep.subr.bf16.mxu0 %v5811_v2 }
 0xf08   : > { %v3302_v38 = vpop.xlane.xlu1 %3301 }
 0xf09   : > { %v3306_v39 = vsub.f32 %v2908_v19, %v3302_v38  ;;  %v5664_v19 = vld [vmem:[%s6581_s28 + $0x78] sm:$0xff]   ;;  %v5673_v38 = vld [vmem:[%s6583_s2 + $0xa4] ss:$8 sps:$4 sm:$0xff]  }
 0xf0b   : > { %v3308_v40 = vmul.f32 1.442695, %v3306_v39  ;;  %v5671_v39 = vld [vmem:[%s6583_s2 + $0xa0] ss:$8 sps:$4 sm:$0xff]  }
 0xf0d   : > { %5739 = vpow2.f32 %v3308_v40 }
 0xf17   : > { %v5740_v42 = vpop.eup %5739 }
 0xf18   : > { %v3312_v43 = vsel %vm1837_vm6, %v5740_v42, 0.0 }
 0xf19   : > { %3313 = vadd.xlane.f32.xlu1 %v3312_v43 }
 0xf6d   : > { %v3291_v41 = vpop.f32.mrb[40].mxu1 }
 0xf6e   : > { %v3297_v44 = vmul.f32 0.125, %v3291_v41  ;;  %v5375_v45 = vpop.f32.mrb[41].mxu1  ;;  %v5676_v41 = vld [vmem:[%s6583_s2 + $0xb4] ss:$8 sps:$4 sm:$0xff]  }
 0xf6f   : > { %v3294_v46 = vpop.f32.mrb[42].mxu1  ;;  %v5679_v45 = vld [vmem:[%s6583_s2 + $0xc4] ss:$8 sps:$4 sm:$0xff]  }
 0xf70   : > { %v5376_v47 = vpop.f32.mrb[43].mxu1  ;;  %v3298_v48 = vadd.f32 %v6162_v54, %v3297_v44  ;;  %v5674_v44 = vld [vmem:[%s6583_s2 + $0xb0] ss:$8 sps:$4 sm:$0xff]   ;;  %v5677_v46 = vld [vmem:[%s6583_s2 + $0xc0] ss:$8 sps:$4 sm:$0xff]  }
 0xf71   : > { %v5682_v47 = vld [vmem:[%s6583_s2 + $0xd4] ss:$8 sps:$4 sm:$0xff]  }
 0xf72   : > { %v3303_v49 = vsel %vm1837_vm6, %v3298_v48, -inf }
 0xf73   : > { %3304 = vmax.xlane.f32.xlu0 %v3303_v49  ;;  %v5685_v49 = vld [vmem:[%s6583_s2 + $0xe4] ss:$8 sps:$4 sm:$0xff]  }
 0xfa6   : > { %v3314_v50 = vpop.xlane.xlu1 %3313 }
 0xfa7   : > { %5741 = vrcp.f32 %v3314_v50  ;;  %v5683_v50 = vld [vmem:[%s6583_s2 + $0xe0] ss:$8 sps:$4 sm:$0xff]  }
 0xfb1   : > { %v5742_v52 = vpop.eup %5741 }
 0xfb2   : > { %v3320_v55 = vmul.f32 %v5742_v52, %v5740_v42  ;;  %v5688_v52 = vld [vmem:[%s6583_s2 + $0xf4] ss:$8 sps:$4 sm:$0xff]  }
 0xfb4   : > { %v3322_v56 = vpack.c.bf16 %v3320_v55, %v3320_v55  ;;  %v5686_v55 = vld [vmem:[%s6583_s2 + $0xf0] ss:$8 sps:$4 sm:$0xff]  }
 0xfb6   : > { %5380 = vmatmul.mubr.msk.bf16.vlgmr.msra.gmra.mrb[44].mxu1 %vm1837_vm6, %v3322_v56 }
 0xfb7   : > { %5397 = vmatprep.mubr.msk.bf16.mxu1 %vm5812_vm1, %v5811_v2  ;;  %5390 = vmatpush3.bf16.msra.mxu1 %v5661_v61  ;;  %v4752_v61 = vld [vmem:[%s6587_s3 + $0x1] ss:$0 sm:$0xff] }
 0xfb8   : > { %5391 = vmatprep.subr.bf16.mxu1 %v5811_v2 }
 0xfbb   : > { %5392 = vmatpush3.bf16.msra.mxu1 %v5662_v63 }
 0xfbc   : > { %5393 = vmatprep.subr.bf16.mxu1 %v5811_v2 }
 0xfbf   : > { %5394 = vmatpush3.bf16.msra.mxu1 %v5663_v3 }
 0xfc0   : > { %5395 = vmatprep.subr.bf16.mxu1 %v5811_v2 }
 0xfc3   : > { %5396 = vmatpush3.bf16.msra.mxu1 %v5664_v19  ;;  %v5701_v19 = vld [vmem:[%s6588_s5 + $0xf0] sm:$0xff]  }
0x1000   : > { %v3305_v57 = vpop.xlane.xlu0 %3304 }
0x1001   : > { %v3307_v58 = vsub.f32 %v3298_v48, %v3305_v57  ;;  %v5680_v48 = vld [vmem:[%s6583_s2 + $0xd0] ss:$8 sps:$4 sm:$0xff]  }
0x1003   : > { %v3310_v59 = vmul.f32 1.442695, %v3307_v58 }
0x1005   : > { %5743 = vpow2.f32 %v3310_v59 }
0x100f   : > { %v5744_v54 = vpop.eup %5743 }
0x1010   : > { %v3315_v60 = vsel %vm1837_vm6, %v5744_v54, 0.0 }
0x1011   : > { %3316 = vadd.xlane.f32.xlu0 %v3315_v60 }
0x1089   : > { %v3363_v4 = vpop.f32.mrb[44].mxu1 }
0x108a   : > { %v5381_v5 = vpop.f32.mrb[45].mxu1  ;;  %v3369_v18 = vpack.c.bf16 %v3363_v4, %v3363_v4 }
0x108b   : > { %v3366_v6 = vpop.f32.mrb[46].mxu1  ;;  %v5689_v5 = vld [vmem:[%s6588_s5 + $0xc0] sm:$0xff]  }
0x108c   : > { %v5382_v8 = vpop.f32.mrb[47].mxu1  ;;  %v5690_v6 = vld [vmem:[%s6588_s5 + $0x80] sm:$0xff]  }
0x108d   : > { %v5691_v8 = vld [vmem:[%s6588_s5 + $0xc8] sm:$0xff]  }
0x109e   : > { %v3317_v9 = vpop.xlane.xlu0 %3316 }
0x109f   : > { %5745 = vrcp.f32 %v3317_v9  ;;  %v5692_v9 = vld [vmem:[%s6588_s5 + $0x88] sm:$0xff]  }
0x10a9   : > { %v5746_v11 = vpop.eup %5745 }
0x10aa   : > { %v3321_v7 = vmul.f32 %v5746_v11, %v5744_v54  ;;  %v4751_v54 = vld [vmem:[%s6585_s16 + $0x1] ss:$0 sm:$0xff]  ;;  %v5693_v11 = vld [vmem:[%s6588_s5 + $0xd0] sm:$0xff]  }
0x10ac   : > { %v3379_v14 = vpack.c.bf16 %v3321_v7, %v3321_v7  ;;  %v5694_v7 = vld [vmem:[%s6588_s5 + $0x90] sm:$0xff]  }
0x10ae   : > { %5386 = vmatmul.mubr.msk.bf16.vlgmr.msra.gmra.mrb[48].mxu0 %vm1837_vm6, %v3379_v14  ;;  %v5696_v14 = vld [vmem:[%s6588_s5 + $0x98] sm:$0xff]  }
0x10af   : > { %5402 = vmatpush3.bf16.msra.mxu0 %v5657_v13  ;;  %5409 = vmatprep.mubr.msk.bf16.mxu0 %vm5812_vm1, %v5811_v2  ;;  %v5695_v13 = vld [vmem:[%s6588_s5 + $0xd8] sm:$0xff]  }
0x10b0   : > { %5403 = vmatprep.subr.bf16.mxu0 %v5811_v2 }
0x10b3   : > { %5404 = vmatpush3.bf16.msra.mxu0 %v5658_v15  ;;  %v5697_v15 = vld [vmem:[%s6588_s5 + $0xe0] sm:$0xff]  }
0x10b4   : > { %5405 = vmatprep.subr.bf16.mxu0 %v5811_v2 }
0x10b7   : > { %5406 = vmatpush3.bf16.msra.mxu0 %v5659_v16  ;;  %v5698_v16 = vld [vmem:[%s6588_s5 + $0xa0] sm:$0xff]  }
0x10b8   : > { %5407 = vmatprep.subr.bf16.mxu0 %v5811_v2 }
0x10bb   : > { %5408 = vmatpush3.bf16.msra.mxu0 %v5660_v17  ;;  %v5699_v17 = vld [vmem:[%s6588_s5 + $0xe8] sm:$0xff]  }
0x10bc   : > { %5029 = vmatprep.subr.bf16.mxu0 %v5689_v5  ;;  %v5711_v5 = vld [vmem:[%s6598_s1 + $0x30] sm:$0xff]  }
0x10be   : > { %5410 = vmatmul.mubr.msk.bf16.vlgmr.msra.gmra.mrb[52].mxu0 %vm1391_vm5, %v3369_v18  ;;  %v5700_v18 = vld [vmem:[%s6588_s5 + $0xa8] sm:$0xff]  }
0x10bf   : > { %5030 = vmatpush3.bf16.msra.mxu0 %v5690_v6  ;;  %v5712_v6 = vld [vmem:[%s6598_s1 + $0x38] sm:$0xff]  }
0x10c0   : > { %5031 = vmatprep.subr.bf16.mxu0 %v5691_v8  ;;  %v5713_v8 = vld [vmem:[%s5951_s12] sm:$0xff]  }
0x10c3   : > { %5032 = vmatpush3.bf16.msra.mxu0 %v5692_v9  ;;  %v5714_v9 = vld [vmem:[%s5951_s12 + $0x8] sm:$0xff]  }
0x10c4   : > { %5033 = vmatprep.subr.bf16.mxu0 %v5693_v11  ;;  %v5715_v11 = vld [vmem:[%s5951_s12 + $0x10] sm:$0xff]  }
0x10c7   : > { %5034 = vmatpush3.bf16.msra.mxu0 %v5694_v7  ;;  %v5716_v7 = vld [vmem:[%s5951_s12 + $0x18] sm:$0xff]  }
0x10c8   : > { %5035 = vmatprep.subr.bf16.mxu0 %v5695_v13 }
0x10cb   : > { %5036 = vmatpush3.bf16.msra.mxu0 %v5696_v14 }
0x10cc   : > { %5037 = vmatprep.subr.bf16.mxu0 %v5697_v15 }
0x10cf   : > { %5038 = vmatpush3.bf16.msra.mxu0 %v5698_v16 }
0x10d0   : > { %5039 = vmatprep.subr.bf16.mxu0 %v5699_v17  ;;  %v4838_v17 = vld [vmem:[%s6594_s17 + $0x1] ss:$0 sm:$0xff] }
0x10d3   : > { %5040 = vmatpush3.bf16.msra.mxu0 %v5700_v18 }
0x10d4   : > { %5041 = vmatprep.subr.bf16.mxu0 %v5701_v19  ;;  %v4839_v19 = vld [vmem:[%s6596_s21 + $0x1] ss:$0 sm:$0xff] }
0x1181   : > { %v3420_v51 = vpop.f32.mrb[48].mxu0 }
0x1182   : > { %v3426_v20 = vpack.c.bf16 %v3420_v51, %v3420_v51  ;;  %v5387_v21 = vpop.f32.mrb[49].mxu0  ;;  %v5702_v51 = vld [vmem:[%s6588_s5 + $0xb0] sm:$0xff]  }
0x1183   : > { %v3423_v22 = vpop.f32.mrb[50].mxu0  ;;  %5042 = vmatpush3.bf16.msra.mxu0 %v5702_v51  ;;  %v5704_v21 = vld [vmem:[%s6588_s5 + $0xb8] sm:$0xff]  }
0x1184   : > { %v5388_v23 = vpop.f32.mrb[51].mxu0  ;;  %5398 = vmatmul.mubr.msk.bf16.vlgmr.msra.gmra.mrb[48].mxu1 %vm1391_vm5, %v3426_v20  ;;  %v5703_v20 = vld [vmem:[%s6588_s5 + $0xf8] sm:$0xff]   ;;  %v4769_v22 = vld [vmem:[%s6590_s9 + $0x2] sm:$0x3] }
0x1185   : > { %3752 = vmatprep.mubr.bf16.mxu1 %v5810_v1  ;;  %v5667_v1 = vld [vmem:[%s6583_s2 + $0x84] ss:$8 sps:$4 sm:$0xff]   ;;  %5043 = vmatprep.subr.bf16.mxu0 %v5703_v20  ;;  %v3633_v23 = vrot.slane %v4769_v22, %v2165_v62 }
0x1186   : > { %3720 = vmatprep.subr.bf16.mxu1 %v5667_v1 }
0x1187   : > { %3721 = vmatpush1.bf16.msra.mxu1 %v5665_v35  ;;  %5044 = vmatpush3.bf16.msra.mxu0 %v5704_v21 }
0x1188   : > { %3722 = vmatprep.subr.bf16.mxu1 %v5670_v36  ;;  %5433 = vmatprep.subr.bf16.mxu0 %v5811_v2 }
0x118b   : > { %3723 = vmatpush1.bf16.msra.mxu1 %v5668_v37 }
0x118c   : > { %3724 = vmatprep.subr.bf16.mxu1 %v5673_v38 }
0x118f   : > { %3725 = vmatpush1.bf16.msra.mxu1 %v5671_v39 }
0x1190   : > { %3726 = vmatprep.subr.bf16.mxu1 %v5676_v41 }
0x1191   : > { %v3564_v24 = vpop.f32.mrb[52].mxu0 }
0x1192   : > { %v5411_v12 = vpop.f32.mrb[53].mxu0 }
0x1193   : > { %v3567_v25 = vpop.f32.mrb[54].mxu0  ;;  %3727 = vmatpush1.bf16.msra.mxu1 %v5674_v44 }
0x1194   : > { %v5412_v26 = vpop.f32.mrb[55].mxu0  ;;  %3728 = vmatprep.subr.bf16.mxu1 %v5679_v45 }
0x1197   : > { %3729 = vmatpush1.bf16.msra.mxu1 %v5677_v46  ;;  %v4819_v46 = vld [vmem:[%s6592_s13 + $0x1] ss:$0 sm:$0xff] }
0x1198   : > { %3730 = vmatprep.subr.bf16.mxu1 %v5682_v47 }
0x119b   : > { %3731 = vmatpush1.bf16.msra.mxu1 %v5680_v48 }
0x119c   : > { %3732 = vmatprep.subr.bf16.mxu1 %v5685_v49 }
0x119f   : > { %3733 = vmatpush1.bf16.msra.mxu1 %v5683_v50 }
0x11a0   : > { %3734 = vmatprep.subr.bf16.mxu1 %v5688_v52 }
0x11a3   : > { %3735 = vmatpush1.bf16.msra.mxu1 %v5686_v55 }
0x11a4   : > { %5413 = vmatprep.subr.bf16.mxu1 %v5811_v2 }
0x1257   : > { %v3497_v27 = vpop.f32.mrb[48].mxu1 }
0x1258   : > { %v3565_v29 = vadd.f32 %v3564_v24, %v3497_v27  ;;  %v5399_v30 = vpop.f32.mrb[49].mxu1  ;;  %v3637_v24 = vrot.slane %v4769_v22, %v2169_v0  ;;  %v5717_v22 = vld [vmem:[%s5951_s12 + $0x20] sm:$0xff]  }
0x1259   : > { %v3500_v31 = vpop.f32.mrb[50].mxu1 }
0x125a   : > { %v3578_v32 = vadd.f32 %v4748_v28, %v3565_v29  ;;  %v5400_v33 = vpop.f32.mrb[51].mxu1 }
0x125c   : > { %v3579_v34 = vadd.f32 %v3578_v32, %v6295_v10 }
0x125e   : > { %3584 = vadd.xlane.f32.xlu1 %v3579_v34 }
0x12eb   : > { %v3585_v10 = vpop.xlane.xlu1 %3584 }
0x12ec   : > { %v3586_v40 = vmul.f32 0.0078125, %v3585_v10 }
0x12ee   : > { %v3587_v42 = vsub.f32 %v3579_v34, %v3586_v40 }
0x12f0   : > { %v3588_v43 = vmul.f32 %v3587_v42, %v3587_v42 }
0x12f2   : > { %3589 = vadd.xlane.f32.xlu0 %v3588_v43 }
0x137f   : > { %v3590_v56 = vpop.xlane.xlu0 %3589 }
0x1380   : > { %v3591_v57 = vmul.f32 0.0078125, %v3590_v56  ;;  %v5705_v56 = vld [vmem:[%s6597_s11] sm:$0xff]   ;;  %s933_s11 = scalar_lea.vmem %s5966_s4, %s6002_s26 }
0x1382   : > { %v3592_v58 = vadd.f32 1e-12, %v3591_v57  ;;  %v5706_v57 = vld [vmem:[%s6598_s1 + $0x8] sm:$0xff]  }
0x1384   : > { %5747 = vrsqrt.f32 %v3592_v58 }
0x138e   : > { %v5748_v59 = vpop.eup %5747 }
0x138f   : > { %v3594_v60 = vmul.f32 %v5748_v59, %v3587_v42 }
0x1391   : > { %v3601_v63 = vmul.f32 %v4751_v54, %v3594_v60 }
0x1393   : > { %v6455_v3 = vadd.f32 %v4752_v61, %v3601_v63  ;;  %v5707_v61 = vld [vmem:[%s6598_s1 + $0x10] sm:$0xff]   ;;  %v5708_v63 = vld [vmem:[%s6598_s1 + $0x18] sm:$0xff]  }
0x1395   : > { %v3609_v4 = vpack.c.bf16 %v6455_v3, %v6455_v3 }
0x1397   : > { %3753 = vmatmul.mubr.bf16.vlgmr.msra.gmra.mrb[52].mxu1 %v3609_v4  ;;  %v5710_v4 = vld [vmem:[%s6598_s1 + $0x28] sm:$0xff]  }
0x1398   : > { %5429 = vmatprep.mubr.msk.bf16.mxu1 %vm5812_vm1, %v5811_v2  ;;  %5414 = vmatpush3.bf16.msra.mxu1 %v5705_v56 }
0x1399   : > { %5415 = vmatprep.subr.bf16.mxu1 %v5811_v2 }
0x139c   : > { %5416 = vmatpush3.bf16.msra.mxu1 %v5706_v57 }
0x139d   : > { %5417 = vmatprep.subr.bf16.mxu1 %v5811_v2 }
0x13a0   : > { %5418 = vmatpush3.bf16.msra.mxu1 %v5707_v61 }
0x13a1   : > { %5419 = vmatprep.subr.bf16.mxu1 %v5811_v2 }
0x13a4   : > { %5420 = vmatpush3.bf16.msra.mxu1 %v5708_v63 }
0x13a5   : > { %5421 = vmatprep.subr.bf16.mxu1 %v5811_v2 }
0x146a   : > { %v3754_v12 = vpop.f32.mrb[52].mxu1 }
0x146b   : > { %v3755_v25 = vadd.f32 %v3754_v12, %v3633_v23  ;;  %v3756_v26 = vpop.f32.mrb[53].mxu1  ;;  %v5718_v23 = vld [vmem:[%s5951_s12 + $0x28] sm:$0xff]   ;;  %v5720_v12 = vld [vmem:[%s5951_s12 + $0x38] sm:$0xff]  }
0x146c   : > { %v3757_v27 = vadd.f32 %v3756_v26, %v3637_v24  ;;  %v3758_v28 = vpop.f32.mrb[54].mxu1  ;;  %v5719_v24 = vld [vmem:[%s5951_s12 + $0x30] sm:$0xff]  }
0x146d   : > { %v3761_v29 = vmul.f32 %v3755_v25, %v3755_v25  ;;  %v3759_v30 = vpop.f32.mrb[55].mxu1 }
0x146e   : > { %v3762_v31 = vmul.f32 %v3757_v27, %v3757_v27 }
0x146f   : > { %v3763_v32 = vmul.f32 %v3761_v29, %v3755_v25 }
0x1470   : > { %v3764_v33 = vmul.f32 %v3762_v31, %v3757_v27 }
0x1471   : > { %v3765_v34 = vmul.f32 0.044715, %v3763_v32 }
0x1472   : > { %v3766_v35 = vmul.f32 0.044715, %v3764_v33  ;;  %v4114_v33 = vld [vmem:[%s5956_s20] sm:$0x1] }
0x1473   : > { %v3767_v1 = vadd.f32 %v3765_v34, %v3755_v25 }
0x1474   : > { %v3768_v36 = vadd.f32 %v3766_v35, %v3757_v27 }
0x1475   : > { %v3769_v37 = vmul.f32 0.7978846, %v3767_v1 }
0x1476   : > { %v3770_v38 = vmul.f32 0.7978846, %v3768_v36 }
0x1477   : > { %5749 = vtanh.f32 %v3769_v37  ;;  %v4248_v37 = vld [vmem:[%s6065_s18] sm:$0xff] (%p5993_p4) }
0x1478   : > { %5751 = vtanh.f32 %v3770_v38  ;;  %v4250_v38 = vld [vmem:[%s6065_s18 + $0x8] sm:$0xff] (%p5993_p4) }
0x1481   : > { %v5750_v53 = vpop.eup %5749 }
0x1482   : > { %v5752_v62 = vpop.eup %5751  ;;  %v3773_v0 = vadd.f32 1.0, %v5750_v53 }
0x1483   : > { %v3774_v39 = vadd.f32 1.0, %v5752_v62 }
0x1484   : > { %v3775_v10 = vmul.f32 0.5, %v3773_v0 }
0x1485   : > { %v3776_v40 = vmul.f32 0.5, %v3774_v39 }
0x1486   : > { %v3777_v42 = vmul.f32 %v3775_v10, %v3755_v25  ;;  %v4007_v25 = vld [vmem:[%s6599_s7] sm:$0x1]  ;;  %s4857_s7 = sshll.u32 (%p5993_p4), %s5981_s0, 3 }
0x1487   : > { %v3778_v43 = vmul.f32 %v3776_v40, %v3757_v27  ;;  %s4216_s26 = scalar_lea.vmem (%p5993_p4), %s5961_s27, %s4857_s7 }
0x1488   : > { %v3779_v44 = vpack.c.bf16 %v3777_v42, %v3777_v42  ;;  %4249 = vst [vmem:[%s4216_s26] sm:$0xff] (%p5993_p4), %v4248_v37  ;;  %4251 = vst [vmem:[%s4216_s26 + $0x10] sm:$0xff] (%p5993_p4), %v4250_v38 }
0x1489   : > { %v3780_v41 = vpack.c.bf16 %v3778_v43, %v3778_v43 }
0x148b   : > { %3950 = vmatprep.mubr.bf16.mxu0 %v3780_v41 }
0x148c   : > { %3951 = vmatmul.mubr.bf16.vlgmr.msra.gmra.mrb[56].mxu0 %v3779_v44 }
0x148d   : > { %5449 = vmatprep.mubr.msk.bf16.mxu0 %vm5812_vm1, %v5811_v2  ;;  %5434 = vmatpush3.bf16.msra.mxu0 %v5713_v8 }
0x148e   : > { %5435 = vmatprep.subr.bf16.mxu0 %v5811_v2 }
0x1491   : > { %5436 = vmatpush3.bf16.msra.mxu0 %v5714_v9 }
0x1492   : > { %5437 = vmatprep.subr.bf16.mxu0 %v5811_v2 }
0x1495   : > { %5438 = vmatpush3.bf16.msra.mxu0 %v5715_v11 }
0x1496   : > { %5439 = vmatprep.subr.bf16.mxu0 %v5811_v2 }
0x1499   : > { %5440 = vmatpush3.bf16.msra.mxu0 %v5716_v7 }
0x149a   : > { %5441 = vmatprep.subr.bf16.mxu0 %v5811_v2 }
0x149d   : > { %5442 = vmatpush3.bf16.msra.mxu0 %v5717_v22 }
0x149e   : > { %5443 = vmatprep.subr.bf16.mxu0 %v5811_v2 }
0x14a1   : > { %5444 = vmatpush3.bf16.msra.mxu0 %v5718_v23 }
0x14a2   : > { %5445 = vmatprep.subr.bf16.mxu0 %v5811_v2 }
0x14a5   : > { %5446 = vmatpush3.bf16.msra.mxu0 %v5719_v24 }
0x14a6   : > { %5447 = vmatprep.subr.bf16.mxu0 %v5811_v2 }
0x14a9   : > { %5448 = vmatpush3.bf16.msra.mxu0 %v5720_v12 }
0x155f   : > { %v5045_v45 = vpop.f32.mrb[56].mxu0 }
0x1560   : > { %v5046_v47 = vpop.f32.mrb[57].mxu0 }
0x1561   : > { %v5047_v48 = vadd.f32 %v5046_v47, %v5045_v45  ;;  %v5048_v49 = vpop.f32.mrb[58].mxu0 }
0x1562   : > { %v5049_v50 = vpop.f32.mrb[59].mxu0 }
0x1563   : > { %v3953_v52 = vadd.f32 %v5047_v48, %v4819_v46 }
0x1565   : > { %v3958_v55 = vadd.f32 %v3953_v52, %v6455_v3  ;;  %v5709_v3 = vld [vmem:[%s6598_s1 + $0x20] sm:$0xff]  }
0x1566   : > { %5422 = vmatpush3.bf16.msra.mxu1 %v5709_v3 }
0x1567   : > { %3963 = vadd.xlane.f32.xlu1 %v3958_v55  ;;  %5423 = vmatprep.subr.bf16.mxu1 %v5811_v2 }
0x156a   : > { %5424 = vmatpush3.bf16.msra.mxu1 %v5710_v4 }
0x156b   : > { %5425 = vmatprep.subr.bf16.mxu1 %v5811_v2 }
0x156e   : > { %5426 = vmatpush3.bf16.msra.mxu1 %v5711_v5 }
0x156f   : > { %5427 = vmatprep.subr.bf16.mxu1 %v5811_v2 }
0x1572   : > { %5428 = vmatpush3.bf16.msra.mxu1 %v5712_v6 }
0x15f4   : > { %v3964_v58 = vpop.xlane.xlu1 %3963 }
0x15f5   : > { %v3965_v59 = vmul.f32 0.0078125, %v3964_v58 }
0x15f7   : > { %v3966_v54 = vsub.f32 %v3958_v55, %v3965_v59 }
0x15f9   : > { %v3967_v60 = vmul.f32 %v3966_v54, %v3966_v54 }
0x15fb   : > { %3968 = vadd.xlane.f32.xlu0 %v3967_v60 }
0x1688   : > { %v3969_v13 = vpop.xlane.xlu0 %3968 }
0x1689   : > { %v3970_v14 = vmul.f32 0.0078125, %v3969_v13 }
0x168b   : > { %v3971_v15 = vadd.f32 1e-12, %v3970_v14 }
0x168d   : > { %5753 = vrsqrt.f32 %v3971_v15 }
0x1697   : > { %v5754_v16 = vpop.eup %5753 }
0x1698   : > { %v3973_v18 = vmul.f32 %v5754_v16, %v3966_v54 }
0x169a   : > { %v3980_v51 = vmul.f32 %v4838_v17, %v3973_v18 }
0x169c   : > { %v3987_v20 = vadd.f32 %v4839_v19, %v3980_v51 }
0x169e   : > { %4840 = vst [vmem:[%s6065_s18 + $0x10] sm:$0xff] %v3987_v20  ;;  %v3990_v21 = vpack.c.bf16 %v3987_v20, %v3987_v20 }
0x16a0   : > { %5430 = vmatmul.mubr.bf16.vlgmr.msra.gmra.mrb[56].mxu1 %v3990_v21 }
0x16a5   : > { %v4252_v53 = vld [vmem:[%s6065_s18 + $0x10] sm:$0xff] (%p5993_p4) }
0x16a6   : > { %4253 = vst [vmem:[%s4216_s26 + $0x20] sm:$0xff] (%p5993_p4), %v4252_v53 }
0x1773   : > { %v4090_v26 = vpop.f32.mrb[56].mxu1 }
0x1774   : > { %v4091_v27 = vadd.f32 %v4090_v26, %v4007_v25  ;;  %v5431_v28 = vpop.f32.mrb[57].mxu1 }
0x1775   : > { %v4093_v29 = vpop.f32.mrb[58].mxu1 }
0x1776   : > { %5755 = vtanh.f32 %v4091_v27  ;;  %v5432_v30 = vpop.f32.mrb[59].mxu1 }
0x1780   : > { %v5756_v31 = vpop.eup %5755 }
0x1781   : > { %v4097_v32 = vpack.c.bf16 %v5756_v31, %v5756_v31 }
0x1783   : > { %5450 = vmatmul.mubr.bf16.vlgmr.msra.gmra.mrb[60].mxu0 %v4097_v32 }
0x1853   : > { %4214 = sbr.rel (!%p5993_p4) target bundleno = 6234 (0x185a), region = 136 }
0x1856   : > { %v4197_v34 = vpop.f32.mrb[60].mxu0 }
0x1857   : > { %v4198_v35 = vadd.f32 %v4197_v34, %v4114_v33  ;;  %v5451_v1 = vpop.f32.mrb[61].mxu0 }
0x1858   : > { %v4200_v36 = vpop.f32.mrb[62].mxu0 }
0x1859   : > { %4204 = vst.msk [vmem:[%s933_s11] sm:$0x1] %vm4203_vm8, %v4198_v35  ;;  %v5452_v2 = vpop.f32.mrb[63].mxu0 }
0x185a PF: > { %p67_p8 = scmp.ge.s32.totalorder %s5983_s15, 4   ;;  %s6600_s7 = smov %s5775_s10 }
0x185b   : > { %s6601_s10 = smov %s5991_s22  ;;  %s6602_s11 = smov %s5983_s15 }
0x185c   :  { %69 = sbr.rel (!%p67_p8) target bundleno = 57 (0x39), region = 279 }

</bundles_post_ra>
